<compile_context>
chip_gen: v6e
topology: v6e:2x2x1
jax: 0.10.0
libtpu: 0.0.40
codegen_flags: <defaults>
</compile_context>

<pallas_src>
import functools

import jax
import jax.numpy as jnp
from jax.experimental import pallas as pl
from jax.experimental.pallas import tpu as pltpu


def _residual_attention_block_kernel(
    x_ref, mask_ref,
    ln1_g_ref, ln1_b_ref,
    wqkv_ref, bqkv_ref,
    wo_ref, bo_ref,
    ln2_g_ref, ln2_b_ref,
    wfc_ref, bfc_ref,
    wpr_ref, bpr_ref,
    o_ref,
    ctx_ref,
    *, n_head: int, head_dim: int, seq_len: int, mlp_chunk: int,
):
    mxu = jnp.bfloat16
    rows, d_model = x_ref.shape            # rows = nb * seq_len
    L = seq_len
    nb = rows // L

    x = x_ref[...].astype(jnp.float32)                         # (nb*L, D) residual path, f32
    # True (1.0) = padded key -> large negative additive bias over the key axis.
    # NOTE: a fully padded key row yields a uniform softmax where PyTorch
    # nn.MultiheadAttention would produce NaN (benign divergence).
    bias = jnp.where(mask_ref[...] > 0.5, -1e30, 0.0)           # (nb, 1, L) f32

    def layer_norm(v, g, beta):
        # One-pass statistics: a single pair of lane-axis reductions instead of
        # mean followed by centered variance.
        mu = jnp.mean(v, axis=-1, keepdims=True)
        ms = jnp.mean(v * v, axis=-1, keepdims=True)
        var = ms - mu * mu
        return (v - mu) * jax.lax.rsqrt(var + 1e-5) * g + beta

    # ---------------- attention branch ----------------
    xn = layer_norm(x, ln1_g_ref[0], ln1_b_ref[0])
    # 1/sqrt(head_dim) is already folded into the q rows of wqkv/bqkv (wrapper).
    qkv = jnp.dot(xn.astype(mxu), wqkv_ref[...],
                  preferred_element_type=jnp.float32) + bqkv_ref[0]   # (nb*L, 3D) f32

    # One bf16 cast, then a batch-split view for per-head batched attention.
    qkv_b = qkv.astype(mxu).reshape(nb, L, 3 * d_model)          # (nb, L, 3D) bf16

    for h in range(n_head):                                      # static head loop
        c0 = h * head_dim
        q_h = qkv_b[:, :, c0:c0 + head_dim]                      # (nb, L, hd)
        k_h = qkv_b[:, :, d_model + c0:d_model + c0 + head_dim]
        v_h = qkv_b[:, :, 2 * d_model + c0:2 * d_model + c0 + head_dim]

        s = jnp.einsum('bqd,bkd->bqk', q_h, k_h,
                       preferred_element_type=jnp.float32)       # (nb, L, L) f32
        s = s + bias                                             # broadcast over queries
        s = s - jnp.max(s, axis=-1, keepdims=True)
        p = jnp.exp(s)
        p = p * pl.reciprocal(jnp.sum(p, axis=-1, keepdims=True), approx=True)
        ctx_h = jnp.einsum('bqk,bkd->bqd', p.astype(mxu), v_h,
                           preferred_element_type=jnp.float32)   # (nb, L, hd) f32
        # Write this head's context straight into its lane slice of the scratch —
        # avoids per-head stacks/concats and bounds live score tiles to one head.
        ctx_ref[:, c0:c0 + head_dim] = ctx_h.reshape(rows, head_dim)

    attn = jnp.dot(ctx_ref[...].astype(mxu), wo_ref[...],
                   preferred_element_type=jnp.float32) + bo_ref[0]
    x1 = x + attn                                                # (nb*L, D) f32

    # ---------------- MLP branch (chunked over the 4D hidden dim) ----------------
    xn2 = layer_norm(x1, ln2_g_ref[0], ln2_b_ref[0]).astype(mxu)
    hidden = wfc_ref.shape[1]
    mlp = jnp.zeros((rows, d_model), jnp.float32)
    for c0 in range(0, hidden, mlp_chunk):
        c1 = min(c0 + mlp_chunk, hidden)
        h = jnp.dot(xn2, wfc_ref[:, c0:c1],
                    preferred_element_type=jnp.float32) + bfc_ref[0, c0:c1]
        h = h * jax.nn.sigmoid(1.702 * h)                        # QuickGELU (f32)
        mlp = mlp + jnp.dot(h.astype(mxu), wpr_ref[c0:c1, :],
                            preferred_element_type=jnp.float32)
    mlp = mlp + bpr_ref[0]

    o_ref[...] = (x1 + mlp).astype(o_ref.dtype)


def _pick_block_batch(n, seq_len, n_head, *, row_target=512, score_budget=24 << 20):
    """Pick nb so M = nb*Lp ~ row_target rows while one (nb, Lp, Lp) f32 score tile
    stays under score_budget.  seq_len is already padded to a multiple of 8, so any
    divisor of n gives a tile-legal block."""
    by_rows = max(1, row_target // max(seq_len, 1))
    by_scores = max(1, score_budget // max(1, seq_len * seq_len * 4))
    target = max(1, min(n, 8, by_rows, by_scores))
    for cand in range(target, 0, -1):
        if n % cand == 0:
            return cand
    return 1


def residual_attention_block(x_lnd, padding_mask, params, n_head, *, block_batch=None):
    """x_lnd: (L, N, D) seq-first (PyTorch layout); padding_mask: (N, L) bool, True = padded."""
    L, N, D = x_lnd.shape
    head_dim = D // n_head
    hidden = 4 * D
    mxu = jnp.bfloat16

    # Pad the sequence length to a multiple of 8 so (nb*Lp, D) blocks are tile-legal
    # for any nb.  Padded positions are masked as keys and sliced off at the end.
    Lp = -(-L // 8) * 8
    x_nld = jnp.transpose(x_lnd, (1, 0, 2))                      # (N, L, D)
    mask_nl = padding_mask
    if Lp != L:
        x_nld = jnp.pad(x_nld, ((0, 0), (0, Lp - L), (0, 0)))
        mask_nl = jnp.pad(padding_mask, ((0, 0), (0, Lp - L)), constant_values=True)

    nb = block_batch if block_batch is not None else _pick_block_batch(N, Lp, n_head)
    assert N % nb == 0, "block_batch must divide the batch size"
    mlp_chunk = min(hidden, 1024)
    rows = nb * Lp

    x2d = x_nld.reshape(N * Lp, D)
    mask_f = mask_nl.astype(jnp.float32).reshape(N, 1, Lp)

    # Fold 1/sqrt(head_dim) into the q rows of the in-projection (free at trace time).
    scale_vec = jnp.concatenate([
        jnp.full((D,), 1.0 / (head_dim ** 0.5), jnp.float32),
        jnp.ones((2 * D,), jnp.float32)])
    wqkv_t = (params["in_proj_w"].astype(jnp.float32) * scale_vec[:, None]).T.astype(mxu)
    bqkv = (params["in_proj_b"].astype(jnp.float32) * scale_vec).reshape(1, 3 * D)
    wo_t = params["out_proj_w"].T.astype(mxu)
    wfc_t = params["c_fc_w"].T.astype(mxu)
    wpr_t = params["c_proj_w"].T.astype(mxu)
    ln1_g = params["ln1_g"].reshape(1, D).astype(jnp.float32)
    ln1_b = params["ln1_b"].reshape(1, D).astype(jnp.float32)
    ln2_g = params["ln2_g"].reshape(1, D).astype(jnp.float32)
    ln2_b = params["ln2_b"].reshape(1, D).astype(jnp.float32)
    bo = params["out_proj_b"].reshape(1, D).astype(jnp.float32)
    bfc = params["c_fc_b"].reshape(1, hidden).astype(jnp.float32)
    bpr = params["c_proj_b"].reshape(1, D).astype(jnp.float32)

    # VMEM budget: bf16 weights + activation/score/MLP-chunk working set, clamped to
    # the physical VMEM of the running chip (minus headroom).
    w_bytes = (D * 3 * D + D * D + 2 * D * hidden) * 2
    a_bytes = (rows * D * 4 * 8 + rows * 3 * D * 4
               + nb * Lp * Lp * 4 * 3 + rows * mlp_chunk * 4 * 2)
    try:
        vmem_cap = int(getattr(pltpu.get_tpu_info(), "vmem_capacity_bytes", 64 << 20))
    except Exception:
        vmem_cap = 64 << 20
    vmem_limit = min(max(2 * w_bytes + 2 * a_bytes + (8 << 20), 32 << 20),
                     vmem_cap - (4 << 20))
    vmem_limit = int(max(vmem_limit, 16 << 20))

    kernel = functools.partial(
        _residual_attention_block_kernel,
        n_head=n_head, head_dim=head_dim, seq_len=Lp, mlp_chunk=mlp_chunk)

    def run(single_buffer_weights):
        def wspec(shape):
            zeros = (0,) * len(shape)
            idx = lambda b: zeros
            if single_buffer_weights:
                # Constant index_map -> fetched once; single-buffer so the pipeline
                # does not double the weights' VMEM residency.
                return pl.BlockSpec(shape, idx, pipeline_mode=pl.Buffered(1))
            return pl.BlockSpec(shape, idx)

        return pl.pallas_call(
            kernel,
            out_shape=jax.ShapeDtypeStruct((N * Lp, D), x_lnd.dtype),
            grid=(N // nb,),
            in_specs=[
                pl.BlockSpec((rows, D), lambda b: (b, 0)),        # activations block
                pl.BlockSpec((nb, 1, Lp), lambda b: (b, 0, 0)),   # per-block key-padding mask
                wspec((1, D)), wspec((1, D)),                     # ln1 gamma / beta
                wspec((D, 3 * D)), wspec((1, 3 * D)),             # in_proj W^T / b (q-scaled)
                wspec((D, D)), wspec((1, D)),                     # out_proj W^T / b
                wspec((1, D)), wspec((1, D)),                     # ln2 gamma / beta
                wspec((D, hidden)), wspec((1, hidden)),           # c_fc W^T / b
                wspec((hidden, D)), wspec((1, D)),                # c_proj W^T / b
            ],
            out_specs=pl.BlockSpec((rows, D), lambda b: (b, 0)),
            scratch_shapes=[pltpu.VMEM((rows, D), jnp.float32)],  # attention context
            compiler_params=pltpu.CompilerParams(
                dimension_semantics=("parallel",),
                vmem_limit_bytes=vmem_limit),
        )(
            x2d, mask_f,
            ln1_g, ln1_b, wqkv_t, bqkv, wo_t, bo,
            ln2_g, ln2_b, wfc_t, bfc, wpr_t, bpr,
        )

    try:
        out2d = run(True)
    except Exception:
        # Older jax without BlockSpec.pipeline_mode / Buffered(1): fall back to the
        # default double-buffered weight blocks (identical results, more VMEM).
        out2d = run(False)

    out = jnp.transpose(out2d.reshape(N, Lp, D)[:, :L], (1, 0, 2))
    return out, padding_mask


def _reference(x_lnd, padding_mask, params, n_head):
    """Plain-JAX f32 reference mirroring PyTorch semantics (for correctness check)."""
    L, N, D = x_lnd.shape
    hd = D // n_head
    x = jnp.transpose(x_lnd, (1, 0, 2)).astype(jnp.float32)      # (N, L, D)

    def ln(v, g, b):
        mu = jnp.mean(v, -1, keepdims=True)
        var = jnp.mean((v - mu) ** 2, -1, keepdims=True)
        return (v - mu) / jnp.sqrt(var + 1e-5) * g + b

    xn = ln(x, params["ln1_g"], params["ln1_b"])
    qkv = xn @ params["in_proj_w"].T + params["in_proj_b"]
    q, k, v = qkv[..., :D], qkv[..., D:2 * D], qkv[..., 2 * D:]
    q = q.reshape(N, L, n_head, hd).transpose(0, 2, 1, 3) / (hd ** 0.5)
    k = k.reshape(N, L, n_head, hd).transpose(0, 2, 1, 3)
    v = v.reshape(N, L, n_head, hd).transpose(0, 2, 1, 3)
    s = jnp.einsum("nhqd,nhkd->nhqk", q, k)
    s = s + jnp.where(padding_mask[:, None, None, :], -1e30, 0.0)
    p = jax.nn.softmax(s, axis=-1)
    o = jnp.einsum("nhqk,nhkd->nhqd", p, v).transpose(0, 2, 1, 3).reshape(N, L, D)
    o = o @ params["out_proj_w"].T + params["out_proj_b"]
    x1 = x + o
    xn2 = ln(x1, params["ln2_g"], params["ln2_b"])
    h = xn2 @ params["c_fc_w"].T + params["c_fc_b"]
    h = h * jax.nn.sigmoid(1.702 * h)
    m = h @ params["c_proj_w"].T + params["c_proj_b"]
    return jnp.transpose(x1 + m, (1, 0, 2))


def _init_params(key, d_model):
    ks = jax.random.split(key, 10)
    std = 0.02
    return {
        "in_proj_w": std * jax.random.normal(ks[0], (3 * d_model, d_model), jnp.float32),
        "in_proj_b": std * jax.random.normal(ks[1], (3 * d_model,), jnp.float32),
        "out_proj_w": std * jax.random.normal(ks[2], (d_model, d_model), jnp.float32),
        "out_proj_b": std * jax.random.normal(ks[3], (d_model,), jnp.float32),
        "ln1_g": jnp.ones((d_model,), jnp.float32),
        "ln1_b": jnp.zeros((d_model,), jnp.float32),
        "ln2_g": jnp.ones((d_model,), jnp.float32),
        "ln2_b": jnp.zeros((d_model,), jnp.float32),
        "c_fc_w": std * jax.random.normal(ks[4], (4 * d_model, d_model), jnp.float32),
        "c_fc_b": std * jax.random.normal(ks[5], (4 * d_model,), jnp.float32),
        "c_proj_w": std * jax.random.normal(ks[6], (d_model, 4 * d_model), jnp.float32),
        "c_proj_b": std * jax.random.normal(ks[7], (d_model,), jnp.float32),
    }


if __name__ == "__main__":
    key = jax.random.PRNGKey(0)
    k_x, k_p, k_x2 = jax.random.split(key, 3)

    # Case 1: L multiple of 8; block_batch=2 exercises the pipelined 2-step grid.
    L, N, D, H = 8, 4, 32, 4   # seq, batch, d_model, n_head (head_dim = 8)
    x = jax.random.normal(k_x, (L, N, D), jnp.float32)           # seq-first like PyTorch
    padding_mask = jnp.array(
        [[False] * L,
         [False] * (L - 2) + [True, True],
         [False] * (L - 3) + [True, True, True],
         [False] * L], dtype=bool)                               # (N, L), True = padded
    params = _init_params(k_p, D)

    out, out_mask = residual_attention_block(x, padding_mask, params, H, block_batch=2)
    out = jax.block_until_ready(out)
    ref = _reference(x, padding_mask, params, H)
    assert out.shape == (L, N, D)
    err1 = float(jnp.max(jnp.abs(out - ref)))
    assert jnp.allclose(out, ref, rtol=2e-2, atol=2e-2), \
        f"case1 mismatch vs reference (max abs err {err1})"

    # Case 2: L not a multiple of 8 exercises the sequence-padding path + auto nb.
    L2, N2 = 7, 2
    x2 = jax.random.normal(k_x2, (L2, N2, D), jnp.float32)
    mask2 = jnp.array([[False] * L2,
                       [False] * (L2 - 3) + [True] * 3], dtype=bool)
    out2, _ = residual_attention_block(x2, mask2, params, H)
    out2 = jax.block_until_ready(out2)
    ref2 = _reference(x2, mask2, params, H)
    assert out2.shape == (L2, N2, D)
    err2 = float(jnp.max(jnp.abs(out2 - ref2)))
    assert jnp.allclose(out2, ref2, rtol=2e-2, atol=2e-2), \
        f"case2 mismatch vs reference (max abs err {err2})"

    print("KERNEL_OK")
</pallas_src>

<mosaic_0001>
module attributes {stable_mosaic.version = 11 : i64} {
  func.func @_residual_attention_block_kernel(%arg0: i32, %arg1: memref<16x32xf32, #tpu.memory_space<vmem>>, %arg2: memref<2x1x8xf32, #tpu.memory_space<vmem>>, %arg3: memref<1x32xf32, #tpu.memory_space<vmem>>, %arg4: memref<1x32xf32, #tpu.memory_space<vmem>>, %arg5: memref<32x96xbf16, #tpu.memory_space<vmem>>, %arg6: memref<1x96xf32, #tpu.memory_space<vmem>>, %arg7: memref<32x32xbf16, #tpu.memory_space<vmem>>, %arg8: memref<1x32xf32, #tpu.memory_space<vmem>>, %arg9: memref<1x32xf32, #tpu.memory_space<vmem>>, %arg10: memref<1x32xf32, #tpu.memory_space<vmem>>, %arg11: memref<32x128xbf16, #tpu.memory_space<vmem>>, %arg12: memref<1x128xf32, #tpu.memory_space<vmem>>, %arg13: memref<128x32xbf16, #tpu.memory_space<vmem>>, %arg14: memref<1x32xf32, #tpu.memory_space<vmem>>, %arg15: memref<16x32xf32, #tpu.memory_space<vmem>>, %arg16: memref<16x32xf32, #tpu.memory_space<vmem>>) attributes {dimension_semantics = [#tpu.dimension_semantics<parallel>], iteration_bounds = array<i64: 2>, scalar_prefetch = 0 : i64, scratch_operands = 1 : i64, tpu.core_type = #tpu.core_type<tc>, window_params = [{transform_indices = @transform_0, window_bounds = array<i64: 16, 32>}, {transform_indices = @transform_1, window_bounds = array<i64: 2, 1, 8>}, {pipeline_mode = #tpu.pipeline_mode<synchronous>, transform_indices = @transform_2, window_bounds = array<i64: 1, 32>}, {pipeline_mode = #tpu.pipeline_mode<synchronous>, transform_indices = @transform_3, window_bounds = array<i64: 1, 32>}, {pipeline_mode = #tpu.pipeline_mode<synchronous>, transform_indices = @transform_4, window_bounds = array<i64: 32, 96>}, {pipeline_mode = #tpu.pipeline_mode<synchronous>, transform_indices = @transform_5, window_bounds = array<i64: 1, 96>}, {pipeline_mode = #tpu.pipeline_mode<synchronous>, transform_indices = @transform_6, window_bounds = array<i64: 32, 32>}, {pipeline_mode = #tpu.pipeline_mode<synchronous>, transform_indices = @transform_7, window_bounds = array<i64: 1, 32>}, {pipeline_mode = #tpu.pipeline_mode<synchronous>, transform_indices = @transform_8, window_bounds = array<i64: 1, 32>}, {pipeline_mode = #tpu.pipeline_mode<synchronous>, transform_indices = @transform_9, window_bounds = array<i64: 1, 32>}, {pipeline_mode = #tpu.pipeline_mode<synchronous>, transform_indices = @transform_10, window_bounds = array<i64: 32, 128>}, {pipeline_mode = #tpu.pipeline_mode<synchronous>, transform_indices = @transform_11, window_bounds = array<i64: 1, 128>}, {pipeline_mode = #tpu.pipeline_mode<synchronous>, transform_indices = @transform_12, window_bounds = array<i64: 128, 32>}, {pipeline_mode = #tpu.pipeline_mode<synchronous>, transform_indices = @transform_13, window_bounds = array<i64: 1, 32>}, {transform_indices = @transform_14, window_bounds = array<i64: 16, 32>}]} {
    %c0 = arith.constant 0 : index
    %c0_0 = arith.constant 0 : index
    %0 = vector.load %arg1[%c0, %c0_0] : memref<16x32xf32, #tpu.memory_space<vmem>>, vector<16x32xf32>
    %c0_1 = arith.constant 0 : index
    %c0_2 = arith.constant 0 : index
    %c0_3 = arith.constant 0 : index
    %1 = vector.load %arg2[%c0_1, %c0_2, %c0_3] : memref<2x1x8xf32, #tpu.memory_space<vmem>>, vector<2x1x8xf32>
    %cst = arith.constant 5.000000e-01 : f32
    %2 = vector.broadcast %cst : f32 to vector<2x1x8xf32>
    %3 = arith.cmpf ogt, %1, %2 : vector<2x1x8xf32>
    %cst_4 = arith.constant -1.000000e+30 : f32
    %cst_5 = arith.constant 0.000000e+00 : f32
    %4 = vector.broadcast %cst_4 : f32 to vector<2x1x8xf32>
    %5 = vector.broadcast %cst_5 : f32 to vector<2x1x8xf32>
    %6 = arith.select %3, %4, %5 : vector<2x1x8xi1>, vector<2x1x8xf32>
    %c0_6 = arith.constant 0 : index
    %c0_7 = arith.constant 0 : index
    %7 = vector.load %arg3[%c0_6, %c0_7] : memref<1x32xf32, #tpu.memory_space<vmem>>, vector<1x32xf32>
    %8 = vector.shape_cast %7 : vector<1x32xf32> to vector<32xf32>
    %c0_8 = arith.constant 0 : index
    %c0_9 = arith.constant 0 : index
    %9 = vector.load %arg4[%c0_8, %c0_9] : memref<1x32xf32, #tpu.memory_space<vmem>>, vector<1x32xf32>
    %10 = vector.shape_cast %9 : vector<1x32xf32> to vector<32xf32>
    %cst_10 = arith.constant dense<0.000000e+00> : vector<16xf32>
    %11 = vector.multi_reduction <add>, %0, %cst_10 [1] : vector<16x32xf32> to vector<16xf32>
    %12 = vector.shape_cast %11 : vector<16xf32> to vector<16x1xf32>
    %cst_11 = arith.constant 3.200000e+01 : f32
    %13 = vector.broadcast %cst_11 : f32 to vector<16x1xf32>
    %14 = arith.divf %12, %13 : vector<16x1xf32>
    %15 = arith.mulf %0, %0 : vector<16x32xf32>
    %cst_12 = arith.constant dense<0.000000e+00> : vector<16xf32>
    %16 = vector.multi_reduction <add>, %15, %cst_12 [1] : vector<16x32xf32> to vector<16xf32>
    %17 = vector.shape_cast %16 : vector<16xf32> to vector<16x1xf32>
    %cst_13 = arith.constant 3.200000e+01 : f32
    %18 = vector.broadcast %cst_13 : f32 to vector<16x1xf32>
    %19 = arith.divf %17, %18 : vector<16x1xf32>
    %20 = arith.mulf %14, %14 : vector<16x1xf32>
    %21 = arith.subf %19, %20 : vector<16x1xf32>
    %22 = vector.broadcast %14 : vector<16x1xf32> to vector<16x32xf32>
    %23 = arith.subf %0, %22 : vector<16x32xf32>
    %cst_14 = arith.constant 9.99999974E-6 : f32
    %24 = vector.broadcast %cst_14 : f32 to vector<16x1xf32>
    %25 = arith.addf %21, %24 : vector<16x1xf32>
    %26 = math.rsqrt %25 : vector<16x1xf32>
    %27 = vector.broadcast %26 : vector<16x1xf32> to vector<16x32xf32>
    %28 = arith.mulf %23, %27 : vector<16x32xf32>
    %29 = vector.shape_cast %8 : vector<32xf32> to vector<1x32xf32>
    %30 = vector.broadcast %29 : vector<1x32xf32> to vector<16x32xf32>
    %31 = arith.mulf %28, %30 : vector<16x32xf32>
    %32 = vector.shape_cast %10 : vector<32xf32> to vector<1x32xf32>
    %33 = vector.broadcast %32 : vector<1x32xf32> to vector<16x32xf32>
    %34 = arith.addf %31, %33 : vector<16x32xf32>
    %35 = arith.truncf %34 : vector<16x32xf32> to vector<16x32xbf16>
    %c0_15 = arith.constant 0 : index
    %c0_16 = arith.constant 0 : index
    %36 = vector.load %arg5[%c0_15, %c0_16] : memref<32x96xbf16, #tpu.memory_space<vmem>>, vector<32x96xbf16>
    %cst_17 = arith.constant dense<0.000000e+00> : vector<16x96xf32>
    %37 = tpu.matmul %35, %36, %cst_17 {dimension_numbers = #tpu.dot_dimension_numbers<[1], [0], [0], [1], [0, 0, 1, 1], [], []>} : vector<16x32xbf16>, vector<32x96xbf16>, vector<16x96xf32> -> vector<16x96xf32>
    %c0_18 = arith.constant 0 : index
    %c0_19 = arith.constant 0 : index
    %38 = vector.load %arg6[%c0_18, %c0_19] : memref<1x96xf32, #tpu.memory_space<vmem>>, vector<1x96xf32>
    %39 = vector.shape_cast %38 : vector<1x96xf32> to vector<96xf32>
    %40 = vector.shape_cast %39 : vector<96xf32> to vector<1x96xf32>
    %41 = vector.broadcast %40 : vector<1x96xf32> to vector<16x96xf32>
    %42 = arith.addf %37, %41 : vector<16x96xf32>
    %43 = arith.truncf %42 : vector<16x96xf32> to vector<16x96xbf16>
    %44 = vector.shape_cast %43 : vector<16x96xbf16> to vector<2x8x96xbf16>
    %45 = vector.extract_strided_slice %44 {offsets = [0, 0, 0], sizes = [2, 8, 8], strides = [1, 1, 1]} : vector<2x8x96xbf16> to vector<2x8x8xbf16>
    %46 = vector.extract_strided_slice %44 {offsets = [0, 0, 32], sizes = [2, 8, 8], strides = [1, 1, 1]} : vector<2x8x96xbf16> to vector<2x8x8xbf16>
    %47 = vector.extract_strided_slice %44 {offsets = [0, 0, 64], sizes = [2, 8, 8], strides = [1, 1, 1]} : vector<2x8x96xbf16> to vector<2x8x8xbf16>
    "tpu.trace_start"() <{level = 10 : i32, message = "bqd,bkd->bqk"}> : () -> ()
    %cst_20 = arith.constant dense<0.000000e+00> : vector<2x8x8xf32>
    %48 = tpu.matmul %45, %46, %cst_20 {dimension_numbers = #tpu.dot_dimension_numbers<[2], [2], [1], [1], [0, 0, 0, 1, 1, 1], [0], [0]>} : vector<2x8x8xbf16>, vector<2x8x8xbf16>, vector<2x8x8xf32> -> vector<2x8x8xf32>
    "tpu.trace_stop"() : () -> ()
    %49 = vector.broadcast %6 : vector<2x1x8xf32> to vector<2x8x8xf32>
    %50 = arith.addf %48, %49 : vector<2x8x8xf32>
    %cst_21 = arith.constant dense<0xFF800000> : vector<2x8xf32>
    %51 = vector.multi_reduction <maximumf>, %50, %cst_21 [2] : vector<2x8x8xf32> to vector<2x8xf32>
    %52 = vector.shape_cast %51 : vector<2x8xf32> to vector<2x8x1xf32>
    %53 = vector.broadcast %52 : vector<2x8x1xf32> to vector<2x8x8xf32>
    %54 = arith.subf %50, %53 : vector<2x8x8xf32>
    %55 = math.exp %54 : vector<2x8x8xf32>
    %cst_22 = arith.constant dense<0.000000e+00> : vector<2x8xf32>
    %56 = vector.multi_reduction <add>, %55, %cst_22 [2] : vector<2x8x8xf32> to vector<2x8xf32>
    %57 = vector.shape_cast %56 : vector<2x8xf32> to vector<2x8x1xf32>
    %58 = tpu.reciprocal %57 {approx = true} : vector<2x8x1xf32> -> vector<2x8x1xf32>
    %59 = vector.broadcast %58 : vector<2x8x1xf32> to vector<2x8x8xf32>
    %60 = arith.mulf %55, %59 : vector<2x8x8xf32>
    %61 = arith.truncf %60 : vector<2x8x8xf32> to vector<2x8x8xbf16>
    "tpu.trace_start"() <{level = 10 : i32, message = "bqk,bkd->bqd"}> : () -> ()
    %cst_23 = arith.constant dense<0.000000e+00> : vector<2x8x8xf32>
    %62 = tpu.matmul %61, %47, %cst_23 {dimension_numbers = #tpu.dot_dimension_numbers<[2], [1], [1], [2], [0, 0, 0, 1, 1, 2], [0], [0]>} : vector<2x8x8xbf16>, vector<2x8x8xbf16>, vector<2x8x8xf32> -> vector<2x8x8xf32>
    "tpu.trace_stop"() : () -> ()
    %63 = vector.shape_cast %62 : vector<2x8x8xf32> to vector<16x8xf32>
    %c0_24 = arith.constant 0 : index
    %c0_25 = arith.constant 0 : index
    %64 = vector.load %arg16[%c0_24, %c0_25] : memref<16x32xf32, #tpu.memory_space<vmem>>, vector<16x8xf32>
    tpu.vector_store %arg16[%c0_24, %c0_25], %63 {strides = array<i32>} : memref<16x32xf32, #tpu.memory_space<vmem>>, vector<16x8xf32>,
    %65 = vector.extract_strided_slice %44 {offsets = [0, 0, 8], sizes = [2, 8, 8], strides = [1, 1, 1]} : vector<2x8x96xbf16> to vector<2x8x8xbf16>
    %66 = vector.extract_strided_slice %44 {offsets = [0, 0, 40], sizes = [2, 8, 8], strides = [1, 1, 1]} : vector<2x8x96xbf16> to vector<2x8x8xbf16>
    %67 = vector.extract_strided_slice %44 {offsets = [0, 0, 72], sizes = [2, 8, 8], strides = [1, 1, 1]} : vector<2x8x96xbf16> to vector<2x8x8xbf16>
    "tpu.trace_start"() <{level = 10 : i32, message = "bqd,bkd->bqk"}> : () -> ()
    %cst_26 = arith.constant dense<0.000000e+00> : vector<2x8x8xf32>
    %68 = tpu.matmul %65, %66, %cst_26 {dimension_numbers = #tpu.dot_dimension_numbers<[2], [2], [1], [1], [0, 0, 0, 1, 1, 1], [0], [0]>} : vector<2x8x8xbf16>, vector<2x8x8xbf16>, vector<2x8x8xf32> -> vector<2x8x8xf32>
    "tpu.trace_stop"() : () -> ()
    %69 = vector.broadcast %6 : vector<2x1x8xf32> to vector<2x8x8xf32>
    %70 = arith.addf %68, %69 : vector<2x8x8xf32>
    %cst_27 = arith.constant dense<0xFF800000> : vector<2x8xf32>
    %71 = vector.multi_reduction <maximumf>, %70, %cst_27 [2] : vector<2x8x8xf32> to vector<2x8xf32>
    %72 = vector.shape_cast %71 : vector<2x8xf32> to vector<2x8x1xf32>
    %73 = vector.broadcast %72 : vector<2x8x1xf32> to vector<2x8x8xf32>
    %74 = arith.subf %70, %73 : vector<2x8x8xf32>
    %75 = math.exp %74 : vector<2x8x8xf32>
    %cst_28 = arith.constant dense<0.000000e+00> : vector<2x8xf32>
    %76 = vector.multi_reduction <add>, %75, %cst_28 [2] : vector<2x8x8xf32> to vector<2x8xf32>
    %77 = vector.shape_cast %76 : vector<2x8xf32> to vector<2x8x1xf32>
    %78 = tpu.reciprocal %77 {approx = true} : vector<2x8x1xf32> -> vector<2x8x1xf32>
    %79 = vector.broadcast %78 : vector<2x8x1xf32> to vector<2x8x8xf32>
    %80 = arith.mulf %75, %79 : vector<2x8x8xf32>
    %81 = arith.truncf %80 : vector<2x8x8xf32> to vector<2x8x8xbf16>
    "tpu.trace_start"() <{level = 10 : i32, message = "bqk,bkd->bqd"}> : () -> ()
    %cst_29 = arith.constant dense<0.000000e+00> : vector<2x8x8xf32>
    %82 = tpu.matmul %81, %67, %cst_29 {dimension_numbers = #tpu.dot_dimension_numbers<[2], [1], [1], [2], [0, 0, 0, 1, 1, 2], [0], [0]>} : vector<2x8x8xbf16>, vector<2x8x8xbf16>, vector<2x8x8xf32> -> vector<2x8x8xf32>
    "tpu.trace_stop"() : () -> ()
    %83 = vector.shape_cast %82 : vector<2x8x8xf32> to vector<16x8xf32>
    %c0_30 = arith.constant 0 : index
    %c8 = arith.constant 8 : index
    %84 = vector.load %arg16[%c0_30, %c8] : memref<16x32xf32, #tpu.memory_space<vmem>>, vector<16x8xf32>
    tpu.vector_store %arg16[%c0_30, %c8], %83 {strides = array<i32>} : memref<16x32xf32, #tpu.memory_space<vmem>>, vector<16x8xf32>,
    %85 = vector.extract_strided_slice %44 {offsets = [0, 0, 16], sizes = [2, 8, 8], strides = [1, 1, 1]} : vector<2x8x96xbf16> to vector<2x8x8xbf16>
    %86 = vector.extract_strided_slice %44 {offsets = [0, 0, 48], sizes = [2, 8, 8], strides = [1, 1, 1]} : vector<2x8x96xbf16> to vector<2x8x8xbf16>
    %87 = vector.extract_strided_slice %44 {offsets = [0, 0, 80], sizes = [2, 8, 8], strides = [1, 1, 1]} : vector<2x8x96xbf16> to vector<2x8x8xbf16>
    "tpu.trace_start"() <{level = 10 : i32, message = "bqd,bkd->bqk"}> : () -> ()
    %cst_31 = arith.constant dense<0.000000e+00> : vector<2x8x8xf32>
    %88 = tpu.matmul %85, %86, %cst_31 {dimension_numbers = #tpu.dot_dimension_numbers<[2], [2], [1], [1], [0, 0, 0, 1, 1, 1], [0], [0]>} : vector<2x8x8xbf16>, vector<2x8x8xbf16>, vector<2x8x8xf32> -> vector<2x8x8xf32>
    "tpu.trace_stop"() : () -> ()
    %89 = vector.broadcast %6 : vector<2x1x8xf32> to vector<2x8x8xf32>
    %90 = arith.addf %88, %89 : vector<2x8x8xf32>
    %cst_32 = arith.constant dense<0xFF800000> : vector<2x8xf32>
    %91 = vector.multi_reduction <maximumf>, %90, %cst_32 [2] : vector<2x8x8xf32> to vector<2x8xf32>
    %92 = vector.shape_cast %91 : vector<2x8xf32> to vector<2x8x1xf32>
    %93 = vector.broadcast %92 : vector<2x8x1xf32> to vector<2x8x8xf32>
    %94 = arith.subf %90, %93 : vector<2x8x8xf32>
    %95 = math.exp %94 : vector<2x8x8xf32>
    %cst_33 = arith.constant dense<0.000000e+00> : vector<2x8xf32>
    %96 = vector.multi_reduction <add>, %95, %cst_33 [2] : vector<2x8x8xf32> to vector<2x8xf32>
    %97 = vector.shape_cast %96 : vector<2x8xf32> to vector<2x8x1xf32>
    %98 = tpu.reciprocal %97 {approx = true} : vector<2x8x1xf32> -> vector<2x8x1xf32>
    %99 = vector.broadcast %98 : vector<2x8x1xf32> to vector<2x8x8xf32>
    %100 = arith.mulf %95, %99 : vector<2x8x8xf32>
    %101 = arith.truncf %100 : vector<2x8x8xf32> to vector<2x8x8xbf16>
    "tpu.trace_start"() <{level = 10 : i32, message = "bqk,bkd->bqd"}> : () -> ()
    %cst_34 = arith.constant dense<0.000000e+00> : vector<2x8x8xf32>
    %102 = tpu.matmul %101, %87, %cst_34 {dimension_numbers = #tpu.dot_dimension_numbers<[2], [1], [1], [2], [0, 0, 0, 1, 1, 2], [0], [0]>} : vector<2x8x8xbf16>, vector<2x8x8xbf16>, vector<2x8x8xf32> -> vector<2x8x8xf32>
    "tpu.trace_stop"() : () -> ()
    %103 = vector.shape_cast %102 : vector<2x8x8xf32> to vector<16x8xf32>
    %c0_35 = arith.constant 0 : index
    %c16 = arith.constant 16 : index
    %104 = vector.load %arg16[%c0_35, %c16] : memref<16x32xf32, #tpu.memory_space<vmem>>, vector<16x8xf32>
    tpu.vector_store %arg16[%c0_35, %c16], %103 {strides = array<i32>} : memref<16x32xf32, #tpu.memory_space<vmem>>, vector<16x8xf32>,
    %105 = vector.extract_strided_slice %44 {offsets = [0, 0, 24], sizes = [2, 8, 8], strides = [1, 1, 1]} : vector<2x8x96xbf16> to vector<2x8x8xbf16>
    %106 = vector.extract_strided_slice %44 {offsets = [0, 0, 56], sizes = [2, 8, 8], strides = [1, 1, 1]} : vector<2x8x96xbf16> to vector<2x8x8xbf16>
    %107 = vector.extract_strided_slice %44 {offsets = [0, 0, 88], sizes = [2, 8, 8], strides = [1, 1, 1]} : vector<2x8x96xbf16> to vector<2x8x8xbf16>
    "tpu.trace_start"() <{level = 10 : i32, message = "bqd,bkd->bqk"}> : () -> ()
    %cst_36 = arith.constant dense<0.000000e+00> : vector<2x8x8xf32>
    %108 = tpu.matmul %105, %106, %cst_36 {dimension_numbers = #tpu.dot_dimension_numbers<[2], [2], [1], [1], [0, 0, 0, 1, 1, 1], [0], [0]>} : vector<2x8x8xbf16>, vector<2x8x8xbf16>, vector<2x8x8xf32> -> vector<2x8x8xf32>
    "tpu.trace_stop"() : () -> ()
    %109 = vector.broadcast %6 : vector<2x1x8xf32> to vector<2x8x8xf32>
    %110 = arith.addf %108, %109 : vector<2x8x8xf32>
    %cst_37 = arith.constant dense<0xFF800000> : vector<2x8xf32>
    %111 = vector.multi_reduction <maximumf>, %110, %cst_37 [2] : vector<2x8x8xf32> to vector<2x8xf32>
    %112 = vector.shape_cast %111 : vector<2x8xf32> to vector<2x8x1xf32>
    %113 = vector.broadcast %112 : vector<2x8x1xf32> to vector<2x8x8xf32>
    %114 = arith.subf %110, %113 : vector<2x8x8xf32>
    %115 = math.exp %114 : vector<2x8x8xf32>
    %cst_38 = arith.constant dense<0.000000e+00> : vector<2x8xf32>
    %116 = vector.multi_reduction <add>, %115, %cst_38 [2] : vector<2x8x8xf32> to vector<2x8xf32>
    %117 = vector.shape_cast %116 : vector<2x8xf32> to vector<2x8x1xf32>
    %118 = tpu.reciprocal %117 {approx = true} : vector<2x8x1xf32> -> vector<2x8x1xf32>
    %119 = vector.broadcast %118 : vector<2x8x1xf32> to vector<2x8x8xf32>
    %120 = arith.mulf %115, %119 : vector<2x8x8xf32>
    %121 = arith.truncf %120 : vector<2x8x8xf32> to vector<2x8x8xbf16>
    "tpu.trace_start"() <{level = 10 : i32, message = "bqk,bkd->bqd"}> : () -> ()
    %cst_39 = arith.constant dense<0.000000e+00> : vector<2x8x8xf32>
    %122 = tpu.matmul %121, %107, %cst_39 {dimension_numbers = #tpu.dot_dimension_numbers<[2], [1], [1], [2], [0, 0, 0, 1, 1, 2], [0], [0]>} : vector<2x8x8xbf16>, vector<2x8x8xbf16>, vector<2x8x8xf32> -> vector<2x8x8xf32>
    "tpu.trace_stop"() : () -> ()
    %123 = vector.shape_cast %122 : vector<2x8x8xf32> to vector<16x8xf32>
    %c0_40 = arith.constant 0 : index
    %c24 = arith.constant 24 : index
    %124 = vector.load %arg16[%c0_40, %c24] : memref<16x32xf32, #tpu.memory_space<vmem>>, vector<16x8xf32>
    tpu.vector_store %arg16[%c0_40, %c24], %123 {strides = array<i32>} : memref<16x32xf32, #tpu.memory_space<vmem>>, vector<16x8xf32>,
    %c0_41 = arith.constant 0 : index
    %c0_42 = arith.constant 0 : index
    %125 = vector.load %arg16[%c0_41, %c0_42] : memref<16x32xf32, #tpu.memory_space<vmem>>, vector<16x32xf32>
    %126 = arith.truncf %125 : vector<16x32xf32> to vector<16x32xbf16>
    %c0_43 = arith.constant 0 : index
    %c0_44 = arith.constant 0 : index
    %127 = vector.load %arg7[%c0_43, %c0_44] : memref<32x32xbf16, #tpu.memory_space<vmem>>, vector<32x32xbf16>
    %cst_45 = arith.constant dense<0.000000e+00> : vector<16x32xf32>
    %128 = tpu.matmul %126, %127, %cst_45 {dimension_numbers = #tpu.dot_dimension_numbers<[1], [0], [0], [1], [0, 0, 1, 1], [], []>} : vector<16x32xbf16>, vector<32x32xbf16>, vector<16x32xf32> -> vector<16x32xf32>
    %c0_46 = arith.constant 0 : index
    %c0_47 = arith.constant 0 : index
    %129 = vector.load %arg8[%c0_46, %c0_47] : memref<1x32xf32, #tpu.memory_space<vmem>>, vector<1x32xf32>
    %130 = vector.shape_cast %129 : vector<1x32xf32> to vector<32xf32>
    %131 = vector.shape_cast %130 : vector<32xf32> to vector<1x32xf32>
    %132 = vector.broadcast %131 : vector<1x32xf32> to vector<16x32xf32>
    %133 = arith.addf %128, %132 : vector<16x32xf32>
    %134 = arith.addf %0, %133 : vector<16x32xf32>
    %c0_48 = arith.constant 0 : index
    %c0_49 = arith.constant 0 : index
    %135 = vector.load %arg9[%c0_48, %c0_49] : memref<1x32xf32, #tpu.memory_space<vmem>>, vector<1x32xf32>
    %136 = vector.shape_cast %135 : vector<1x32xf32> to vector<32xf32>
    %c0_50 = arith.constant 0 : index
    %c0_51 = arith.constant 0 : index
    %137 = vector.load %arg10[%c0_50, %c0_51] : memref<1x32xf32, #tpu.memory_space<vmem>>, vector<1x32xf32>
    %138 = vector.shape_cast %137 : vector<1x32xf32> to vector<32xf32>
    %cst_52 = arith.constant dense<0.000000e+00> : vector<16xf32>
    %139 = vector.multi_reduction <add>, %134, %cst_52 [1] : vector<16x32xf32> to vector<16xf32>
    %140 = vector.shape_cast %139 : vector<16xf32> to vector<16x1xf32>
    %cst_53 = arith.constant 3.200000e+01 : f32
    %141 = vector.broadcast %cst_53 : f32 to vector<16x1xf32>
    %142 = arith.divf %140, %141 : vector<16x1xf32>
    %143 = arith.mulf %134, %134 : vector<16x32xf32>
    %cst_54 = arith.constant dense<0.000000e+00> : vector<16xf32>
    %144 = vector.multi_reduction <add>, %143, %cst_54 [1] : vector<16x32xf32> to vector<16xf32>
    %145 = vector.shape_cast %144 : vector<16xf32> to vector<16x1xf32>
    %cst_55 = arith.constant 3.200000e+01 : f32
    %146 = vector.broadcast %cst_55 : f32 to vector<16x1xf32>
    %147 = arith.divf %145, %146 : vector<16x1xf32>
    %148 = arith.mulf %142, %142 : vector<16x1xf32>
    %149 = arith.subf %147, %148 : vector<16x1xf32>
    %150 = vector.broadcast %142 : vector<16x1xf32> to vector<16x32xf32>
    %151 = arith.subf %134, %150 : vector<16x32xf32>
    %cst_56 = arith.constant 9.99999974E-6 : f32
    %152 = vector.broadcast %cst_56 : f32 to vector<16x1xf32>
    %153 = arith.addf %149, %152 : vector<16x1xf32>
    %154 = math.rsqrt %153 : vector<16x1xf32>
    %155 = vector.broadcast %154 : vector<16x1xf32> to vector<16x32xf32>
    %156 = arith.mulf %151, %155 : vector<16x32xf32>
    %157 = vector.shape_cast %136 : vector<32xf32> to vector<1x32xf32>
    %158 = vector.broadcast %157 : vector<1x32xf32> to vector<16x32xf32>
    %159 = arith.mulf %156, %158 : vector<16x32xf32>
    %160 = vector.shape_cast %138 : vector<32xf32> to vector<1x32xf32>
    %161 = vector.broadcast %160 : vector<1x32xf32> to vector<16x32xf32>
    %162 = arith.addf %159, %161 : vector<16x32xf32>
    %163 = arith.truncf %162 : vector<16x32xf32> to vector<16x32xbf16>
    %cst_57 = arith.constant 0.000000e+00 : f32
    %164 = vector.broadcast %cst_57 : f32 to vector<16x32xf32>
    %c0_58 = arith.constant 0 : index
    %c0_59 = arith.constant 0 : index
    %165 = vector.load %arg11[%c0_58, %c0_59] : memref<32x128xbf16, #tpu.memory_space<vmem>>, vector<32x128xbf16>
    %cst_60 = arith.constant dense<0.000000e+00> : vector<16x128xf32>
    %166 = tpu.matmul %163, %165, %cst_60 {dimension_numbers = #tpu.dot_dimension_numbers<[1], [0], [0], [1], [0, 0, 1, 1], [], []>} : vector<16x32xbf16>, vector<32x128xbf16>, vector<16x128xf32> -> vector<16x128xf32>
    %c0_61 = arith.constant 0 : index
    %c0_62 = arith.constant 0 : index
    %167 = vector.load %arg12[%c0_61, %c0_62] : memref<1x128xf32, #tpu.memory_space<vmem>>, vector<1x128xf32>
    %168 = vector.shape_cast %167 : vector<1x128xf32> to vector<128xf32>
    %169 = vector.shape_cast %168 : vector<128xf32> to vector<1x128xf32>
    %170 = vector.broadcast %169 : vector<1x128xf32> to vector<16x128xf32>
    %171 = arith.addf %166, %170 : vector<16x128xf32>
    %cst_63 = arith.constant 1.702000e+00 : f32
    %172 = vector.broadcast %cst_63 : f32 to vector<16x128xf32>
    %173 = arith.mulf %172, %171 : vector<16x128xf32>
    %174 = arith.negf %173 : vector<16x128xf32>
    %175 = math.exp %174 : vector<16x128xf32>
    %cst_64 = arith.constant 1.000000e+00 : f32
    %176 = vector.broadcast %cst_64 : f32 to vector<16x128xf32>
    %177 = arith.addf %176, %175 : vector<16x128xf32>
    %178 = arith.divf %176, %177 : vector<16x128xf32>
    %179 = arith.mulf %171, %178 : vector<16x128xf32>
    %180 = arith.truncf %179 : vector<16x128xf32> to vector<16x128xbf16>
    %c0_65 = arith.constant 0 : index
    %c0_66 = arith.constant 0 : index
    %181 = vector.load %arg13[%c0_65, %c0_66] : memref<128x32xbf16, #tpu.memory_space<vmem>>, vector<128x32xbf16>
    %cst_67 = arith.constant dense<0.000000e+00> : vector<16x32xf32>
    %182 = tpu.matmul %180, %181, %cst_67 {dimension_numbers = #tpu.dot_dimension_numbers<[1], [0], [0], [1], [0, 0, 1, 1], [], []>} : vector<16x128xbf16>, vector<128x32xbf16>, vector<16x32xf32> -> vector<16x32xf32>
    %183 = arith.addf %164, %182 : vector<16x32xf32>
    %c0_68 = arith.constant 0 : index
    %c0_69 = arith.constant 0 : index
    %184 = vector.load %arg14[%c0_68, %c0_69] : memref<1x32xf32, #tpu.memory_space<vmem>>, vector<1x32xf32>
    %185 = vector.shape_cast %184 : vector<1x32xf32> to vector<32xf32>
    %186 = vector.shape_cast %185 : vector<32xf32> to vector<1x32xf32>
    %187 = vector.broadcast %186 : vector<1x32xf32> to vector<16x32xf32>
    %188 = arith.addf %183, %187 : vector<16x32xf32>
    %189 = arith.addf %134, %188 : vector<16x32xf32>
    %c0_70 = arith.constant 0 : index
    %c0_71 = arith.constant 0 : index
    %190 = vector.load %arg15[%c0_70, %c0_71] : memref<16x32xf32, #tpu.memory_space<vmem>>, vector<16x32xf32>
    tpu.vector_store %arg15[%c0_70, %c0_71], %189 {strides = array<i32>} : memref<16x32xf32, #tpu.memory_space<vmem>>, vector<16x32xf32>,
    return
  }
  func.func @transform_0(%arg0: i32) -> (i32, i32) {
    %c0_i32 = arith.constant 0 : i32
    %c0_i32_0 = arith.constant 0 : i32
    return %arg0, %c0_i32 : i32, i32
  }
  func.func @transform_1(%arg0: i32) -> (i32, i32, i32) {
    %c0_i32 = arith.constant 0 : i32
    %c0_i32_0 = arith.constant 0 : i32
    %c0_i32_1 = arith.constant 0 : i32
    return %arg0, %c0_i32, %c0_i32_0 : i32, i32, i32
  }
  func.func @transform_2(%arg0: i32) -> (i32, i32) {
    %c0_i32 = arith.constant 0 : i32
    %c0_i32_0 = arith.constant 0 : i32
    %c0_i32_1 = arith.constant 0 : i32
    return %c0_i32, %c0_i32_0 : i32, i32
  }
  func.func @transform_3(%arg0: i32) -> (i32, i32) {
    %c0_i32 = arith.constant 0 : i32
    %c0_i32_0 = arith.constant 0 : i32
    %c0_i32_1 = arith.constant 0 : i32
    return %c0_i32, %c0_i32_0 : i32, i32
  }
  func.func @transform_4(%arg0: i32) -> (i32, i32) {
    %c0_i32 = arith.constant 0 : i32
    %c0_i32_0 = arith.constant 0 : i32
    %c0_i32_1 = arith.constant 0 : i32
    return %c0_i32, %c0_i32_0 : i32, i32
  }
  func.func @transform_5(%arg0: i32) -> (i32, i32) {
    %c0_i32 = arith.constant 0 : i32
    %c0_i32_0 = arith.constant 0 : i32
    %c0_i32_1 = arith.constant 0 : i32
    return %c0_i32, %c0_i32_0 : i32, i32
  }
  func.func @transform_6(%arg0: i32) -> (i32, i32) {
    %c0_i32 = arith.constant 0 : i32
    %c0_i32_0 = arith.constant 0 : i32
    %c0_i32_1 = arith.constant 0 : i32
    return %c0_i32, %c0_i32_0 : i32, i32
  }
  func.func @transform_7(%arg0: i32) -> (i32, i32) {
    %c0_i32 = arith.constant 0 : i32
    %c0_i32_0 = arith.constant 0 : i32
    %c0_i32_1 = arith.constant 0 : i32
    return %c0_i32, %c0_i32_0 : i32, i32
  }
  func.func @transform_8(%arg0: i32) -> (i32, i32) {
    %c0_i32 = arith.constant 0 : i32
    %c0_i32_0 = arith.constant 0 : i32
    %c0_i32_1 = arith.constant 0 : i32
    return %c0_i32, %c0_i32_0 : i32, i32
  }
  func.func @transform_9(%arg0: i32) -> (i32, i32) {
    %c0_i32 = arith.constant 0 : i32
    %c0_i32_0 = arith.constant 0 : i32
    %c0_i32_1 = arith.constant 0 : i32
    return %c0_i32, %c0_i32_0 : i32, i32
  }
  func.func @transform_10(%arg0: i32) -> (i32, i32) {
    %c0_i32 = arith.constant 0 : i32
    %c0_i32_0 = arith.constant 0 : i32
    %c0_i32_1 = arith.constant 0 : i32
    return %c0_i32, %c0_i32_0 : i32, i32
  }
  func.func @transform_11(%arg0: i32) -> (i32, i32) {
    %c0_i32 = arith.constant 0 : i32
    %c0_i32_0 = arith.constant 0 : i32
    %c0_i32_1 = arith.constant 0 : i32
    return %c0_i32, %c0_i32_0 : i32, i32
  }
  func.func @transform_12(%arg0: i32) -> (i32, i32) {
    %c0_i32 = arith.constant 0 : i32
    %c0_i32_0 = arith.constant 0 : i32
    %c0_i32_1 = arith.constant 0 : i32
    return %c0_i32, %c0_i32_0 : i32, i32
  }
  func.func @transform_13(%arg0: i32) -> (i32, i32) {
    %c0_i32 = arith.constant 0 : i32
    %c0_i32_0 = arith.constant 0 : i32
    %c0_i32_1 = arith.constant 0 : i32
    return %c0_i32, %c0_i32_0 : i32, i32
  }
  func.func @transform_14(%arg0: i32) -> (i32, i32) {
    %c0_i32 = arith.constant 0 : i32
    %c0_i32_0 = arith.constant 0 : i32
    return %arg0, %c0_i32 : i32, i32
  }
}

module attributes {stable_mosaic.version = 11 : i64} {
  func.func @_residual_attention_block_kernel(%arg0: i32, %arg1: memref<16x32xf32, #tpu.memory_space<vmem>>, %arg2: memref<2x1x8xf32, #tpu.memory_space<vmem>>, %arg3: memref<1x32xf32, #tpu.memory_space<vmem>>, %arg4: memref<1x32xf32, #tpu.memory_space<vmem>>, %arg5: memref<32x96xbf16, #tpu.memory_space<vmem>>, %arg6: memref<1x96xf32, #tpu.memory_space<vmem>>, %arg7: memref<32x32xbf16, #tpu.memory_space<vmem>>, %arg8: memref<1x32xf32, #tpu.memory_space<vmem>>, %arg9: memref<1x32xf32, #tpu.memory_space<vmem>>, %arg10: memref<1x32xf32, #tpu.memory_space<vmem>>, %arg11: memref<32x128xbf16, #tpu.memory_space<vmem>>, %arg12: memref<1x128xf32, #tpu.memory_space<vmem>>, %arg13: memref<128x32xbf16, #tpu.memory_space<vmem>>, %arg14: memref<1x32xf32, #tpu.memory_space<vmem>>, %arg15: memref<16x32xf32, #tpu.memory_space<vmem>>, %arg16: memref<16x32xf32, #tpu.memory_space<vmem>>) attributes {dimension_semantics = [#tpu.dimension_semantics<parallel>], iteration_bounds = array<i64: 2>, scalar_prefetch = 0 : i64, scratch_operands = 1 : i64, tpu.core_type = #tpu.core_type<tc>, window_params = [{transform_indices = @transform_0, window_bounds = array<i64: 16, 32>}, {transform_indices = @transform_1, window_bounds = array<i64: 2, 1, 8>}, {pipeline_mode = #tpu.pipeline_mode<synchronous>, transform_indices = @transform_2, window_bounds = array<i64: 1, 32>}, {pipeline_mode = #tpu.pipeline_mode<synchronous>, transform_indices = @transform_3, window_bounds = array<i64: 1, 32>}, {pipeline_mode = #tpu.pipeline_mode<synchronous>, transform_indices = @transform_4, window_bounds = array<i64: 32, 96>}, {pipeline_mode = #tpu.pipeline_mode<synchronous>, transform_indices = @transform_5, window_bounds = array<i64: 1, 96>}, {pipeline_mode = #tpu.pipeline_mode<synchronous>, transform_indices = @transform_6, window_bounds = array<i64: 32, 32>}, {pipeline_mode = #tpu.pipeline_mode<synchronous>, transform_indices = @transform_7, window_bounds = array<i64: 1, 32>}, {pipeline_mode = #tpu.pipeline_mode<synchronous>, transform_indices = @transform_8, window_bounds = array<i64: 1, 32>}, {pipeline_mode = #tpu.pipeline_mode<synchronous>, transform_indices = @transform_9, window_bounds = array<i64: 1, 32>}, {pipeline_mode = #tpu.pipeline_mode<synchronous>, transform_indices = @transform_10, window_bounds = array<i64: 32, 128>}, {pipeline_mode = #tpu.pipeline_mode<synchronous>, transform_indices = @transform_11, window_bounds = array<i64: 1, 128>}, {pipeline_mode = #tpu.pipeline_mode<synchronous>, transform_indices = @transform_12, window_bounds = array<i64: 128, 32>}, {pipeline_mode = #tpu.pipeline_mode<synchronous>, transform_indices = @transform_13, window_bounds = array<i64: 1, 32>}, {transform_indices = @transform_14, window_bounds = array<i64: 16, 32>}]} {
    %c0 = arith.constant 0 : index
    %c0_0 = arith.constant 0 : index
    %0 = vector.load %arg1[%c0, %c0_0] : memref<16x32xf32, #tpu.memory_space<vmem>>, vector<16x32xf32>
    %c0_1 = arith.constant 0 : index
    %c0_2 = arith.constant 0 : index
    %c0_3 = arith.constant 0 : index
    %1 = vector.load %arg2[%c0_1, %c0_2, %c0_3] : memref<2x1x8xf32, #tpu.memory_space<vmem>>, vector<2x1x8xf32>
    %cst = arith.constant 5.000000e-01 : f32
    %2 = vector.broadcast %cst : f32 to vector<2x1x8xf32>
    %3 = arith.cmpf ogt, %1, %2 : vector<2x1x8xf32>
    %cst_4 = arith.constant -1.000000e+30 : f32
    %cst_5 = arith.constant 0.000000e+00 : f32
    %4 = vector.broadcast %cst_4 : f32 to vector<2x1x8xf32>
    %5 = vector.broadcast %cst_5 : f32 to vector<2x1x8xf32>
    %6 = arith.select %3, %4, %5 : vector<2x1x8xi1>, vector<2x1x8xf32>
    %c0_6 = arith.constant 0 : index
    %c0_7 = arith.constant 0 : index
    %7 = vector.load %arg3[%c0_6, %c0_7] : memref<1x32xf32, #tpu.memory_space<vmem>>, vector<1x32xf32>
    %8 = vector.shape_cast %7 : vector<1x32xf32> to vector<32xf32>
    %c0_8 = arith.constant 0 : index
    %c0_9 = arith.constant 0 : index
    %9 = vector.load %arg4[%c0_8, %c0_9] : memref<1x32xf32, #tpu.memory_space<vmem>>, vector<1x32xf32>
    %10 = vector.shape_cast %9 : vector<1x32xf32> to vector<32xf32>
    %cst_10 = arith.constant dense<0.000000e+00> : vector<16xf32>
    %11 = vector.multi_reduction <add>, %0, %cst_10 [1] : vector<16x32xf32> to vector<16xf32>
    %12 = vector.shape_cast %11 : vector<16xf32> to vector<16x1xf32>
    %cst_11 = arith.constant 3.200000e+01 : f32
    %13 = vector.broadcast %cst_11 : f32 to vector<16x1xf32>
    %14 = arith.divf %12, %13 : vector<16x1xf32>
    %15 = arith.mulf %0, %0 : vector<16x32xf32>
    %cst_12 = arith.constant dense<0.000000e+00> : vector<16xf32>
    %16 = vector.multi_reduction <add>, %15, %cst_12 [1] : vector<16x32xf32> to vector<16xf32>
    %17 = vector.shape_cast %16 : vector<16xf32> to vector<16x1xf32>
    %cst_13 = arith.constant 3.200000e+01 : f32
    %18 = vector.broadcast %cst_13 : f32 to vector<16x1xf32>
    %19 = arith.divf %17, %18 : vector<16x1xf32>
    %20 = arith.mulf %14, %14 : vector<16x1xf32>
    %21 = arith.subf %19, %20 : vector<16x1xf32>
    %22 = vector.broadcast %14 : vector<16x1xf32> to vector<16x32xf32>
    %23 = arith.subf %0, %22 : vector<16x32xf32>
    %cst_14 = arith.constant 9.99999974E-6 : f32
    %24 = vector.broadcast %cst_14 : f32 to vector<16x1xf32>
    %25 = arith.addf %21, %24 : vector<16x1xf32>
    %26 = math.rsqrt %25 : vector<16x1xf32>
    %27 = vector.broadcast %26 : vector<16x1xf32> to vector<16x32xf32>
    %28 = arith.mulf %23, %27 : vector<16x32xf32>
    %29 = vector.shape_cast %8 : vector<32xf32> to vector<1x32xf32>
    %30 = vector.broadcast %29 : vector<1x32xf32> to vector<16x32xf32>
    %31 = arith.mulf %28, %30 : vector<16x32xf32>
    %32 = vector.shape_cast %10 : vector<32xf32> to vector<1x32xf32>
    %33 = vector.broadcast %32 : vector<1x32xf32> to vector<16x32xf32>
    %34 = arith.addf %31, %33 : vector<16x32xf32>
    %35 = arith.truncf %34 : vector<16x32xf32> to vector<16x32xbf16>
    %c0_15 = arith.constant 0 : index
    %c0_16 = arith.constant 0 : index
    %36 = vector.load %arg5[%c0_15, %c0_16] : memref<32x96xbf16, #tpu.memory_space<vmem>>, vector<32x96xbf16>
    %cst_17 = arith.constant dense<0.000000e+00> : vector<16x96xf32>
    %37 = tpu.matmul %35, %36, %cst_17 {dimension_numbers = #tpu.dot_dimension_numbers<[1], [0], [0], [1], [0, 0, 1, 1], [], []>} : vector<16x32xbf16>, vector<32x96xbf16>, vector<16x96xf32> -> vector<16x96xf32>
    %c0_18 = arith.constant 0 : index
    %c0_19 = arith.constant 0 : index
    %38 = vector.load %arg6[%c0_18, %c0_19] : memref<1x96xf32, #tpu.memory_space<vmem>>, vector<1x96xf32>
    %39 = vector.shape_cast %38 : vector<1x96xf32> to vector<96xf32>
    %40 = vector.shape_cast %39 : vector<96xf32> to vector<1x96xf32>
    %41 = vector.broadcast %40 : vector<1x96xf32> to vector<16x96xf32>
    %42 = arith.addf %37, %41 : vector<16x96xf32>
    %43 = arith.truncf %42 : vector<16x96xf32> to vector<16x96xbf16>
    %44 = vector.shape_cast %43 : vector<16x96xbf16> to vector<2x8x96xbf16>
    %45 = vector.extract_strided_slice %44 {offsets = [0, 0, 0], sizes = [2, 8, 8], strides = [1, 1, 1]} : vector<2x8x96xbf16> to vector<2x8x8xbf16>
    %46 = vector.extract_strided_slice %44 {offsets = [0, 0, 32], sizes = [2, 8, 8], strides = [1, 1, 1]} : vector<2x8x96xbf16> to vector<2x8x8xbf16>
    %47 = vector.extract_strided_slice %44 {offsets = [0, 0, 64], sizes = [2, 8, 8], strides = [1, 1, 1]} : vector<2x8x96xbf16> to vector<2x8x8xbf16>
    "tpu.trace_start"() <{level = 10 : i32, message = "bqd,bkd->bqk"}> : () -> ()
    %cst_20 = arith.constant dense<0.000000e+00> : vector<2x8x8xf32>
    %48 = tpu.matmul %45, %46, %cst_20 {dimension_numbers = #tpu.dot_dimension_numbers<[2], [2], [1], [1], [0, 0, 0, 1, 1, 1], [0], [0]>} : vector<2x8x8xbf16>, vector<2x8x8xbf16>, vector<2x8x8xf32> -> vector<2x8x8xf32>
    "tpu.trace_stop"() : () -> ()
    %49 = vector.broadcast %6 : vector<2x1x8xf32> to vector<2x8x8xf32>
    %50 = arith.addf %48, %49 : vector<2x8x8xf32>
    %cst_21 = arith.constant dense<0xFF800000> : vector<2x8xf32>
    %51 = vector.multi_reduction <maximumf>, %50, %cst_21 [2] : vector<2x8x8xf32> to vector<2x8xf32>
    %52 = vector.shape_cast %51 : vector<2x8xf32> to vector<2x8x1xf32>
    %53 = vector.broadcast %52 : vector<2x8x1xf32> to vector<2x8x8xf32>
    %54 = arith.subf %50, %53 : vector<2x8x8xf32>
    %55 = math.exp %54 : vector<2x8x8xf32>
    %cst_22 = arith.constant dense<0.000000e+00> : vector<2x8xf32>
    %56 = vector.multi_reduction <add>, %55, %cst_22 [2] : vector<2x8x8xf32> to vector<2x8xf32>
    %57 = vector.shape_cast %56 : vector<2x8xf32> to vector<2x8x1xf32>
    %58 = tpu.reciprocal %57 {approx = true} : vector<2x8x1xf32> -> vector<2x8x1xf32>
    %59 = vector.broadcast %58 : vector<2x8x1xf32> to vector<2x8x8xf32>
    %60 = arith.mulf %55, %59 : vector<2x8x8xf32>
    %61 = arith.truncf %60 : vector<2x8x8xf32> to vector<2x8x8xbf16>
    "tpu.trace_start"() <{level = 10 : i32, message = "bqk,bkd->bqd"}> : () -> ()
    %cst_23 = arith.constant dense<0.000000e+00> : vector<2x8x8xf32>
    %62 = tpu.matmul %61, %47, %cst_23 {dimension_numbers = #tpu.dot_dimension_numbers<[2], [1], [1], [2], [0, 0, 0, 1, 1, 2], [0], [0]>} : vector<2x8x8xbf16>, vector<2x8x8xbf16>, vector<2x8x8xf32> -> vector<2x8x8xf32>
    "tpu.trace_stop"() : () -> ()
    %63 = vector.shape_cast %62 : vector<2x8x8xf32> to vector<16x8xf32>
    %c0_24 = arith.constant 0 : index
    %c0_25 = arith.constant 0 : index
    %64 = vector.load %arg16[%c0_24, %c0_25] : memref<16x32xf32, #tpu.memory_space<vmem>>, vector<16x8xf32>
    tpu.vector_store %arg16[%c0_24, %c0_25], %63 {strides = array<i32>} : memref<16x32xf32, #tpu.memory_space<vmem>>, vector<16x8xf32>,
    %65 = vector.extract_strided_slice %44 {offsets = [0, 0, 8], sizes = [2, 8, 8], strides = [1, 1, 1]} : vector<2x8x96xbf16> to vector<2x8x8xbf16>
    %66 = vector.extract_strided_slice %44 {offsets = [0, 0, 40], sizes = [2, 8, 8], strides = [1, 1, 1]} : vector<2x8x96xbf16> to vector<2x8x8xbf16>
    %67 = vector.extract_strided_slice %44 {offsets = [0, 0, 72], sizes = [2, 8, 8], strides = [1, 1, 1]} : vector<2x8x96xbf16> to vector<2x8x8xbf16>
    "tpu.trace_start"() <{level = 10 : i32, message = "bqd,bkd->bqk"}> : () -> ()
    %cst_26 = arith.constant dense<0.000000e+00> : vector<2x8x8xf32>
    %68 = tpu.matmul %65, %66, %cst_26 {dimension_numbers = #tpu.dot_dimension_numbers<[2], [2], [1], [1], [0, 0, 0, 1, 1, 1], [0], [0]>} : vector<2x8x8xbf16>, vector<2x8x8xbf16>, vector<2x8x8xf32> -> vector<2x8x8xf32>
    "tpu.trace_stop"() : () -> ()
    %69 = vector.broadcast %6 : vector<2x1x8xf32> to vector<2x8x8xf32>
    %70 = arith.addf %68, %69 : vector<2x8x8xf32>
    %cst_27 = arith.constant dense<0xFF800000> : vector<2x8xf32>
    %71 = vector.multi_reduction <maximumf>, %70, %cst_27 [2] : vector<2x8x8xf32> to vector<2x8xf32>
    %72 = vector.shape_cast %71 : vector<2x8xf32> to vector<2x8x1xf32>
    %73 = vector.broadcast %72 : vector<2x8x1xf32> to vector<2x8x8xf32>
    %74 = arith.subf %70, %73 : vector<2x8x8xf32>
    %75 = math.exp %74 : vector<2x8x8xf32>
    %cst_28 = arith.constant dense<0.000000e+00> : vector<2x8xf32>
    %76 = vector.multi_reduction <add>, %75, %cst_28 [2] : vector<2x8x8xf32> to vector<2x8xf32>
    %77 = vector.shape_cast %76 : vector<2x8xf32> to vector<2x8x1xf32>
    %78 = tpu.reciprocal %77 {approx = true} : vector<2x8x1xf32> -> vector<2x8x1xf32>
    %79 = vector.broadcast %78 : vector<2x8x1xf32> to vector<2x8x8xf32>
    %80 = arith.mulf %75, %79 : vector<2x8x8xf32>
    %81 = arith.truncf %80 : vector<2x8x8xf32> to vector<2x8x8xbf16>
    "tpu.trace_start"() <{level = 10 : i32, message = "bqk,bkd->bqd"}> : () -> ()
    %cst_29 = arith.constant dense<0.000000e+00> : vector<2x8x8xf32>
    %82 = tpu.matmul %81, %67, %cst_29 {dimension_numbers = #tpu.dot_dimension_numbers<[2], [1], [1], [2], [0, 0, 0, 1, 1, 2], [0], [0]>} : vector<2x8x8xbf16>, vector<2x8x8xbf16>, vector<2x8x8xf32> -> vector<2x8x8xf32>
    "tpu.trace_stop"() : () -> ()
    %83 = vector.shape_cast %82 : vector<2x8x8xf32> to vector<16x8xf32>
    %c0_30 = arith.constant 0 : index
    %c8 = arith.constant 8 : index
    %84 = vector.load %arg16[%c0_30, %c8] : memref<16x32xf32, #tpu.memory_space<vmem>>, vector<16x8xf32>
    tpu.vector_store %arg16[%c0_30, %c8], %83 {strides = array<i32>} : memref<16x32xf32, #tpu.memory_space<vmem>>, vector<16x8xf32>,
    %85 = vector.extract_strided_slice %44 {offsets = [0, 0, 16], sizes = [2, 8, 8], strides = [1, 1, 1]} : vector<2x8x96xbf16> to vector<2x8x8xbf16>
    %86 = vector.extract_strided_slice %44 {offsets = [0, 0, 48], sizes = [2, 8, 8], strides = [1, 1, 1]} : vector<2x8x96xbf16> to vector<2x8x8xbf16>
    %87 = vector.extract_strided_slice %44 {offsets = [0, 0, 80], sizes = [2, 8, 8], strides = [1, 1, 1]} : vector<2x8x96xbf16> to vector<2x8x8xbf16>
    "tpu.trace_start"() <{level = 10 : i32, message = "bqd,bkd->bqk"}> : () -> ()
    %cst_31 = arith.constant dense<0.000000e+00> : vector<2x8x8xf32>
    %88 = tpu.matmul %85, %86, %cst_31 {dimension_numbers = #tpu.dot_dimension_numbers<[2], [2], [1], [1], [0, 0, 0, 1, 1, 1], [0], [0]>} : vector<2x8x8xbf16>, vector<2x8x8xbf16>, vector<2x8x8xf32> -> vector<2x8x8xf32>
    "tpu.trace_stop"() : () -> ()
    %89 = vector.broadcast %6 : vector<2x1x8xf32> to vector<2x8x8xf32>
    %90 = arith.addf %88, %89 : vector<2x8x8xf32>
    %cst_32 = arith.constant dense<0xFF800000> : vector<2x8xf32>
    %91 = vector.multi_reduction <maximumf>, %90, %cst_32 [2] : vector<2x8x8xf32> to vector<2x8xf32>
    %92 = vector.shape_cast %91 : vector<2x8xf32> to vector<2x8x1xf32>
    %93 = vector.broadcast %92 : vector<2x8x1xf32> to vector<2x8x8xf32>
    %94 = arith.subf %90, %93 : vector<2x8x8xf32>
    %95 = math.exp %94 : vector<2x8x8xf32>
    %cst_33 = arith.constant dense<0.000000e+00> : vector<2x8xf32>
    %96 = vector.multi_reduction <add>, %95, %cst_33 [2] : vector<2x8x8xf32> to vector<2x8xf32>
    %97 = vector.shape_cast %96 : vector<2x8xf32> to vector<2x8x1xf32>
    %98 = tpu.reciprocal %97 {approx = true} : vector<2x8x1xf32> -> vector<2x8x1xf32>
    %99 = vector.broadcast %98 : vector<2x8x1xf32> to vector<2x8x8xf32>
    %100 = arith.mulf %95, %99 : vector<2x8x8xf32>
    %101 = arith.truncf %100 : vector<2x8x8xf32> to vector<2x8x8xbf16>
    "tpu.trace_start"() <{level = 10 : i32, message = "bqk,bkd->bqd"}> : () -> ()
    %cst_34 = arith.constant dense<0.000000e+00> : vector<2x8x8xf32>
    %102 = tpu.matmul %101, %87, %cst_34 {dimension_numbers = #tpu.dot_dimension_numbers<[2], [1], [1], [2], [0, 0, 0, 1, 1, 2], [0], [0]>} : vector<2x8x8xbf16>, vector<2x8x8xbf16>, vector<2x8x8xf32> -> vector<2x8x8xf32>
    "tpu.trace_stop"() : () -> ()
    %103 = vector.shape_cast %102 : vector<2x8x8xf32> to vector<16x8xf32>
    %c0_35 = arith.constant 0 : index
    %c16 = arith.constant 16 : index
    %104 = vector.load %arg16[%c0_35, %c16] : memref<16x32xf32, #tpu.memory_space<vmem>>, vector<16x8xf32>
    tpu.vector_store %arg16[%c0_35, %c16], %103 {strides = array<i32>} : memref<16x32xf32, #tpu.memory_space<vmem>>, vector<16x8xf32>,
    %105 = vector.extract_strided_slice %44 {offsets = [0, 0, 24], sizes = [2, 8, 8], strides = [1, 1, 1]} : vector<2x8x96xbf16> to vector<2x8x8xbf16>
    %106 = vector.extract_strided_slice %44 {offsets = [0, 0, 56], sizes = [2, 8, 8], strides = [1, 1, 1]} : vector<2x8x96xbf16> to vector<2x8x8xbf16>
    %107 = vector.extract_strided_slice %44 {offsets = [0, 0, 88], sizes = [2, 8, 8], strides = [1, 1, 1]} : vector<2x8x96xbf16> to vector<2x8x8xbf16>
    "tpu.trace_start"() <{level = 10 : i32, message = "bqd,bkd->bqk"}> : () -> ()
    %cst_36 = arith.constant dense<0.000000e+00> : vector<2x8x8xf32>
    %108 = tpu.matmul %105, %106, %cst_36 {dimension_numbers = #tpu.dot_dimension_numbers<[2], [2], [1], [1], [0, 0, 0, 1, 1, 1], [0], [0]>} : vector<2x8x8xbf16>, vector<2x8x8xbf16>, vector<2x8x8xf32> -> vector<2x8x8xf32>
    "tpu.trace_stop"() : () -> ()
    %109 = vector.broadcast %6 : vector<2x1x8xf32> to vector<2x8x8xf32>
    %110 = arith.addf %108, %109 : vector<2x8x8xf32>
    %cst_37 = arith.constant dense<0xFF800000> : vector<2x8xf32>
    %111 = vector.multi_reduction <maximumf>, %110, %cst_37 [2] : vector<2x8x8xf32> to vector<2x8xf32>
    %112 = vector.shape_cast %111 : vector<2x8xf32> to vector<2x8x1xf32>
    %113 = vector.broadcast %112 : vector<2x8x1xf32> to vector<2x8x8xf32>
    %114 = arith.subf %110, %113 : vector<2x8x8xf32>
    %115 = math.exp %114 : vector<2x8x8xf32>
    %cst_38 = arith.constant dense<0.000000e+00> : vector<2x8xf32>
    %116 = vector.multi_reduction <add>, %115, %cst_38 [2] : vector<2x8x8xf32> to vector<2x8xf32>
    %117 = vector.shape_cast %116 : vector<2x8xf32> to vector<2x8x1xf32>
    %118 = tpu.reciprocal %117 {approx = true} : vector<2x8x1xf32> -> vector<2x8x1xf32>
    %119 = vector.broadcast %118 : vector<2x8x1xf32> to vector<2x8x8xf32>
    %120 = arith.mulf %115, %119 : vector<2x8x8xf32>
    %121 = arith.truncf %120 : vector<2x8x8xf32> to vector<2x8x8xbf16>
    "tpu.trace_start"() <{level = 10 : i32, message = "bqk,bkd->bqd"}> : () -> ()
    %cst_39 = arith.constant dense<0.000000e+00> : vector<2x8x8xf32>
    %122 = tpu.matmul %121, %107, %cst_39 {dimension_numbers = #tpu.dot_dimension_numbers<[2], [1], [1], [2], [0, 0, 0, 1, 1, 2], [0], [0]>} : vector<2x8x8xbf16>, vector<2x8x8xbf16>, vector<2x8x8xf32> -> vector<2x8x8xf32>
    "tpu.trace_stop"() : () -> ()
    %123 = vector.shape_cast %122 : vector<2x8x8xf32> to vector<16x8xf32>
    %c0_40 = arith.constant 0 : index
    %c24 = arith.constant 24 : index
    %124 = vector.load %arg16[%c0_40, %c24] : memref<16x32xf32, #tpu.memory_space<vmem>>, vector<16x8xf32>
    tpu.vector_store %arg16[%c0_40, %c24], %123 {strides = array<i32>} : memref<16x32xf32, #tpu.memory_space<vmem>>, vector<16x8xf32>,
    %c0_41 = arith.constant 0 : index
    %c0_42 = arith.constant 0 : index
    %125 = vector.load %arg16[%c0_41, %c0_42] : memref<16x32xf32, #tpu.memory_space<vmem>>, vector<16x32xf32>
    %126 = arith.truncf %125 : vector<16x32xf32> to vector<16x32xbf16>
    %c0_43 = arith.constant 0 : index
    %c0_44 = arith.constant 0 : index
    %127 = vector.load %arg7[%c0_43, %c0_44] : memref<32x32xbf16, #tpu.memory_space<vmem>>, vector<32x32xbf16>
    %cst_45 = arith.constant dense<0.000000e+00> : vector<16x32xf32>
    %128 = tpu.matmul %126, %127, %cst_45 {dimension_numbers = #tpu.dot_dimension_numbers<[1], [0], [0], [1], [0, 0, 1, 1], [], []>} : vector<16x32xbf16>, vector<32x32xbf16>, vector<16x32xf32> -> vector<16x32xf32>
    %c0_46 = arith.constant 0 : index
    %c0_47 = arith.constant 0 : index
    %129 = vector.load %arg8[%c0_46, %c0_47] : memref<1x32xf32, #tpu.memory_space<vmem>>, vector<1x32xf32>
    %130 = vector.shape_cast %129 : vector<1x32xf32> to vector<32xf32>
    %131 = vector.shape_cast %130 : vector<32xf32> to vector<1x32xf32>
    %132 = vector.broadcast %131 : vector<1x32xf32> to vector<16x32xf32>
    %133 = arith.addf %128, %132 : vector<16x32xf32>
    %134 = arith.addf %0, %133 : vector<16x32xf32>
    %c0_48 = arith.constant 0 : index
    %c0_49 = arith.constant 0 : index
    %135 = vector.load %arg9[%c0_48, %c0_49] : memref<1x32xf32, #tpu.memory_space<vmem>>, vector<1x32xf32>
    %136 = vector.shape_cast %135 : vector<1x32xf32> to vector<32xf32>
    %c0_50 = arith.constant 0 : index
    %c0_51 = arith.constant 0 : index
    %137 = vector.load %arg10[%c0_50, %c0_51] : memref<1x32xf32, #tpu.memory_space<vmem>>, vector<1x32xf32>
    %138 = vector.shape_cast %137 : vector<1x32xf32> to vector<32xf32>
    %cst_52 = arith.constant dense<0.000000e+00> : vector<16xf32>
    %139 = vector.multi_reduction <add>, %134, %cst_52 [1] : vector<16x32xf32> to vector<16xf32>
    %140 = vector.shape_cast %139 : vector<16xf32> to vector<16x1xf32>
    %cst_53 = arith.constant 3.200000e+01 : f32
    %141 = vector.broadcast %cst_53 : f32 to vector<16x1xf32>
    %142 = arith.divf %140, %141 : vector<16x1xf32>
    %143 = arith.mulf %134, %134 : vector<16x32xf32>
    %cst_54 = arith.constant dense<0.000000e+00> : vector<16xf32>
    %144 = vector.multi_reduction <add>, %143, %cst_54 [1] : vector<16x32xf32> to vector<16xf32>
    %145 = vector.shape_cast %144 : vector<16xf32> to vector<16x1xf32>
    %cst_55 = arith.constant 3.200000e+01 : f32
    %146 = vector.broadcast %cst_55 : f32 to vector<16x1xf32>
    %147 = arith.divf %145, %146 : vector<16x1xf32>
    %148 = arith.mulf %142, %142 : vector<16x1xf32>
    %149 = arith.subf %147, %148 : vector<16x1xf32>
    %150 = vector.broadcast %142 : vector<16x1xf32> to vector<16x32xf32>
    %151 = arith.subf %134, %150 : vector<16x32xf32>
    %cst_56 = arith.constant 9.99999974E-6 : f32
    %152 = vector.broadcast %cst_56 : f32 to vector<16x1xf32>
    %153 = arith.addf %149, %152 : vector<16x1xf32>
    %154 = math.rsqrt %153 : vector<16x1xf32>
    %155 = vector.broadcast %154 : vector<16x1xf32> to vector<16x32xf32>
    %156 = arith.mulf %151, %155 : vector<16x32xf32>
    %157 = vector.shape_cast %136 : vector<32xf32> to vector<1x32xf32>
    %158 = vector.broadcast %157 : vector<1x32xf32> to vector<16x32xf32>
    %159 = arith.mulf %156, %158 : vector<16x32xf32>
    %160 = vector.shape_cast %138 : vector<32xf32> to vector<1x32xf32>
    %161 = vector.broadcast %160 : vector<1x32xf32> to vector<16x32xf32>
    %162 = arith.addf %159, %161 : vector<16x32xf32>
    %163 = arith.truncf %162 : vector<16x32xf32> to vector<16x32xbf16>
    %cst_57 = arith.constant 0.000000e+00 : f32
    %164 = vector.broadcast %cst_57 : f32 to vector<16x32xf32>
    %c0_58 = arith.constant 0 : index
    %c0_59 = arith.constant 0 : index
    %165 = vector.load %arg11[%c0_58, %c0_59] : memref<32x128xbf16, #tpu.memory_space<vmem>>, vector<32x128xbf16>
    %cst_60 = arith.constant dense<0.000000e+00> : vector<16x128xf32>
    %166 = tpu.matmul %163, %165, %cst_60 {dimension_numbers = #tpu.dot_dimension_numbers<[1], [0], [0], [1], [0, 0, 1, 1], [], []>} : vector<16x32xbf16>, vector<32x128xbf16>, vector<16x128xf32> -> vector<16x128xf32>
    %c0_61 = arith.constant 0 : index
    %c0_62 = arith.constant 0 : index
    %167 = vector.load %arg12[%c0_61, %c0_62] : memref<1x128xf32, #tpu.memory_space<vmem>>, vector<1x128xf32>
    %168 = vector.shape_cast %167 : vector<1x128xf32> to vector<128xf32>
    %169 = vector.shape_cast %168 : vector<128xf32> to vector<1x128xf32>
    %170 = vector.broadcast %169 : vector<1x128xf32> to vector<16x128xf32>
    %171 = arith.addf %166, %170 : vector<16x128xf32>
    %cst_63 = arith.constant 1.702000e+00 : f32
    %172 = vector.broadcast %cst_63 : f32 to vector<16x128xf32>
    %173 = arith.mulf %172, %171 : vector<16x128xf32>
    %174 = arith.negf %173 : vector<16x128xf32>
    %175 = math.exp %174 : vector<16x128xf32>
    %cst_64 = arith.constant 1.000000e+00 : f32
    %176 = vector.broadcast %cst_64 : f32 to vector<16x128xf32>
    %177 = arith.addf %176, %175 : vector<16x128xf32>
    %178 = arith.divf %176, %177 : vector<16x128xf32>
    %179 = arith.mulf %171, %178 : vector<16x128xf32>
    %180 = arith.truncf %179 : vector<16x128xf32> to vector<16x128xbf16>
    %c0_65 = arith.constant 0 : index
    %c0_66 = arith.constant 0 : index
    %181 = vector.load %arg13[%c0_65, %c0_66] : memref<128x32xbf16, #tpu.memory_space<vmem>>, vector<128x32xbf16>
    %cst_67 = arith.constant dense<0.000000e+00> : vector<16x32xf32>
    %182 = tpu.matmul %180, %181, %cst_67 {dimension_numbers = #tpu.dot_dimension_numbers<[1], [0], [0], [1], [0, 0, 1, 1], [], []>} : vector<16x128xbf16>, vector<128x32xbf16>, vector<16x32xf32> -> vector<16x32xf32>
    %183 = arith.addf %164, %182 : vector<16x32xf32>
    %c0_68 = arith.constant 0 : index
    %c0_69 = arith.constant 0 : index
    %184 = vector.load %arg14[%c0_68, %c0_69] : memref<1x32xf32, #tpu.memory_space<vmem>>, vector<1x32xf32>
    %185 = vector.shape_cast %184 : vector<1x32xf32> to vector<32xf32>
    %186 = vector.shape_cast %185 : vector<32xf32> to vector<1x32xf32>
    %187 = vector.broadcast %186 : vector<1x32xf32> to vector<16x32xf32>
    %188 = arith.addf %183, %187 : vector<16x32xf32>
    %189 = arith.addf %134, %188 : vector<16x32xf32>
    %c0_70 = arith.constant 0 : index
    %c0_71 = arith.constant 0 : index
    %190 = vector.load %arg15[%c0_70, %c0_71] : memref<16x32xf32, #tpu.memory_space<vmem>>, vector<16x32xf32>
    tpu.vector_store %arg15[%c0_70, %c0_71], %189 {strides = array<i32>} : memref<16x32xf32, #tpu.memory_space<vmem>>, vector<16x32xf32>,
    return
  }
  func.func @transform_0(%arg0: i32) -> (i32, i32) {
    %c0_i32 = arith.constant 0 : i32
    %c0_i32_0 = arith.constant 0 : i32
    return %arg0, %c0_i32 : i32, i32
  }
  func.func @transform_1(%arg0: i32) -> (i32, i32, i32) {
    %c0_i32 = arith.constant 0 : i32
    %c0_i32_0 = arith.constant 0 : i32
    %c0_i32_1 = arith.constant 0 : i32
    return %arg0, %c0_i32, %c0_i32_0 : i32, i32, i32
  }
  func.func @transform_2(%arg0: i32) -> (i32, i32) {
    %c0_i32 = arith.constant 0 : i32
    %c0_i32_0 = arith.constant 0 : i32
    %c0_i32_1 = arith.constant 0 : i32
    return %c0_i32, %c0_i32_0 : i32, i32
  }
  func.func @transform_3(%arg0: i32) -> (i32, i32) {
    %c0_i32 = arith.constant 0 : i32
    %c0_i32_0 = arith.constant 0 : i32
    %c0_i32_1 = arith.constant 0 : i32
    return %c0_i32, %c0_i32_0 : i32, i32
  }
  func.func @transform_4(%arg0: i32) -> (i32, i32) {
    %c0_i32 = arith.constant 0 : i32
    %c0_i32_0 = arith.constant 0 : i32
    %c0_i32_1 = arith.constant 0 : i32
    return %c0_i32, %c0_i32_0 : i32, i32
  }
  func.func @transform_5(%arg0: i32) -> (i32, i32) {
    %c0_i32 = arith.constant 0 : i32
    %c0_i32_0 = arith.constant 0 : i32
    %c0_i32_1 = arith.constant 0 : i32
    return %c0_i32, %c0_i32_0 : i32, i32
  }
  func.func @transform_6(%arg0: i32) -> (i32, i32) {
    %c0_i32 = arith.constant 0 : i32
    %c0_i32_0 = arith.constant 0 : i32
    %c0_i32_1 = arith.constant 0 : i32
    return %c0_i32, %c0_i32_0 : i32, i32
  }
  func.func @transform_7(%arg0: i32) -> (i32, i32) {
    %c0_i32 = arith.constant 0 : i32
    %c0_i32_0 = arith.constant 0 : i32
    %c0_i32_1 = arith.constant 0 : i32
    return %c0_i32, %c0_i32_0 : i32, i32
  }
  func.func @transform_8(%arg0: i32) -> (i32, i32) {
    %c0_i32 = arith.constant 0 : i32
    %c0_i32_0 = arith.constant 0 : i32
    %c0_i32_1 = arith.constant 0 : i32
    return %c0_i32, %c0_i32_0 : i32, i32
  }
  func.func @transform_9(%arg0: i32) -> (i32, i32) {
    %c0_i32 = arith.constant 0 : i32
    %c0_i32_0 = arith.constant 0 : i32
    %c0_i32_1 = arith.constant 0 : i32
    return %c0_i32, %c0_i32_0 : i32, i32
  }
  func.func @transform_10(%arg0: i32) -> (i32, i32) {
    %c0_i32 = arith.constant 0 : i32
    %c0_i32_0 = arith.constant 0 : i32
    %c0_i32_1 = arith.constant 0 : i32
    return %c0_i32, %c0_i32_0 : i32, i32
  }
  func.func @transform_11(%arg0: i32) -> (i32, i32) {
    %c0_i32 = arith.constant 0 : i32
    %c0_i32_0 = arith.constant 0 : i32
    %c0_i32_1 = arith.constant 0 : i32
    return %c0_i32, %c0_i32_0 : i32, i32
  }
  func.func @transform_12(%arg0: i32) -> (i32, i32) {
    %c0_i32 = arith.constant 0 : i32
    %c0_i32_0 = arith.constant 0 : i32
    %c0_i32_1 = arith.constant 0 : i32
    return %c0_i32, %c0_i32_0 : i32, i32
  }
  func.func @transform_13(%arg0: i32) -> (i32, i32) {
    %c0_i32 = arith.constant 0 : i32
    %c0_i32_0 = arith.constant 0 : i32
    %c0_i32_1 = arith.constant 0 : i32
    return %c0_i32, %c0_i32_0 : i32, i32
  }
  func.func @transform_14(%arg0: i32) -> (i32, i32) {
    %c0_i32 = arith.constant 0 : i32
    %c0_i32_0 = arith.constant 0 : i32
    return %arg0, %c0_i32 : i32, i32
  }
}

</mosaic_0001>

<bundles_post_ra>
// kernel: tpu_custom_call.1
= control target key start
LH: loop header
LB: loop body
LE: loop exit
PB: predicated region body
PF: predicated region fallthrough
CT: control target
= control target key end

     0   :  { %s3164_s0 = inlined_call_operand.vmem [shape: f32[32,32], index: 0, kind: input, shape index: {}]   ;;  %s3165_s1 = inlined_call_operand.hbm [shape: f32[4,1,8], index: 1, kind: input, shape index: {}]   ;;  %s3166_s2 = inlined_call_operand.vmem [shape: f32[1,32], index: 2, kind: input, shape index: {}]   ;;  %s3167_s3 = inlined_call_operand.vmem [shape: f32[1,32], index: 3, kind: input, shape index: {}]   ;;  %s3168_s4 = inlined_call_operand.vmem [shape: bf16[32,96], index: 4, kind: input, shape index: {}]   ;;  %s3169_s5 = inlined_call_operand.vmem [shape: f32[1,96], index: 5, kind: input, shape index: {}]   ;;  %s3170_s6 = inlined_call_operand.vmem [shape: bf16[32,32], index: 6, kind: input, shape index: {}]   ;;  %s3171_s7 = inlined_call_operand.vmem [shape: f32[1,32], index: 7, kind: input, shape index: {}]   ;;  %s3172_s8 = inlined_call_operand.vmem [shape: f32[1,32], index: 8, kind: input, shape index: {}]   ;;  %s3173_s9 = inlined_call_operand.hbm [shape: f32[1,32], index: 9, kind: input, shape index: {}]   ;;  %s3174_s10 = inlined_call_operand.vmem [shape: bf16[32,128], index: 10, kind: input, shape index: {}]   ;;  %s3175_s11 = inlined_call_operand.hbm [shape: f32[1,128], index: 11, kind: input, shape index: {}]   ;;  %s3176_s12 = inlined_call_operand.vmem [shape: bf16[128,32], index: 12, kind: input, shape index: {}]   ;;  %s3177_s13 = inlined_call_operand.vmem [shape: f32[1,32], index: 13, kind: input, shape index: {}]   ;;  %s3178_s14 = inlined_call_operand.hbm [shape: f32[32,32], index: 14, kind: output, shape index: {}]  }
   0x1   :  { %3191 = sst [smem:[#allocation19_spill]] %s3173_s9 }
   0x2   :  { %3192 = sst [smem:[#allocation20_spill]] %s3178_s14 }
   0x3   :  { %19 = vsyncpa [#allocation4], 0 }
   0x4   :  { %21 = vsyncpa [#allocation4 + $0x1], 0 }
   0x5   :  { %22 = vsyncpa [#allocation7], 0 }
   0x6   :  { %23 = vsyncpa [#allocation5], 0 }
   0x7   :  { %25 = vsyncpa [#allocation5 + $0x1], 0  ;;  %s2687_s29 = smov 0   ;;  %s2689_s30 = smov 0  }
   0x8   :  { %s2691_s15 = smov 0   ;;  %s2693_s16 = smov 0  }
   0x9 LB: > { %3193 = sst [smem:[#allocation13_spill]] %s2575_s29  ;;  %s2708_s17 = sadd.s32 4294967295, %s2587_s16   ;;  %s2587_s16 = sphi %s2693_s16, %s3220_s16   ;;  %s2583_s15 = sphi %s2691_s15, %s3222_s15   ;;  %s2579_s30 = sphi %s2689_s30, %s3224_s30   ;;  %s2575_s29 = sphi %s2687_s29, %s3223_s29  }
   0xa   : > { %3194 = sst [smem:[#allocation14_spill]] %s2583_s15  ;;  %s2032_s18 = sadd.s32 4294967294, %s2587_s16  }
   0xb   : > { %s2712_s19 = sadd.s32 1, %s2587_s16   ;;  %s64_s20 = sadd.s32 1, %s2583_s15 }
   0xc   : > { %3195 = sst [smem:[#allocation15_spill]] %s2712_s19  ;;  %s61_s21 = ssub.s32 %s2587_s16, %s2712_s19 }
   0xd   : > { %p71_p0 = scmp.ne.s32.totalorder %s2583_s15, %s2579_s30  ;;  %p62_p1 = scmp.eq.s32.totalorder %s61_s21, 0 }
   0xe   : > { %p72_p2 = scmp.eq.s32.totalorder %s2587_s16, 0  ;;  %p77_p3 = scmp.ne.s32.totalorder %s2579_s30, %s2575_s29 }
   0xf   : > { %p3179_p4 = scmp.eq.s32.totalorder %s2708_s17, 0  ;;  %p353_p7 = scmp.eq.s32.totalorder %s2708_s17, 1 }
  0x10   : > { %s2724_s22 = scalar_select %p62_p1, %s2583_s15, %s64_s20  }
  0x11   : > { %p2726_p5 = por %p72_p2, %p71_p0  ;;  %p2732_p6 = por %p3179_p4, %p77_p3 }
  0x12   : > { %3196 = sst [smem:[#allocation16_spill]] %s2724_s22  ;;  %p359_p8 = scmp.eq.s32.totalorder %s2032_s18, 1 }
  0x13   : > { %s3198_s24 = scalar_select %p2732_p6, 1, 0 }
  0x14   : > { %p2033_p9 = scmp.ge.s32.totalorder %s2587_s16, 1  ;;  %p366_p10 = scmp.lt.s32.totalorder %s2587_s16, 3 }
  0x15   : > { %p2739_p11 = por %p353_p7, %p71_p0  ;;  %p2743_p12 = por %p359_p8, %p77_p3 }
  0x16   : > { %p2747_p13 = pnand %p2033_p9, %p366_p10  ;;  %s2589_s28 = smov [#allocation6]  }
  0x17   : > { %s3199_s25 = scalar_select %p2739_p11, 1, 0 }
  0x18   : > { %s3201_s26 = scalar_select %p2743_p12, 1, 0 }
  0x19   : > { %3200 = sst [smem:[#allocation17_spill]] %s3199_s25  ;;  %p2303_p2 = pneg %p2747_p13 }
  0x1a   : > { %3202 = sst [smem:[#allocation18_spill]] %s3201_s26  ;;  %s400_s18 = sshll.u32 %s2589_s28, 4  ;;  %s401_s18 = int_to_ptr.vmem [resolvable:$true] %s400_s18 }
  0x1b   : > { %s3203_s27 = scalar_select %p2747_p13, 1, 0 }
  0x1c   : > { %p2320_p4 = scmp.lt.s32.totalorder %s2587_s16, 2  ;;  %p3204_p0 = scmp.eq.s32.totalorder %s2708_s17, 0 }
  0x1d   : > { %s2590_s22 = smov [#allocation8]   ;;  %s2450_s28 = scalar_lea.vmem %s401_s18, 16 }
  0x1e   : > { %p2757_p7 = pnand %p2303_p2, %p3204_p0  ;;  %p2763_p3 = pnand %p2320_p4, %p2726_p5 }
  0x1f   : > { %s414_s19 = sshll.u32 %s2590_s22, 4  ;;  %p2451_p9 = scmp.ne.s32.totalorder %s401_s18, %s2450_s28  ;;  %s415_s19 = int_to_ptr.vmem [resolvable:$true] %s414_s19 }
  0x20   : > { %p2441_p8 = pneg %p2757_p7  ;;  %s2457_s26 = scalar_lea.vmem %s401_s18, 32 }
  0x21   : > { %p2458_p0 = scmp.lt.s32.totalorder %s401_s18, %s401_s18  ;;  %p2459_p1 = scmp.lt.s32.totalorder %s2457_s26, %s2450_s28 }
  0x22   : > { %p2453_p10 = pnand %p2451_p9, %p2441_p8 }
  0x23   : > { %p2460_p12 = por %p2459_p1, %p2458_p0 }
  0x24   : > { %p2454_p2 = pneg %p2453_p10 }
  0x26   : > { %p2461_p11 = pnand %p2460_p12, %p2454_p2 }
  0x28   : > { %2464 = shalt.err (!%p2461_p11)
}
  0x29   : > { %s3207_s9 = sld [smem:[#allocation19_spill]]  ;;  %s440_s22 = sand.u32 1, %s2583_s15  }
  0x2a   : > { %s2476_s14 = scalar_lea.vmem %s415_s19, 16  ;;  %s2483_s25 = scalar_lea.vmem %s415_s19, 32 }
  0x2b   : > { %p2477_p4 = scmp.ne.s32.totalorder %s415_s19, %s2476_s14  ;;  %p2484_p10 = scmp.lt.s32.totalorder %s415_s19, %s415_s19 }
  0x2c   : > { %p2485_p1 = scmp.lt.s32.totalorder %s2483_s25, %s2476_s14 }
  0x2d   : > { %p2479_p5 = pnand %p2477_p4, %p2441_p8 }
  0x2e   : > { %p2486_p12 = por %p2485_p1, %p2484_p10 }
  0x2f   : > { %2306 = dma.hbm_to_vmem [thread:$0]  (!%p2757_p7), %s3207_s9, 16, %s401_s18, [#allocation7]  }
  0x30   : > { %p2480_p9 = pneg %p2479_p5 }
  0x32   : > { %p2487_p11 = pnand %p2486_p12, %p2480_p9 }
  0x34   : > { %2490 = shalt.err (!%p2487_p11)
}
  0x35   : > { %2309 = dma.hbm_to_vmem [thread:$0]  (!%p2757_p7), %s3175_s11, 16, %s415_s19, [#allocation7]  }
  0x36   : > { %s2037_s18 = sshll.u32 %s440_s22, 1  ;;  %s2097_s28 = sshll.u32 %s2587_s16, 5 }
  0x37   : > { %s2790_s15 = scalar_lea.hbm %s3165_s1, %s2097_s28  ;;  %s444_s14 = scalar_lea.vmem [#allocation3], %s2037_s18 }
  0x38   : > { %s451_s25 = sshll.u32 %s444_s14, 4  ;;  %s2794_s20 = scalar_lea.sflag [#allocation4], %s440_s22  ;;  %s2792_s25 = int_to_ptr.vmem [resolvable:$true] %s451_s25 }
  0x39   : > { %s2491_s26 = scalar_lea.hbm %s2790_s15, 32  ;;  %p2493_p7 = pneg %p2763_p3 }
  0x3a   : > { %p2492_p8 = scmp.ne.s32.totalorder %s2790_s15, %s2491_s26  ;;  %s2496_s9 = scalar_lea.hbm %s3165_s1, 64 }
  0x3b   : > { %p2497_p4 = scmp.lt.s32.totalorder %s2790_s15, %s3165_s1  ;;  %p2498_p5 = scmp.lt.s32.totalorder %s2496_s9, %s2491_s26 }
  0x3c   : > { %p2494_p2 = pnand %p2493_p7, %p2492_p8 }
  0x3d   : > { %p2499_p9 = por %p2498_p5, %p2497_p4 }
  0x3e   : > { %p2495_p0 = pneg %p2494_p2 }
  0x40   : > { %p2500_p10 = pnand %p2499_p9, %p2495_p0 }
  0x42   : > { %2503 = shalt.err (!%p2500_p10)
}
  0x43   : > { %s2504_s22 = scalar_lea.vmem %s2792_s25, 32  ;;  %s2591_s18 = smov [#allocation3]  }
  0x44   : > { %p2505_p1 = scmp.ne.s32.totalorder %s2792_s25, %s2504_s22  ;;  %s2509_s14 = sshll.u32 %s2591_s18, 4  ;;  %s2510_s14 = int_to_ptr.vmem [resolvable:$false] %s2509_s14 }
  0x45   : > { %s2511_s19 = scalar_lea.vmem %s2510_s14, 64  ;;  %p2512_p8 = scmp.lt.s32.totalorder %s2792_s25, %s2510_s14 }
  0x46   : > { %p2507_p12 = pnand %p2505_p1, %p2493_p7  ;;  %p2513_p2 = scmp.lt.s32.totalorder %s2511_s19, %s2504_s22 }
  0x48   : > { %p2508_p11 = pneg %p2507_p12  ;;  %p2514_p6 = por %p2513_p2, %p2512_p8 }
  0x4a   : > { %p2515_p13 = pnand %p2514_p6, %p2508_p11 }
  0x4c   : > { %2518 = shalt.err (!%p2515_p13)
}
  0x4d   : > { %s2592_s26 = smov 16   ;;  %s2593_s29 = smov 1  }
  0x4e   : > { %2313 = dma.hbm_to_vmem [thread:$0]  (!%p2763_p3), %s2790_s15, 32, %s2792_s25, %s2794_s20, %s2592_s26, %s2592_s26, %s2593_s29  }
  0x4f   : > { %p3208_p7 = scmp.ne.s32.totalorder %s3203_s27, 0 }
  0x50   : > { %s2818_s9 = sand.u32 (!%p3208_p7), 1, %s2579_s30   ;;  %p3209_p6 = scmp.ne.s32.totalorder (!%p3208_p7), %s3198_s24, 0 }
  0x51   : > { %463 = sbr.rel (%p3208_p7) target bundleno = 3800 (0xed8), region = 76  ;;  %s2041_s28 = sshll.u32 (!%p3208_p7), %s2818_s9, 1 }
  0x52   : > { %s466_s23 = scalar_lea.sflag (!%p3208_p7), [#allocation4], %s2818_s9  ;;  %s2822_s22 = scalar_lea.vmem (!%p3208_p7), [#allocation3], %s2041_s28 }
  0x56   : > { %2562 = dma.done.wait (%p3209_p6), %s466_s23, 32  }
  0x57   : > { %2564 = vsyncadd (%p3209_p6), %s466_s23, 4294967264  ;;  %p3210_p13 = scmp.eq.s32.totalorder %s2708_s17, 0 }
  0x59   : > { %2566 = dma.done.wait (%p3210_p13), [#allocation7], 32   ;;  %p3211_p3 = pmov %p3210_p13 }
  0x5a   : > { %s2045_s15 = sshll.u32 %s2708_s17, 1  ;;  %vm546_vm0 = vcmask 261120   ;;  %v2377_v8 = vld [vmem:[%s3168_s4 + $0x8] sm:$0xff]   ;;  %v2594_v9 = vmov 0.0   ;;  %vm2595_vm1 = vmmov 0   ;;  %v2378_v10 = vld [vmem:[%s3168_s4] sm:$0xff]   ;;  %v670_v51 = vlaneseq }
  0x5b   : > { %2568 = vsyncadd (%p3211_p3), [#allocation7], 4294967264  ;;  %p528_p0 = scmp.lt.s32.totalorder %s2045_s15, 3  ;;  %2151 = vmatprep.subr.bf16.mxu0 %v2594_v9  ;;  %2155 = vmatprep.mubr.msk.bf16.mxu0 %vm2595_vm1, %v2594_v9  ;;  %v2047_v28 = vld [vmem:[%s3166_s2] ss:$0 sm:$0xff]  ;;  %s2596_s21 = smov 96  }
  0x5c   : > { %2152 = vmatpush3.bf16.msra.mxu0 %v2377_v8  ;;  %2171 = vmatprep.subr.bf16.mxu1 %v2594_v9  ;;  %v2048_v33 = vld [vmem:[%s3167_s3] ss:$0 sm:$0xff]  ;;  %vm682_vm2 = vcmask 64512   ;;  %v538_v52 = vld [vmem:[%s2822_s22] sm:$0x1]  ;;  %v671_v53 = vshrl.u32 %v670_v51, 7 }
  0x5d   : > { %s3226_s15 = smov (!%p528_p0, %s2045_s15), 3  ;;  %2153 = vmatprep.subr.bf16.mxu0 %v2594_v9  ;;  %2173 = vmatprep.mubr.msk.bf16.mxu1 %vm2595_vm1, %v2594_v9  ;;  %v2049_v38 = vld [vmem:[%s3169_s5] ss:$0 sm:$0xff]  ;;  %vm540_vm3 = vcmp.gt.f32.partialorder %v538_v52, 0.5  ;;  %v539_v56 = vld [vmem:[%s2822_s22 + $0x1] sm:$0x1] }
  0x5e   : > { %s2046_s27 = sshll.u32 %s3226_s15, 3  ;;  %v672_v54 = vsub.s32 0, %v671_v53  ;;  %v542_v55 = vsel %vm540_vm3, -1e+30, %v2594_v9  ;;  %vm541_vm4 = vcmp.gt.f32.partialorder %v539_v56, 0.5  ;;  %s2597_s22 = smov 64  }
  0x5f   : > { %s531_s20 = scalar_lea.vmem %s3164_s0, %s2046_s27  ;;  %v543_v61 = vsel %vm541_vm4, -1e+30, %v2594_v9  ;;  %s2598_s25 = smov 88   ;;  %vm806_vm5 = vcmask 1043456   ;;  %vm1128_vm6 = vcmask 130112   ;;  %vm1359_vm7 = vcmask 195712  }
  0x60   : > { %v2836_v0 = vld [vmem:[%s531_s20] sm:$0xff]  ;;  %v2838_v1 = vld [vmem:[%s531_s20 + $0x8] sm:$0xff]  ;;  %2154 = vmatpush3.bf16.msra.mxu0 %v2378_v10  ;;  %v2899_v57 = vrot.slane %v542_v55, %v672_v54  ;;  %s2599_s20 = smov 120   ;;  %s2600_s24 = smov 56   ;;  %vm1590_vm8 = vcmask 261312  }
  0x61   : > { %v547_v2 = vsel %vm546_vm0, %v2836_v0, 0.0  ;;  %v556_v3 = vmul.f32 %v2836_v0, %v2836_v0  ;;  %v550_v4 = vsel %vm546_vm0, %v2838_v1, 0.0  ;;  %v557_v5 = vmul.f32 %v2838_v1, %v2838_v1  ;;  %2159 = vmatprep.subr.bf16.mxu0 %v2594_v9  ;;  %s2601_s18 = smov 80   ;;  %s2602_s14 = smov 112  }
  0x62   : > { %548 = vadd.xlane.f32.xlu0 %v547_v2  ;;  %v2904_v2 = vrot.slane %v543_v61, %v672_v54  ;;  %s2603_s19 = smov 48   ;;  %s2604_s26 = smov 72  }
  0x63   : > { %v558_v6 = vsel %vm546_vm0, %v556_v3, 0.0  ;;  %v561_v7 = vsel %vm546_vm0, %v557_v5, 0.0  ;;  %s2605_s29 = smov 104   ;;  %s2606_s28 = smov 40  }
  0x64   : > { %559 = vadd.xlane.f32.xlu1 %v558_v6  ;;  %s2607_s23 = smov 8   ;;  %s2608_s15 = smov 16  }
  0x66   : > { %551 = vadd.xlane.f32.xlu0 %v550_v4 }
  0x68   : > { %562 = vadd.xlane.f32.xlu1 %v561_v7 }
  0xeb   : > { %v549_v11 = vpop.xlane.xlu0 %548 }
  0xec   : > { %v554_v12 = vmul.f32 0.03125, %v549_v11 }
  0xed   : > { %v560_v13 = vpop.xlane.xlu1 %559 }
  0xee   : > { %v566_v14 = vmul.f32 %v554_v12, %v554_v12  ;;  %v564_v15 = vmul.f32 0.03125, %v560_v13  ;;  %v570_v25 = vsub.f32 %v2836_v0, %v554_v12 }
  0xef   : > { %v552_v16 = vpop.xlane.xlu0 %551 }
  0xf0   : > { %v568_v17 = vsub.f32 %v564_v15, %v566_v14  ;;  %v555_v18 = vmul.f32 0.03125, %v552_v16 }
  0xf1   : > { %v563_v19 = vpop.xlane.xlu1 %562 }
  0xf2   : > { %v572_v20 = vadd.f32 1e-05, %v568_v17  ;;  %v567_v21 = vmul.f32 %v555_v18, %v555_v18  ;;  %v565_v22 = vmul.f32 0.03125, %v563_v19  ;;  %v571_v29 = vsub.f32 %v2838_v1, %v555_v18 }
  0xf4   : > { %2391 = vrsqrt.f32 %v572_v20  ;;  %v569_v23 = vsub.f32 %v565_v22, %v567_v21 }
  0xf6   : > { %v573_v24 = vadd.f32 1e-05, %v569_v23 }
  0xf8   : > { %2393 = vrsqrt.f32 %v573_v24 }
 0x101   : > { %v2392_v26 = vpop.eup %2391 }
 0x102   : > { %v576_v27 = vmul.f32 %v2392_v26, %v570_v25 }
 0x104   : > { %v584_v32 = vmul.f32 %v2047_v28, %v576_v27 }
 0x105   : > { %v2394_v30 = vpop.eup %2393 }
 0x106   : > { %v577_v31 = vmul.f32 %v2394_v30, %v571_v29  ;;  %v592_v35 = vadd.f32 %v2048_v33, %v584_v32 }
 0x108   : > { %v585_v34 = vmul.f32 %v2047_v28, %v577_v31 }
 0x10a   : > { %v593_v36 = vadd.f32 %v2048_v33, %v585_v34 }
 0x10c   : > { %v594_v37 = vpack.c.bf16 %v593_v36, %v592_v35 }
 0x10e   : > { %2156 = vmatmul.mubr.msk.bf16.vlgmr.msra.gmra.mxu0 %vm546_vm0, %v594_v37 }
 0x10f   : > { %2161 = vmatprep.mubr.msk.bf16.mxu0 %vm2595_vm1, %v2594_v9 }
 0x1ce   : > { %v655_v39 = vpop.f32.mrf.mxu0 }
 0x1cf   : > { %v656_v40 = vadd.f32 %v2049_v38, %v655_v39 }
 0x1d0   : > { %v2157_v41 = vpop.f32.mrf.mxu0 }
 0x1d1   : > { %v2878_v42 = vpack.c.bf16 %v656_v40, %v656_v40 }
 0x1d2   : > { %v658_v43 = vpop.f32.mrf.mxu0 }
 0x1d3   : > { %v659_v44 = vadd.f32 %v2049_v38, %v658_v43  ;;  %680 = vrot.lane.b32.xlu0 %v2878_v42, %s2596_s21 }
 0x1d4   : > { %v2158_v45 = vpop.f32.mrf.mxu0 }
 0x1d5   : > { %v2881_v46 = vpack.c.bf16 %v659_v44, %v659_v44 }
 0x1d7   : > { %729 = vrot.lane.b32.xlu1 %v2881_v46, %s2596_s21 }
 0x245   : > { %v681_v47 = vpop.permute.xlu0 %680 }
 0x246   : > { %v687_v48 = vsel %vm682_vm2, %v681_v47, 0 }
 0x247   : > { %2160 = vmatpush3.bf16.xpose.msra.mxu0 %v687_v48 }
 0x248   : > { %2165 = vmatprep.subr.bf16.mxu0 %v2594_v9 }
 0x249   : > { %v730_v49 = vpop.permute.xlu1 %729 }
 0x24a   : > { %v735_v50 = vsel %vm682_vm2, %v730_v49, 0 }
 0x24e   : > { %2162 = vmatmul.mubr.msk.bf16.vlgmr.msra.gmra.mxu0 %vm682_vm2, %v2878_v42 }
 0x24f   : > { %2166 = vmatpush3.bf16.xpose.msra.mxu0 %v735_v50  ;;  %2167 = vmatprep.mubr.msk.bf16.mxu0 %vm2595_vm1, %v2594_v9 }
 0x250   : > { %2177 = vmatprep.subr.bf16.mxu0 %v2594_v9 }
 0x256   : > { %2168 = vmatmul.mubr.msk.bf16.vlgmr.msra.gmra.mxu0 %vm682_vm2, %v2881_v46 }
 0x257   : > { %2179 = vmatprep.mubr.msk.bf16.mxu0 %vm2595_vm1, %v2594_v9 }
 0x30e   : > { %v723_v58 = vpop.f32.mrf.mxu0 }
 0x30f   : > { %v724_v59 = vadd.f32 %v723_v58, %v2899_v57 }
 0x310   : > { %v2163_v60 = vpop.f32.mrf.mxu0 }
 0x311   : > { %v777_v62 = vsel %vm682_vm2, %v724_v59, -inf }
 0x312   : > { %778 = vmax.xlane.f32.xlu1 %v777_v62  ;;  %v726_v63 = vpop.f32.mrf.mxu0 }
 0x314   : > { %v2164_v3 = vpop.f32.mrf.mxu0 }
 0x316   : > { %v771_v4 = vpop.f32.mrf.mxu0 }
 0x317   : > { %v772_v5 = vadd.f32 %v771_v4, %v2904_v2 }
 0x318   : > { %v2169_v6 = vpop.f32.mrf.mxu0 }
 0x319   : > { %v780_v7 = vsel %vm682_vm2, %v772_v5, -inf }
 0x31a   : > { %781 = vmax.xlane.f32.xlu0 %v780_v7  ;;  %v774_v8 = vpop.f32.mrf.mxu0 }
 0x31c   : > { %v2170_v10 = vpop.f32.mrf.mxu0 }
 0x323   : > { %850 = vrot.lane.b32.xlu1 %v2881_v46, %s2597_s22 }
 0x327   : > { %902 = vrot.lane.b32.xlu1 %v2878_v42, %s2598_s25 }
 0x39b   : > { %v779_v11 = vpop.xlane.xlu1 %778 }
 0x39c   : > { %v783_v12 = vsub.f32 %v724_v59, %v779_v11 }
 0x39e   : > { %v785_v13 = vmul.f32 1.442695, %v783_v12 }
 0x39f   : > { %v851_v14 = vpop.permute.xlu1 %850 }
 0x3a0   : > { %2395 = vpow2.f32 %v785_v13  ;;  %v856_v15 = vsel %vm806_vm5, %v851_v14, 0 }
 0x3a1   : > { %2178 = vmatpush3.bf16.msra.mxu0 %v856_v15 }
 0x3a2   : > { %2189 = vmatprep.subr.bf16.mxu0 %v2594_v9 }
 0x3a3   : > { %v782_v16 = vpop.xlane.xlu0 %781  ;;  %v903_v24 = vpop.permute.xlu1 %902 }
 0x3a4   : > { %v784_v17 = vsub.f32 %v772_v5, %v782_v16  ;;  %v908_v31 = vsel %vm682_vm2, %v903_v24, 0 }
 0x3a6   : > { %v787_v18 = vmul.f32 1.442695, %v784_v17 }
 0x3a8   : > { %2397 = vpow2.f32 %v787_v18 }
 0x3ad   : > { %v2396_v19 = vpop.eup %2395 }
 0x3ae   : > { %v789_v20 = vsel %vm682_vm2, %v2396_v19, 0.0 }
 0x3af   : > { %790 = vadd.xlane.f32.xlu0 %v789_v20 }
 0x3b5   : > { %v2398_v21 = vpop.eup %2397 }
 0x3b6   : > { %v792_v22 = vsel %vm682_vm2, %v2398_v21, 0.0 }
 0x3b7   : > { %793 = vadd.xlane.f32.xlu1 %v792_v22 }
 0x3c5   : > { %801 = vrot.lane.b32.xlu0 %v2878_v42, %s2597_s22 }
 0x3c8   : > { %952 = vrot.lane.b32.xlu1 %v2881_v46, %s2598_s25  ;;  %s2610_s25 = smov [#allocation9]  }
 0x3c9   : > { %900 = vrot.lane.b32.xlu0 %v2878_v42, %s2599_s20 }
 0x3cc   : > { %950 = vrot.lane.b32.xlu1 %v2881_v46, %s2599_s20  ;;  %s2609_s20 = smov 24  }
 0x438   : > { %v791_v23 = vpop.xlane.xlu0 %790 }
 0x439   : > { %2399 = vrcp.f32 %v791_v23 }
 0x43c   : > { %v802_v25 = vpop.permute.xlu0 %801 }
 0x43d   : > { %v808_v26 = vsel %vm806_vm5, %v802_v25, 0 }
 0x43e   : > { %2172 = vmatpush3.bf16.msra.mxu1 %v808_v26 }
 0x43f   : > { %2183 = vmatprep.subr.bf16.mxu1 %v2594_v9 }
 0x440   : > { %v794_v27 = vpop.xlane.xlu1 %793  ;;  %v901_v36 = vpop.permute.xlu0 %900 }
 0x441   : > { %2401 = vrcp.f32 %v794_v27 }
 0x444   : > { %v953_v34 = vpop.permute.xlu1 %952 }
 0x445   : > { %v958_v37 = vsel %vm682_vm2, %v953_v34, 0 }
 0x446   : > { %v2400_v28 = vpop.eup %2399 }
 0x447   : > { %v797_v29 = vmul.f32 %v2400_v28, %v2396_v19 }
 0x448   : > { %v951_v38 = vpop.permute.xlu1 %950 }
 0x449   : > { %v799_v30 = vpack.c.bf16 %v797_v29, %v797_v29 }
 0x44b   : > { %2174 = vmatmul.mubr.msk.bf16.vlgmr.msra.gmra.mxu1 %vm682_vm2, %v799_v30 }
 0x44c   : > { %2184 = vmatpush3.bf16.xpose.msra.mxu1 %v908_v31  ;;  %2185 = vmatprep.mubr.msk.bf16.mxu1 %vm2595_vm1, %v2594_v9 }
 0x44d   : > { %2195 = vmatprep.subr.bf16.mxu1 %v2594_v9 }
 0x44e   : > { %v2402_v32 = vpop.eup %2401 }
 0x44f   : > { %v798_v33 = vmul.f32 %v2402_v32, %v2398_v21 }
 0x451   : > { %v800_v35 = vpack.c.bf16 %v798_v33, %v798_v33 }
 0x453   : > { %2180 = vmatmul.mubr.msk.bf16.vlgmr.msra.gmra.mxu0 %vm682_vm2, %v800_v35  ;;  %2186 = vmatmul.mubr.msk.bf16.vlgmr.msra.gmra.mxu1 %vm682_vm2, %v901_v36 }
 0x454   : > { %2190 = vmatpush3.bf16.xpose.msra.mxu0 %v958_v37  ;;  %2191 = vmatprep.mubr.msk.bf16.mxu0 %vm2595_vm1, %v2594_v9 }
 0x455   : > { %2201 = vmatprep.subr.bf16.mxu0 %v2594_v9  ;;  %2197 = vmatprep.mubr.msk.bf16.mxu1 %vm2595_vm1, %v2594_v9 }
 0x45b   : > { %2192 = vmatmul.mubr.msk.bf16.vlgmr.msra.gmra.mxu0 %vm682_vm2, %v951_v38 }
 0x45c   : > { %2203 = vmatprep.mubr.msk.bf16.mxu0 %vm2595_vm1, %v2594_v9 }
 0x50b   : > { %v844_v39 = vpop.f32.mrf.mxu1 }
 0x50c   : > { %898 = vst.msk [vmem:[#allocation2] sm:$0xff] %vm682_vm2, %v844_v39 }
 0x50d   : > { %v2175_v40 = vpop.f32.mrf.mxu1 }
 0x50f   : > { %v847_v41 = vpop.f32.mrf.mxu1 }
 0x511   : > { %v2176_v43 = vpop.f32.mrf.mxu1 }
 0x513   : > { %v892_v44 = vpop.f32.mrf.mxu0  ;;  %v944_v45 = vpop.f32.mrf.mxu1 }
 0x514   : > { %899 = vst.msk [vmem:[#allocation2 + $0x8] sm:$0xff] %vm682_vm2, %v892_v44  ;;  %v945_v47 = vadd.f32 %v944_v45, %v2899_v57 }
 0x515   : > { %v2181_v48 = vpop.f32.mrf.mxu0  ;;  %v2187_v49 = vpop.f32.mrf.mxu1 }
 0x516   : > { %v1000_v50 = vsel %vm682_vm2, %v945_v47, -inf }
 0x517   : > { %1001 = vmax.xlane.f32.xlu0 %v1000_v50  ;;  %v895_v51 = vpop.f32.mrf.mxu0  ;;  %v947_v52 = vpop.f32.mrf.mxu1 }
 0x519   : > { %v2182_v53 = vpop.f32.mrf.mxu0  ;;  %v2188_v54 = vpop.f32.mrf.mxu1 }
 0x51b   : > { %v994_v55 = vpop.f32.mrf.mxu0 }
 0x51c   : > { %v995_v56 = vadd.f32 %v994_v55, %v2904_v2 }
 0x51d   : > { %v2193_v58 = vpop.f32.mrf.mxu0 }
 0x51e   : > { %v1003_v59 = vsel %vm682_vm2, %v995_v56, -inf }
 0x51f   : > { %1004 = vmax.xlane.f32.xlu1 %v1003_v59  ;;  %v997_v60 = vpop.f32.mrf.mxu0 }
 0x521   : > { %v2194_v61 = vpop.f32.mrf.mxu0 }
 0x530   : > { %1072 = vrot.lane.b32.xlu1 %v2881_v46, %s2600_s24 }
 0x534   : > { %1133 = vrot.lane.b32.xlu1 %v2878_v42, %s2601_s18 }
 0x538   : > { %1183 = vrot.lane.b32.xlu1 %v2881_v46, %s2601_s18  ;;  %s3212_s18 = sld [smem:[#allocation17_spill]] }
 0x53c   : > { %1181 = vrot.lane.b32.xlu1 %v2881_v46, %s2602_s14 }
 0x53e   : > { %p3215_p5 = scmp.ne.s32.totalorder %s3212_s18, 0 }
 0x5a0   : > { %v1002_v62 = vpop.xlane.xlu0 %1001 }
 0x5a1   : > { %v1006_v63 = vsub.f32 %v945_v47, %v1002_v62 }
 0x5a3   : > { %v1008_v3 = vmul.f32 1.442695, %v1006_v63 }
 0x5a5   : > { %2403 = vpow2.f32 %v1008_v3 }
 0x5a8   : > { %v1005_v4 = vpop.xlane.xlu1 %1004 }
 0x5a9   : > { %v1007_v5 = vsub.f32 %v995_v56, %v1005_v4 }
 0x5ab   : > { %v1010_v6 = vmul.f32 1.442695, %v1007_v5 }
 0x5ac   : > { %v1073_v7 = vpop.permute.xlu1 %1072 }
 0x5ad   : > { %2405 = vpow2.f32 %v1010_v6  ;;  %v1078_v8 = vsel %vm806_vm5, %v1073_v7, 0 }
 0x5ae   : > { %2202 = vmatpush3.bf16.msra.mxu0 %v1078_v8 }
 0x5af   : > { %2213 = vmatprep.subr.bf16.mxu0 %v2594_v9 }
 0x5b0   : > { %v1134_v20 = vpop.permute.xlu1 %1133 }
 0x5b1   : > { %v1139_v22 = vsel %vm682_vm2, %v1134_v20, 0 }
 0x5b2   : > { %v2404_v10 = vpop.eup %2403 }
 0x5b3   : > { %v1012_v11 = vsel %vm682_vm2, %v2404_v10, 0.0 }
 0x5b4   : > { %1013 = vadd.xlane.f32.xlu0 %v1012_v11  ;;  %v1184_v25 = vpop.permute.xlu1 %1183 }
 0x5b5   : > { %v1189_v28 = vsel %vm682_vm2, %v1184_v25, 0 }
 0x5b8   : > { %v1182_v29 = vpop.permute.xlu1 %1181 }
 0x5ba   : > { %v2406_v12 = vpop.eup %2405 }
 0x5bb   : > { %v1015_v13 = vsel %vm682_vm2, %v2406_v12, 0.0 }
 0x5bc   : > { %1016 = vadd.xlane.f32.xlu0 %v1015_v13 }
 0x5d2   : > { %1024 = vrot.lane.b32.xlu0 %v2878_v42, %s2600_s24  ;;  %s2044_s24 = sshll.u32 %s2818_s9, 4 }
 0x5d6   : > { %1131 = vrot.lane.b32.xlu0 %v2878_v42, %s2602_s14  ;;  %s2100_s14 = sshll.u32 %s2708_s17, 8  ;;  %s1915_s17 = scalar_lea.sflag [#allocation5], %s2818_s9 }
 0x63d   : > { %v1014_v14 = vpop.xlane.xlu0 %1013 }
 0x63e   : > { %2407 = vrcp.f32 %v1014_v14 }
 0x645   : > { %v1017_v15 = vpop.xlane.xlu0 %1016 }
 0x646   : > { %2409 = vrcp.f32 %v1017_v15 }
 0x649   : > { %v1025_v16 = vpop.permute.xlu0 %1024 }
 0x64a   : > { %v1030_v17 = vsel %vm806_vm5, %v1025_v16, 0 }
 0x64b   : > { %v2408_v18 = vpop.eup %2407  ;;  %2196 = vmatpush3.bf16.msra.mxu1 %v1030_v17 }
 0x64c   : > { %2207 = vmatprep.subr.bf16.mxu1 %v2594_v9  ;;  %v1020_v19 = vmul.f32 %v2408_v18, %v2404_v10 }
 0x64d   : > { %v1132_v27 = vpop.permute.xlu0 %1131 }
 0x64e   : > { %v1022_v21 = vpack.c.bf16 %v1020_v19, %v1020_v19 }
 0x650   : > { %2198 = vmatmul.mubr.msk.bf16.vlgmr.msra.gmra.mxu1 %vm682_vm2, %v1022_v21 }
 0x651   : > { %2208 = vmatpush3.bf16.xpose.msra.mxu1 %v1139_v22  ;;  %2209 = vmatprep.mubr.msk.bf16.mxu1 %vm2595_vm1, %v2594_v9 }
 0x652   : > { %2219 = vmatprep.subr.bf16.mxu1 %v2594_v9 }
 0x653   : > { %v2410_v23 = vpop.eup %2409 }
 0x654   : > { %v1021_v24 = vmul.f32 %v2410_v23, %v2406_v12 }
 0x656   : > { %v1023_v26 = vpack.c.bf16 %v1021_v24, %v1021_v24 }
 0x658   : > { %2204 = vmatmul.mubr.msk.bf16.vlgmr.msra.gmra.mxu0 %vm682_vm2, %v1023_v26  ;;  %2210 = vmatmul.mubr.msk.bf16.vlgmr.msra.gmra.mxu1 %vm682_vm2, %v1132_v27 }
 0x659   : > { %2214 = vmatpush3.bf16.xpose.msra.mxu0 %v1189_v28  ;;  %2215 = vmatprep.mubr.msk.bf16.mxu0 %vm2595_vm1, %v2594_v9 }
 0x65a   : > { %2225 = vmatprep.subr.bf16.mxu0 %v2594_v9  ;;  %2221 = vmatprep.mubr.msk.bf16.mxu1 %vm2595_vm1, %v2594_v9 }
 0x660   : > { %2216 = vmatmul.mubr.msk.bf16.vlgmr.msra.gmra.mxu0 %vm682_vm2, %v1182_v29 }
 0x661   : > { %2227 = vmatprep.mubr.msk.bf16.mxu0 %vm2595_vm1, %v2594_v9 }
 0x710   : > { %v2970_v30 = vpop.f32.mrf.mxu1 }
 0x712   : > { %v2199_v31 = vpop.f32.mrf.mxu1 }
 0x714   : > { %v1069_v32 = vpop.f32.mrf.mxu1 }
 0x716   : > { %v2200_v33 = vpop.f32.mrf.mxu1 }
 0x718   : > { %v2972_v34 = vpop.f32.mrf.mxu0  ;;  %v1175_v35 = vpop.f32.mrf.mxu1 }
 0x719   : > { %v1176_v36 = vadd.f32 %v1175_v35, %v2899_v57 }
 0x71a   : > { %v2205_v37 = vpop.f32.mrf.mxu0  ;;  %v2211_v38 = vpop.f32.mrf.mxu1 }
 0x71b   : > { %v1231_v39 = vsel %vm682_vm2, %v1176_v36, -inf }
 0x71c   : > { %1232 = vmax.xlane.f32.xlu0 %v1231_v39  ;;  %v1117_v40 = vpop.f32.mrf.mxu0  ;;  %v1178_v41 = vpop.f32.mrf.mxu1 }
 0x71e   : > { %v2206_v43 = vpop.f32.mrf.mxu0  ;;  %v2212_v44 = vpop.f32.mrf.mxu1 }
 0x720   : > { %v1225_v45 = vpop.f32.mrf.mxu0 }
 0x721   : > { %v1226_v47 = vadd.f32 %v1225_v45, %v2904_v2 }
 0x722   : > { %v2217_v48 = vpop.f32.mrf.mxu0 }
 0x723   : > { %v1234_v49 = vsel %vm682_vm2, %v1226_v47, -inf }
 0x724   : > { %1235 = vmax.xlane.f32.xlu1 %v1234_v49  ;;  %v1228_v50 = vpop.f32.mrf.mxu0 }
 0x726   : > { %v2218_v51 = vpop.f32.mrf.mxu0 }
 0x735   : > { %1303 = vrot.lane.b32.xlu1 %v2881_v46, %s2603_s19 }
 0x739   : > { %1364 = vrot.lane.b32.xlu1 %v2878_v42, %s2604_s26 }
 0x73d   : > { %1414 = vrot.lane.b32.xlu1 %v2881_v46, %s2604_s26 }
 0x741   : > { %1412 = vrot.lane.b32.xlu1 %v2881_v46, %s2605_s29 }
 0x7a5   : > { %v1233_v52 = vpop.xlane.xlu0 %1232 }
 0x7a6   : > { %v1237_v53 = vsub.f32 %v1176_v36, %v1233_v52 }
 0x7a8   : > { %v1239_v54 = vmul.f32 1.442695, %v1237_v53 }
 0x7aa   : > { %2411 = vpow2.f32 %v1239_v54 }
 0x7ad   : > { %v1236_v55 = vpop.xlane.xlu1 %1235 }
 0x7ae   : > { %v1238_v56 = vsub.f32 %v1226_v47, %v1236_v55 }
 0x7b0   : > { %v1241_v58 = vmul.f32 1.442695, %v1238_v56 }
 0x7b1   : > { %v1304_v59 = vpop.permute.xlu1 %1303 }
 0x7b2   : > { %2413 = vpow2.f32 %v1241_v58  ;;  %v1309_v60 = vsel %vm806_vm5, %v1304_v59, 0 }
 0x7b3   : > { %2226 = vmatpush3.bf16.msra.mxu0 %v1309_v60 }
 0x7b4   : > { %2237 = vmatprep.subr.bf16.mxu0 %v2594_v9 }
 0x7b5   : > { %v1365_v11 = vpop.permute.xlu1 %1364 }
 0x7b6   : > { %v1370_v13 = vsel %vm682_vm2, %v1365_v11, 0 }
 0x7b7   : > { %v2412_v61 = vpop.eup %2411 }
 0x7b8   : > { %v1243_v62 = vsel %vm682_vm2, %v2412_v61, 0.0 }
 0x7b9   : > { %1244 = vadd.xlane.f32.xlu0 %v1243_v62  ;;  %v1415_v16 = vpop.permute.xlu1 %1414 }
 0x7ba   : > { %v1420_v19 = vsel %vm682_vm2, %v1415_v16, 0 }
 0x7bd   : > { %v1413_v20 = vpop.permute.xlu1 %1412 }
 0x7bf   : > { %v2414_v63 = vpop.eup %2413 }
 0x7c0   : > { %v1246_v3 = vsel %vm682_vm2, %v2414_v63, 0.0 }
 0x7c1   : > { %1247 = vadd.xlane.f32.xlu0 %v1246_v3 }
 0x7d7   : > { %1255 = vrot.lane.b32.xlu0 %v2878_v42, %s2603_s19  ;;  %s526_s19 = scalar_lea.vmem [#allocation9], %s2044_s24 }
 0x7d8   : > { %s1928_s26 = sshll.u32 %s526_s19, 4  ;;  %s3119_s26 = int_to_ptr.vmem [resolvable:$true] %s1928_s26 }
 0x7d9   : > { %s2519_s22 = scalar_lea.vmem %s3119_s26, 256 }
 0x7da   : > { %p2520_p4 = scmp.ne.s32.totalorder %s3119_s26, %s2519_s22 }
 0x7db   : > { %1362 = vrot.lane.b32.xlu0 %v2878_v42, %s2605_s29 }
 0x7dc   : > { %p2521_p9 = pnand %p2520_p4, %p3215_p5 }
 0x7de   : > { %p2522_p10 = pneg %p2521_p9 }
 0x842   : > { %v1245_v4 = vpop.xlane.xlu0 %1244 }
 0x843   : > { %2415 = vrcp.f32 %v1245_v4 }
 0x84a   : > { %v1248_v5 = vpop.xlane.xlu0 %1247 }
 0x84b   : > { %2417 = vrcp.f32 %v1248_v5  ;;  %v2379_v5 = vld [vmem:[%s3170_s6 + $0x8] sm:$0xff]  }
 0x84e   : > { %v1256_v6 = vpop.permute.xlu0 %1255 }
 0x84f   : > { %v1261_v7 = vsel %vm806_vm5, %v1256_v6, 0  ;;  %v2380_v6 = vld [vmem:[%s3170_s6] sm:$0xff]  }
 0x850   : > { %v2416_v8 = vpop.eup %2415  ;;  %2220 = vmatpush3.bf16.msra.mxu1 %v1261_v7 }
 0x851   : > { %2231 = vmatprep.subr.bf16.mxu1 %v2594_v9  ;;  %v1251_v10 = vmul.f32 %v2416_v8, %v2412_v61 }
 0x852   : > { %v1363_v18 = vpop.permute.xlu0 %1362 }
 0x853   : > { %v1253_v12 = vpack.c.bf16 %v1251_v10, %v1251_v10 }
 0x855   : > { %2222 = vmatmul.mubr.msk.bf16.vlgmr.msra.gmra.mxu1 %vm682_vm2, %v1253_v12 }
 0x856   : > { %2232 = vmatpush3.bf16.xpose.msra.mxu1 %v1370_v13  ;;  %2233 = vmatprep.mubr.msk.bf16.mxu1 %vm2595_vm1, %v2594_v9 }
 0x857   : > { %2243 = vmatprep.subr.bf16.mxu1 %v2594_v9 }
 0x858   : > { %v2418_v14 = vpop.eup %2417 }
 0x859   : > { %v1252_v15 = vmul.f32 %v2418_v14, %v2414_v63 }
 0x85b   : > { %v1254_v17 = vpack.c.bf16 %v1252_v15, %v1252_v15 }
 0x85d   : > { %2228 = vmatmul.mubr.msk.bf16.vlgmr.msra.gmra.mxu0 %vm682_vm2, %v1254_v17  ;;  %2234 = vmatmul.mubr.msk.bf16.vlgmr.msra.gmra.mxu1 %vm682_vm2, %v1363_v18 }
 0x85e   : > { %2238 = vmatpush3.bf16.xpose.msra.mxu0 %v1420_v19  ;;  %2239 = vmatprep.mubr.msk.bf16.mxu0 %vm2595_vm1, %v2594_v9 }
 0x85f   : > { %2249 = vmatprep.subr.bf16.mxu0 %v2594_v9  ;;  %2245 = vmatprep.mubr.msk.bf16.mxu1 %vm2595_vm1, %v2594_v9 }
 0x865   : > { %2240 = vmatmul.mubr.msk.bf16.vlgmr.msra.gmra.mxu0 %vm682_vm2, %v1413_v20 }
 0x866   : > { %2251 = vmatprep.mubr.msk.bf16.mxu0 %vm2595_vm1, %v2594_v9 }
 0x915   : > { %v1297_v21 = vpop.f32.mrf.mxu1 }
 0x917   : > { %v2223_v22 = vpop.f32.mrf.mxu1 }
 0x919   : > { %v1300_v23 = vpop.f32.mrf.mxu1 }
 0x91b   : > { %v2224_v24 = vpop.f32.mrf.mxu1 }
 0x91d   : > { %v1345_v25 = vpop.f32.mrf.mxu0  ;;  %v1406_v26 = vpop.f32.mrf.mxu1 }
 0x91e   : > { %v1407_v27 = vadd.f32 %v1406_v26, %v2899_v57 }
 0x91f   : > { %v2229_v28 = vpop.f32.mrf.mxu0  ;;  %v2235_v29 = vpop.f32.mrf.mxu1 }
 0x920   : > { %v1462_v31 = vsel %vm682_vm2, %v1407_v27, -inf }
 0x921   : > { %1463 = vmax.xlane.f32.xlu0 %v1462_v31  ;;  %v1348_v32 = vpop.f32.mrf.mxu0  ;;  %v1409_v33 = vpop.f32.mrf.mxu1 }
 0x923   : > { %v2230_v35 = vpop.f32.mrf.mxu0  ;;  %v2236_v36 = vpop.f32.mrf.mxu1 }
 0x925   : > { %v1456_v37 = vpop.f32.mrf.mxu0 }
 0x926   : > { %v1457_v38 = vadd.f32 %v1456_v37, %v2904_v2  ;;  %v2381_v37 = vld [vmem:[%s3174_s10 + $0x8] sm:$0xff]  }
 0x927   : > { %v2241_v39 = vpop.f32.mrf.mxu0 }
 0x928   : > { %v1465_v40 = vsel %vm682_vm2, %v1457_v38, -inf }
 0x929   : > { %1466 = vmax.xlane.f32.xlu1 %v1465_v40  ;;  %v1459_v41 = vpop.f32.mrf.mxu0 }
 0x92b   : > { %v2242_v43 = vpop.f32.mrf.mxu0 }
 0x93a   : > { %1534 = vrot.lane.b32.xlu1 %v2881_v46, %s2606_s28 }
 0x93e   : > { %1122 = vrot.lane.b32.xlu1 %v2970_v30, %s2607_s23 }
 0x942   : > { %1124 = vrot.lane.b32.xlu1 %v2972_v34, %s2607_s23 }
 0x946   : > { %1355 = vrot.lane.b32.xlu1 %v1345_v25, %s2608_s15 }
 0x9aa   : > { %v1464_v57 = vpop.xlane.xlu0 %1463 }
 0x9ab   : > { %v1468_v2 = vsub.f32 %v1407_v27, %v1464_v57 }
 0x9ad   : > { %v1470_v44 = vmul.f32 1.442695, %v1468_v2 }
 0x9af   : > { %2419 = vpow2.f32 %v1470_v44 }
 0x9b2   : > { %v1467_v45 = vpop.xlane.xlu1 %1466 }
 0x9b3   : > { %v1469_v47 = vsub.f32 %v1457_v38, %v1467_v45 }
 0x9b5   : > { %v1472_v48 = vmul.f32 1.442695, %v1469_v47 }
 0x9b6   : > { %v1535_v49 = vpop.permute.xlu1 %1534 }
 0x9b7   : > { %2421 = vpow2.f32 %v1472_v48  ;;  %v1540_v46 = vsel %vm806_vm5, %v1535_v49, 0 }
 0x9b8   : > { %2250 = vmatpush3.bf16.msra.mxu0 %v1540_v46 }
 0x9b9   : > { %2263 = vmatprep.subr.bf16.mxu0 %v2594_v9 }
 0x9ba   : > { %v1123_v30 = vpop.permute.xlu1 %1122 }
 0x9bb   : > { %1129 = vst.msk [vmem:[#allocation2] sm:$0xff] %vm1128_vm6, %v1123_v30 }
 0x9bc   : > { %v2420_v34 = vpop.eup %2419 }
 0x9bd   : > { %v1474_v50 = vsel %vm682_vm2, %v2420_v34, 0.0 }
 0x9be   : > { %1475 = vadd.xlane.f32.xlu0 %v1474_v50  ;;  %v1125_v51 = vpop.permute.xlu1 %1124 }
 0x9bf   : > { %1130 = vst.msk [vmem:[#allocation2 + $0x8] sm:$0xff] %vm1128_vm6, %v1125_v51 }
 0x9c2   : > { %v1356_v52 = vpop.permute.xlu1 %1355 }
 0x9c3   : > { %1361 = vst.msk [vmem:[#allocation2 + $0x8] sm:$0xff] %vm1359_vm7, %v1356_v52  ;;  %v2075_v52 = vld [vmem:[%s3172_s8] ss:$0 sm:$0xff] }
 0x9c4   : > { %v2422_v53 = vpop.eup %2421 }
 0x9c5   : > { %v1477_v54 = vsel %vm682_vm2, %v2422_v53, 0.0 }
 0x9c6   : > { %1478 = vadd.xlane.f32.xlu0 %v1477_v54 }
 0x9dc   : > { %1486 = vrot.lane.b32.xlu0 %v2878_v42, %s2606_s28 }
 0x9e0   : > { %1353 = vrot.lane.b32.xlu0 %v1297_v21, %s2608_s15  ;;  %v2071_v21 = vld [vmem:[%s3171_s7] ss:$0 sm:$0xff]  ;;  %s3213_s15 = sld [smem:[#allocation20_spill]] }
 0x9e6   : > { %s3214_s27 = smov %s3213_s15  ;;  %s3116_s21 = scalar_lea.hbm %s3213_s15, %s2100_s14 }
 0xa47   : > { %v1476_v55 = vpop.xlane.xlu0 %1475 }
 0xa48   : > { %2423 = vrcp.f32 %v1476_v55 }
 0xa4f   : > { %v1479_v56 = vpop.xlane.xlu0 %1478 }
 0xa50   : > { %2425 = vrcp.f32 %v1479_v56 }
 0xa53   : > { %v1487_v58 = vpop.permute.xlu0 %1486 }
 0xa54   : > { %v1492_v59 = vsel %vm806_vm5, %v1487_v58, 0  ;;  %v2076_v58 = vld [vmem:[#allocation6] ss:$0 sm:$0xff] }
 0xa55   : > { %v2424_v60 = vpop.eup %2423  ;;  %2244 = vmatpush3.bf16.msra.mxu1 %v1492_v59 }
 0xa56   : > { %v1482_v61 = vmul.f32 %v2424_v60, %v2420_v34  ;;  %2255 = vmatprep.subr.bf16.mxu1 %v2594_v9 }
 0xa57   : > { %v1354_v62 = vpop.permute.xlu0 %1353 }
 0xa58   : > { %1360 = vst.msk [vmem:[#allocation2] sm:$0xff] %vm1359_vm7, %v1354_v62  ;;  %v1484_v63 = vpack.c.bf16 %v1482_v61, %v1482_v61 }
 0xa5a   : > { %2246 = vmatmul.mubr.msk.bf16.vlgmr.msra.gmra.mxu1 %vm682_vm2, %v1484_v63  ;;  %v2383_v63 = vld [vmem:[%s3176_s12 + $0x38] sm:$0xff]  }
 0xa5b   : > { %2259 = vmatprep.mubr.msk.bf16.mxu1 %vm2595_vm1, %v2594_v9  ;;  %2256 = vmatpush3.bf16.msra.mxu1 %v2379_v5  ;;  %v2387_v5 = vld [vmem:[%s3176_s12 + $0x18] sm:$0xff]  }
 0xa5c   : > { %2257 = vmatprep.subr.bf16.mxu1 %v2594_v9 }
 0xa5d   : > { %v2426_v42 = vpop.eup %2425 }
 0xa5e   : > { %v1483_v3 = vmul.f32 %v2426_v42, %v2422_v53  ;;  %v2384_v42 = vld [vmem:[%s3176_s12 + $0x30] sm:$0xff]  }
 0xa5f   : > { %2258 = vmatpush3.bf16.msra.mxu1 %v2380_v6  ;;  %v2388_v6 = vld [vmem:[%s3176_s12 + $0x10] sm:$0xff]  }
 0xa60   : > { %v1485_v4 = vpack.c.bf16 %v1483_v3, %v1483_v3  ;;  %2271 = vmatprep.subr.bf16.mxu1 %v2594_v9  ;;  %v2385_v3 = vld [vmem:[%s3176_s12 + $0x28] sm:$0xff]  }
 0xa62   : > { %2252 = vmatmul.mubr.msk.bf16.vlgmr.msra.gmra.mxu0 %vm682_vm2, %v1485_v4  ;;  %v2386_v4 = vld [vmem:[%s3176_s12 + $0x20] sm:$0xff]  }
 0xa63   : > { %2267 = vmatprep.mubr.msk.bf16.mxu0 %vm2595_vm1, %v2594_v9  ;;  %2264 = vmatpush3.bf16.msra.mxu0 %v2381_v37 }
 0xa64   : > { %2265 = vmatprep.subr.bf16.mxu0 %v2594_v9 }
 0xb1a   : > { %v1528_v7 = vpop.f32.mrf.mxu1 }
 0xb1b   : > { %1584 = vrot.lane.b32.xlu0 %v1528_v7, %s2609_s20  ;;  %v2389_v7 = vld [vmem:[%s3176_s12 + $0x8] sm:$0xff]  }
 0xb1c   : > { %v2247_v8 = vpop.f32.mrf.mxu1 }
 0xb1d   : > { %v2390_v8 = vld [vmem:[%s3176_s12] sm:$0xff]  }
 0xb1e   : > { %v1531_v10 = vpop.f32.mrf.mxu1 }
 0xb1f   : > { %v2077_v10 = vld [vmem:[#allocation8] ss:$0 sm:$0xff] }
 0xb20   : > { %v2248_v11 = vpop.f32.mrf.mxu1 }
 0xb22   : > { %v1576_v12 = vpop.f32.mrf.mxu0 }
 0xb23   : > { %1586 = vrot.lane.b32.xlu1 %v1576_v12, %s2609_s20  ;;  %s2523_s20 = sshll.u32 %s2610_s25, 4  ;;  %s2524_s20 = int_to_ptr.vmem [resolvable:$false] %s2523_s20 }
 0xb24   : > { %v2253_v13 = vpop.f32.mrf.mxu0  ;;  %s2525_s24 = scalar_lea.vmem %s2524_s20, 512  ;;  %p2526_p1 = scmp.lt.s32.totalorder %s3119_s26, %s2524_s20 }
 0xb25   : > { %p2527_p12 = scmp.lt.s32.totalorder %s2525_s24, %s2519_s22 }
 0xb26   : > { %v1579_v14 = vpop.f32.mrf.mxu0 }
 0xb27   : > { %p2528_p11 = por %p2527_p12, %p2526_p1 }
 0xb28   : > { %v2254_v15 = vpop.f32.mrf.mxu0 }
 0xb29   : > { %p2529_p8 = pnand %p2528_p11, %p2522_p10 }
 0xb8d   : > { %v1585_v16 = vpop.permute.xlu0 %1584 }
 0xb8e   : > { %1591 = vst.msk [vmem:[#allocation2] sm:$0xff] %vm1590_vm8, %v1585_v16 }
 0xb95   : > { %v1587_v17 = vpop.permute.xlu1 %1586  ;;  %v1593_v18 = vld [vmem:[#allocation2] sm:$0xff] }
 0xb96   : > { %1592 = vst.msk [vmem:[#allocation2 + $0x8] sm:$0xff] %vm1590_vm8, %v1587_v17 }
 0xb9d   : > { %v1594_v19 = vld [vmem:[#allocation2 + $0x8] sm:$0xff] }
 0xb9e   : > { %v1595_v20 = vpack.c.bf16 %v1594_v19, %v1593_v18 }
 0xba0   : > { %2260 = vmatmul.mubr.msk.bf16.vlgmr.msra.gmra.mxu1 %vm546_vm0, %v1595_v20 }
 0xba1   : > { %2287 = vmatprep.mubr.msk.bf16.mxu1 %vm2595_vm1, %v2594_v9  ;;  %2272 = vmatpush3.bf16.msra.mxu1 %v2383_v63 }
 0xba2   : > { %2273 = vmatprep.subr.bf16.mxu1 %v2594_v9 }
 0xba5   : > { %2274 = vmatpush3.bf16.msra.mxu1 %v2384_v42 }
 0xba6   : > { %2275 = vmatprep.subr.bf16.mxu1 %v2594_v9 }
 0xba9   : > { %2276 = vmatpush3.bf16.msra.mxu1 %v2385_v3 }
 0xbaa   : > { %2277 = vmatprep.subr.bf16.mxu1 %v2594_v9 }
 0xbad   : > { %2278 = vmatpush3.bf16.msra.mxu1 %v2386_v4 }
 0xbae   : > { %2279 = vmatprep.subr.bf16.mxu1 %v2594_v9 }
 0xbb1   : > { %2280 = vmatpush3.bf16.msra.mxu1 %v2387_v5 }
 0xbb2   : > { %2281 = vmatprep.subr.bf16.mxu1 %v2594_v9 }
 0xbb5   : > { %2282 = vmatpush3.bf16.msra.mxu1 %v2388_v6 }
 0xbb6   : > { %2283 = vmatprep.subr.bf16.mxu1 %v2594_v9 }
 0xbb9   : > { %2284 = vmatpush3.bf16.msra.mxu1 %v2389_v7 }
 0xbba   : > { %2285 = vmatprep.subr.bf16.mxu1 %v2594_v9 }
 0xbbd   : > { %2286 = vmatpush3.bf16.msra.mxu1 %v2390_v8 }
 0xc60   : > { %v1656_v22 = vpop.f32.mrf.mxu1 }
 0xc61   : > { %v1657_v23 = vadd.f32 %v2071_v21, %v1656_v22 }
 0xc62   : > { %v2261_v24 = vpop.f32.mrf.mxu1 }
 0xc63   : > { %v3047_v25 = vadd.f32 %v1657_v23, %v2836_v0 }
 0xc64   : > { %v1659_v26 = vpop.f32.mrf.mxu1 }
 0xc65   : > { %v1660_v27 = vadd.f32 %v2071_v21, %v1659_v26  ;;  %v1667_v28 = vsel %vm546_vm0, %v3047_v25, 0.0  ;;  %v1675_v29 = vmul.f32 %v3047_v25, %v3047_v25 }
 0xc66   : > { %1668 = vadd.xlane.f32.xlu0 %v1667_v28  ;;  %v2262_v31 = vpop.f32.mrf.mxu1 }
 0xc67   : > { %v3054_v32 = vadd.f32 %v1660_v27, %v2838_v1  ;;  %v1677_v33 = vsel %vm546_vm0, %v1675_v29, 0.0  ;;  %v2382_v1 = vld [vmem:[%s3174_s10] sm:$0xff]  }
 0xc68   : > { %2266 = vmatpush3.bf16.msra.mxu0 %v2382_v1  ;;  %v2083_v31 = vld [vmem:[%s3177_s13] ss:$0 sm:$0xff] }
 0xc69   : > { %v1670_v35 = vsel %vm546_vm0, %v3054_v32, 0.0  ;;  %v1676_v0 = vmul.f32 %v3054_v32, %v3054_v32 }
 0xc6a   : > { %1678 = vadd.xlane.f32.xlu0 %v1677_v33  ;;  %1671 = vadd.xlane.f32.xlu1 %v1670_v35 }
 0xc6b   : > { %v1680_v36 = vsel %vm546_vm0, %v1676_v0, 0.0 }
 0xc6e   : > { %1681 = vadd.xlane.f32.xlu0 %v1680_v36 }
 0xcef   : > { %v1669_v38 = vpop.xlane.xlu0 %1668 }
 0xcf0   : > { %v1673_v39 = vmul.f32 0.03125, %v1669_v38 }
 0xcf2   : > { %v1685_v43 = vmul.f32 %v1673_v39, %v1673_v39  ;;  %v1689_v34 = vsub.f32 %v3047_v25, %v1673_v39 }
 0xcf3   : > { %v1679_v40 = vpop.xlane.xlu0 %1678  ;;  %v1672_v41 = vpop.xlane.xlu1 %1671 }
 0xcf4   : > { %v1683_v57 = vmul.f32 0.03125, %v1679_v40  ;;  %v1674_v2 = vmul.f32 0.03125, %v1672_v41 }
 0xcf6   : > { %v1687_v44 = vsub.f32 %v1683_v57, %v1685_v43  ;;  %v1686_v48 = vmul.f32 %v1674_v2, %v1674_v2  ;;  %v1690_v53 = vsub.f32 %v3054_v32, %v1674_v2 }
 0xcf7   : > { %v1682_v45 = vpop.xlane.xlu0 %1681 }
 0xcf8   : > { %v1691_v47 = vadd.f32 1e-05, %v1687_v44  ;;  %v1684_v49 = vmul.f32 0.03125, %v1682_v45 }
 0xcfa   : > { %2427 = vrsqrt.f32 %v1691_v47  ;;  %v1688_v46 = vsub.f32 %v1684_v49, %v1686_v48 }
 0xcfc   : > { %v1692_v30 = vadd.f32 1e-05, %v1688_v46 }
 0xcfe   : > { %2429 = vrsqrt.f32 %v1692_v30 }
 0xd07   : > { %v2428_v50 = vpop.eup %2427 }
 0xd08   : > { %v1695_v51 = vmul.f32 %v2428_v50, %v1689_v34 }
 0xd0a   : > { %v1703_v56 = vmul.f32 %v2075_v52, %v1695_v51 }
 0xd0b   : > { %v2430_v54 = vpop.eup %2429 }
 0xd0c   : > { %v1696_v55 = vmul.f32 %v2430_v54, %v1690_v53  ;;  %v1711_v60 = vadd.f32 %v2076_v58, %v1703_v56 }
 0xd0e   : > { %v1704_v59 = vmul.f32 %v2075_v52, %v1696_v55 }
 0xd10   : > { %v1712_v61 = vadd.f32 %v2076_v58, %v1704_v59 }
 0xd12   : > { %v1713_v62 = vpack.c.bf16 %v1712_v61, %v1711_v60 }
 0xd14   : > { %2268 = vmatmul.mubr.msk.bf16.vlgmr.msra.gmra.mxu0 %vm546_vm0, %v1713_v62 }
 0xdd4   : > { %v1774_v11 = vpop.f32.mrf.mxu0 }
 0xdd5   : > { %v1775_v12 = vadd.f32 %v2077_v10, %v1774_v11 }
 0xdd6   : > { %v2269_v13 = vpop.f32.mrf.mxu0 }
 0xdd7   : > { %v2081_v14 = vmul.f32 -1.702, %v1775_v12 }
 0xdd8   : > { %v1777_v15 = vpop.f32.mrf.mxu0 }
 0xdd9   : > { %v1785_v16 = vmul.f32 1.442695, %v2081_v14  ;;  %v1778_v17 = vadd.f32 %v2077_v10, %v1777_v15 }
 0xdda   : > { %v2270_v18 = vpop.f32.mrf.mxu0 }
 0xddb   : > { %2431 = vpow2.f32 %v1785_v16  ;;  %v2082_v19 = vmul.f32 -1.702, %v1778_v17 }
 0xddd   : > { %v1787_v20 = vmul.f32 1.442695, %v2082_v19 }
 0xddf   : > { %2433 = vpow2.f32 %v1787_v20 }
 0xde8   : > { %v2432_v9 = vpop.eup %2431 }
 0xde9   : > { %v1789_v21 = vadd.f32 1.0, %v2432_v9 }
 0xdeb   : > { %2435 = vrcp.f32 %v1789_v21 }
 0xdec   : > { %v2434_v22 = vpop.eup %2433 }
 0xded   : > { %v1790_v23 = vadd.f32 1.0, %v2434_v22 }
 0xdef   : > { %2437 = vrcp.f32 %v1790_v23 }
 0xdf8   : > { %v2436_v24 = vpop.eup %2435 }
 0xdf9   : > { %v1795_v27 = vmul.f32 %v2436_v24, %v1775_v12 }
 0xdfc   : > { %v2438_v26 = vpop.eup %2437 }
 0xdfd   : > { %v1796_v28 = vmul.f32 %v2438_v26, %v1778_v17 }
 0xdff   : > { %v1797_v29 = vpack.c.bf16 %v1796_v28, %v1795_v27 }
 0xe01   : > { %2288 = vmatmul.mubr.bf16.vlgmr.msra.gmra.mxu1 %v1797_v29 }
 0xec1   : > { %v1903_v33 = vpop.f32.mrf.mxu1 }
 0xec2   : > { %v1904_v35 = vadd.f32 %v2083_v31, %v1903_v33 }
 0xec3   : > { %v2289_v0 = vpop.f32.mrf.mxu1 }
 0xec4   : > { %v1910_v36 = vadd.f32 %v1904_v35, %v3047_v25 }
 0xec5   : > { %v1906_v37 = vpop.f32.mrf.mxu1 }
 0xec6   : > { %1912 = vst.msk [vmem:[%s526_s19] sm:$0xff] %vm546_vm0, %v1910_v36  ;;  %v1907_v1 = vadd.f32 %v2083_v31, %v1906_v37 }
 0xec7   : > { %v2290_v38 = vpop.f32.mrf.mxu1 }
 0xec8   : > { %v1911_v39 = vadd.f32 %v1907_v1, %v3054_v32 }
 0xeca   : > { %1913 = vst.msk [vmem:[%s526_s19 + $0x8] sm:$0xff] %vm546_vm0, %v1911_v39 }
 0xecb   : > { %2532 = shalt.err (!%p2529_p8)
}
 0xecc   : > { %s2533_s14 = scalar_lea.hbm %s3116_s21, 256  ;;  %s2537_s28 = scalar_lea.hbm %s3214_s27, 512 }
 0xecd   : > { %p2534_p2 = scmp.ne.s32.totalorder %s3116_s21, %s2533_s14  ;;  %p2538_p13 = scmp.lt.s32.totalorder %s3116_s21, %s3214_s27 }
 0xece   : > { %p2539_p3 = scmp.lt.s32.totalorder %s2537_s28, %s2533_s14 }
 0xecf   : > { %p2535_p7 = pnand %p2534_p2, %p3215_p5 }
 0xed0   : > { %p2540_p0 = por %p2539_p3, %p2538_p13 }
 0xed1   : > { %p2536_p6 = pneg %p2535_p7 }
 0xed3   : > { %p2541_p4 = pnand %p2540_p0, %p2536_p6 }
 0xed5   : > { %2544 = shalt.err (!%p2541_p4)
}
 0xed6   : > { %s2611_s22 = smov 128  }
 0xed7   : > { %2301 = dma.vmem_to_hbm [thread:$0]  (%p3215_p5), %s3119_s26, 256, %s3116_s21, %s1915_s17, %s2611_s22, %s2611_s22, %s2607_s23  }
 0xed8 PF: > { %s3216_s20 = sld [smem:[#allocation13_spill]]  ;;  %p3219_p10 = scmp.ge.s32.totalorder %s2587_s16, 2 }
 0xed9   : > { %s3217_s24 = sld [smem:[#allocation18_spill]] }
 0xede   : > { %s1943_s19 = sand.u32 1, %s3216_s20  }
 0xedf   : > { %p3218_p9 = scmp.ne.s32.totalorder %s3217_s24, 0  ;;  %s1944_s14 = scalar_lea.sflag [#allocation5], %s1943_s19 }
 0xee1   : > { %p2315_p1 = pnand %p3219_p10, %p3218_p9 }
 0xee3   : > { %p2316_p12 = pneg %p2315_p1 }
 0xee5   : > { %2570 = dma.done.wait (%p2316_p12), %s1944_s14, 256  }
 0xee6   : > { %2572 = vsyncadd (%p2316_p12), %s1944_s14, 4294967040  ;;  %s3220_s16 = sld [smem:[#allocation15_spill]]  ;;  %s3223_s29 = smov %s2579_s30 }
 0xee7   : > { %s3221_s18 = sld [smem:[#allocation14_spill]] }
 0xee8   : > { %s3222_s15 = sld [smem:[#allocation16_spill]] }
 0xeec   : > { %p28_p11 = scmp.ge.s32.totalorder %s3220_s16, 4  }
 0xeed   : > { %s3224_s30 = smov %s3221_s18 }
 0xeee   :  { %30 = sbr.rel (!%p28_p11) target bundleno = 9 (0x9), region = 132 }
 0xef3   :  { %1949 = vsyncpa [#allocation4], 1 }
 0xef4   :  { %1951 = vsyncpa [#allocation4 + $0x1], 1 }
 0xef5   :  { %1952 = vsyncpa [#allocation7], 1 }
 0xef6   :  { %1953 = vsyncpa [#allocation5], 1 }
 0xef7   :  { %1955 = vsyncpa [#allocation5 + $0x1], 1 }

// kernel: tpu_custom_call.1
= control target key start
LH: loop header
LB: loop body
LE: loop exit
PB: predicated region body
PF: predicated region fallthrough
CT: control target
= control target key end

     0   :  { %s3164_s0 = inlined_call_operand.vmem [shape: f32[32,32], index: 0, kind: input, shape index: {}]   ;;  %s3165_s1 = inlined_call_operand.hbm [shape: f32[4,1,8], index: 1, kind: input, shape index: {}]   ;;  %s3166_s2 = inlined_call_operand.vmem [shape: f32[1,32], index: 2, kind: input, shape index: {}]   ;;  %s3167_s3 = inlined_call_operand.vmem [shape: f32[1,32], index: 3, kind: input, shape index: {}]   ;;  %s3168_s4 = inlined_call_operand.vmem [shape: bf16[32,96], index: 4, kind: input, shape index: {}]   ;;  %s3169_s5 = inlined_call_operand.vmem [shape: f32[1,96], index: 5, kind: input, shape index: {}]   ;;  %s3170_s6 = inlined_call_operand.vmem [shape: bf16[32,32], index: 6, kind: input, shape index: {}]   ;;  %s3171_s7 = inlined_call_operand.vmem [shape: f32[1,32], index: 7, kind: input, shape index: {}]   ;;  %s3172_s8 = inlined_call_operand.vmem [shape: f32[1,32], index: 8, kind: input, shape index: {}]   ;;  %s3173_s9 = inlined_call_operand.hbm [shape: f32[1,32], index: 9, kind: input, shape index: {}]   ;;  %s3174_s10 = inlined_call_operand.vmem [shape: bf16[32,128], index: 10, kind: input, shape index: {}]   ;;  %s3175_s11 = inlined_call_operand.hbm [shape: f32[1,128], index: 11, kind: input, shape index: {}]   ;;  %s3176_s12 = inlined_call_operand.vmem [shape: bf16[128,32], index: 12, kind: input, shape index: {}]   ;;  %s3177_s13 = inlined_call_operand.vmem [shape: f32[1,32], index: 13, kind: input, shape index: {}]   ;;  %s3178_s14 = inlined_call_operand.hbm [shape: f32[32,32], index: 14, kind: output, shape index: {}]  }
   0x1   :  { %3191 = sst [smem:[#allocation19_spill]] %s3173_s9 }
   0x2   :  { %3192 = sst [smem:[#allocation20_spill]] %s3178_s14 }
   0x3   :  { %19 = vsyncpa [#allocation4], 0 }
   0x4   :  { %21 = vsyncpa [#allocation4 + $0x1], 0 }
   0x5   :  { %22 = vsyncpa [#allocation7], 0 }
   0x6   :  { %23 = vsyncpa [#allocation5], 0 }
   0x7   :  { %25 = vsyncpa [#allocation5 + $0x1], 0  ;;  %s2687_s29 = smov 0   ;;  %s2689_s30 = smov 0  }
   0x8   :  { %s2691_s15 = smov 0   ;;  %s2693_s16 = smov 0  }
   0x9 LB: > { %3193 = sst [smem:[#allocation13_spill]] %s2575_s29  ;;  %s2708_s17 = sadd.s32 4294967295, %s2587_s16   ;;  %s2587_s16 = sphi %s2693_s16, %s3220_s16   ;;  %s2583_s15 = sphi %s2691_s15, %s3222_s15   ;;  %s2579_s30 = sphi %s2689_s30, %s3224_s30   ;;  %s2575_s29 = sphi %s2687_s29, %s3223_s29  }
   0xa   : > { %3194 = sst [smem:[#allocation14_spill]] %s2583_s15  ;;  %s2032_s18 = sadd.s32 4294967294, %s2587_s16  }
   0xb   : > { %s2712_s19 = sadd.s32 1, %s2587_s16   ;;  %s64_s20 = sadd.s32 1, %s2583_s15 }
   0xc   : > { %3195 = sst [smem:[#allocation15_spill]] %s2712_s19  ;;  %s61_s21 = ssub.s32 %s2587_s16, %s2712_s19 }
   0xd   : > { %p71_p0 = scmp.ne.s32.totalorder %s2583_s15, %s2579_s30  ;;  %p62_p1 = scmp.eq.s32.totalorder %s61_s21, 0 }
   0xe   : > { %p72_p2 = scmp.eq.s32.totalorder %s2587_s16, 0  ;;  %p77_p3 = scmp.ne.s32.totalorder %s2579_s30, %s2575_s29 }
   0xf   : > { %p3179_p4 = scmp.eq.s32.totalorder %s2708_s17, 0  ;;  %p353_p7 = scmp.eq.s32.totalorder %s2708_s17, 1 }
  0x10   : > { %s2724_s22 = scalar_select %p62_p1, %s2583_s15, %s64_s20  }
  0x11   : > { %p2726_p5 = por %p72_p2, %p71_p0  ;;  %p2732_p6 = por %p3179_p4, %p77_p3 }
  0x12   : > { %3196 = sst [smem:[#allocation16_spill]] %s2724_s22  ;;  %p359_p8 = scmp.eq.s32.totalorder %s2032_s18, 1 }
  0x13   : > { %s3198_s24 = scalar_select %p2732_p6, 1, 0 }
  0x14   : > { %p2033_p9 = scmp.ge.s32.totalorder %s2587_s16, 1  ;;  %p366_p10 = scmp.lt.s32.totalorder %s2587_s16, 3 }
  0x15   : > { %p2739_p11 = por %p353_p7, %p71_p0  ;;  %p2743_p12 = por %p359_p8, %p77_p3 }
  0x16   : > { %p2747_p13 = pnand %p2033_p9, %p366_p10  ;;  %s2589_s28 = smov [#allocation6]  }
  0x17   : > { %s3199_s25 = scalar_select %p2739_p11, 1, 0 }
  0x18   : > { %s3201_s26 = scalar_select %p2743_p12, 1, 0 }
  0x19   : > { %3200 = sst [smem:[#allocation17_spill]] %s3199_s25  ;;  %p2303_p2 = pneg %p2747_p13 }
  0x1a   : > { %3202 = sst [smem:[#allocation18_spill]] %s3201_s26  ;;  %s400_s18 = sshll.u32 %s2589_s28, 4  ;;  %s401_s18 = int_to_ptr.vmem [resolvable:$true] %s400_s18 }
  0x1b   : > { %s3203_s27 = scalar_select %p2747_p13, 1, 0 }
  0x1c   : > { %p2320_p4 = scmp.lt.s32.totalorder %s2587_s16, 2  ;;  %p3204_p0 = scmp.eq.s32.totalorder %s2708_s17, 0 }
  0x1d   : > { %s2590_s22 = smov [#allocation8]   ;;  %s2450_s28 = scalar_lea.vmem %s401_s18, 16 }
  0x1e   : > { %p2757_p7 = pnand %p2303_p2, %p3204_p0  ;;  %p2763_p3 = pnand %p2320_p4, %p2726_p5 }
  0x1f   : > { %s414_s19 = sshll.u32 %s2590_s22, 4  ;;  %p2451_p9 = scmp.ne.s32.totalorder %s401_s18, %s2450_s28  ;;  %s415_s19 = int_to_ptr.vmem [resolvable:$true] %s414_s19 }
  0x20   : > { %p2441_p8 = pneg %p2757_p7  ;;  %s2457_s26 = scalar_lea.vmem %s401_s18, 32 }
  0x21   : > { %p2458_p0 = scmp.lt.s32.totalorder %s401_s18, %s401_s18  ;;  %p2459_p1 = scmp.lt.s32.totalorder %s2457_s26, %s2450_s28 }
  0x22   : > { %p2453_p10 = pnand %p2451_p9, %p2441_p8 }
  0x23   : > { %p2460_p12 = por %p2459_p1, %p2458_p0 }
  0x24   : > { %p2454_p2 = pneg %p2453_p10 }
  0x26   : > { %p2461_p11 = pnand %p2460_p12, %p2454_p2 }
  0x28   : > { %2464 = shalt.err (!%p2461_p11)
}
  0x29   : > { %s3207_s9 = sld [smem:[#allocation19_spill]]  ;;  %s440_s22 = sand.u32 1, %s2583_s15  }
  0x2a   : > { %s2476_s14 = scalar_lea.vmem %s415_s19, 16  ;;  %s2483_s25 = scalar_lea.vmem %s415_s19, 32 }
  0x2b   : > { %p2477_p4 = scmp.ne.s32.totalorder %s415_s19, %s2476_s14  ;;  %p2484_p10 = scmp.lt.s32.totalorder %s415_s19, %s415_s19 }
  0x2c   : > { %p2485_p1 = scmp.lt.s32.totalorder %s2483_s25, %s2476_s14 }
  0x2d   : > { %p2479_p5 = pnand %p2477_p4, %p2441_p8 }
  0x2e   : > { %p2486_p12 = por %p2485_p1, %p2484_p10 }
  0x2f   : > { %2306 = dma.hbm_to_vmem [thread:$0]  (!%p2757_p7), %s3207_s9, 16, %s401_s18, [#allocation7]  }
  0x30   : > { %p2480_p9 = pneg %p2479_p5 }
  0x32   : > { %p2487_p11 = pnand %p2486_p12, %p2480_p9 }
  0x34   : > { %2490 = shalt.err (!%p2487_p11)
}
  0x35   : > { %2309 = dma.hbm_to_vmem [thread:$0]  (!%p2757_p7), %s3175_s11, 16, %s415_s19, [#allocation7]  }
  0x36   : > { %s2037_s18 = sshll.u32 %s440_s22, 1  ;;  %s2097_s28 = sshll.u32 %s2587_s16, 5 }
  0x37   : > { %s2790_s15 = scalar_lea.hbm %s3165_s1, %s2097_s28  ;;  %s444_s14 = scalar_lea.vmem [#allocation3], %s2037_s18 }
  0x38   : > { %s451_s25 = sshll.u32 %s444_s14, 4  ;;  %s2794_s20 = scalar_lea.sflag [#allocation4], %s440_s22  ;;  %s2792_s25 = int_to_ptr.vmem [resolvable:$true] %s451_s25 }
  0x39   : > { %s2491_s26 = scalar_lea.hbm %s2790_s15, 32  ;;  %p2493_p7 = pneg %p2763_p3 }
  0x3a   : > { %p2492_p8 = scmp.ne.s32.totalorder %s2790_s15, %s2491_s26  ;;  %s2496_s9 = scalar_lea.hbm %s3165_s1, 64 }
  0x3b   : > { %p2497_p4 = scmp.lt.s32.totalorder %s2790_s15, %s3165_s1  ;;  %p2498_p5 = scmp.lt.s32.totalorder %s2496_s9, %s2491_s26 }
  0x3c   : > { %p2494_p2 = pnand %p2493_p7, %p2492_p8 }
  0x3d   : > { %p2499_p9 = por %p2498_p5, %p2497_p4 }
  0x3e   : > { %p2495_p0 = pneg %p2494_p2 }
  0x40   : > { %p2500_p10 = pnand %p2499_p9, %p2495_p0 }
  0x42   : > { %2503 = shalt.err (!%p2500_p10)
}
  0x43   : > { %s2504_s22 = scalar_lea.vmem %s2792_s25, 32  ;;  %s2591_s18 = smov [#allocation3]  }
  0x44   : > { %p2505_p1 = scmp.ne.s32.totalorder %s2792_s25, %s2504_s22  ;;  %s2509_s14 = sshll.u32 %s2591_s18, 4  ;;  %s2510_s14 = int_to_ptr.vmem [resolvable:$false] %s2509_s14 }
  0x45   : > { %s2511_s19 = scalar_lea.vmem %s2510_s14, 64  ;;  %p2512_p8 = scmp.lt.s32.totalorder %s2792_s25, %s2510_s14 }
  0x46   : > { %p2507_p12 = pnand %p2505_p1, %p2493_p7  ;;  %p2513_p2 = scmp.lt.s32.totalorder %s2511_s19, %s2504_s22 }
  0x48   : > { %p2508_p11 = pneg %p2507_p12  ;;  %p2514_p6 = por %p2513_p2, %p2512_p8 }
  0x4a   : > { %p2515_p13 = pnand %p2514_p6, %p2508_p11 }
  0x4c   : > { %2518 = shalt.err (!%p2515_p13)
}
  0x4d   : > { %s2592_s26 = smov 16   ;;  %s2593_s29 = smov 1  }
  0x4e   : > { %2313 = dma.hbm_to_vmem [thread:$0]  (!%p2763_p3), %s2790_s15, 32, %s2792_s25, %s2794_s20, %s2592_s26, %s2592_s26, %s2593_s29  }
  0x4f   : > { %p3208_p7 = scmp.ne.s32.totalorder %s3203_s27, 0 }
  0x50   : > { %s2818_s9 = sand.u32 (!%p3208_p7), 1, %s2579_s30   ;;  %p3209_p6 = scmp.ne.s32.totalorder (!%p3208_p7), %s3198_s24, 0 }
  0x51   : > { %463 = sbr.rel (%p3208_p7) target bundleno = 3800 (0xed8), region = 76  ;;  %s2041_s28 = sshll.u32 (!%p3208_p7), %s2818_s9, 1 }
  0x52   : > { %s466_s23 = scalar_lea.sflag (!%p3208_p7), [#allocation4], %s2818_s9  ;;  %s2822_s22 = scalar_lea.vmem (!%p3208_p7), [#allocation3], %s2041_s28 }
  0x56   : > { %2562 = dma.done.wait (%p3209_p6), %s466_s23, 32  }
  0x57   : > { %2564 = vsyncadd (%p3209_p6), %s466_s23, 4294967264  ;;  %p3210_p13 = scmp.eq.s32.totalorder %s2708_s17, 0 }
  0x59   : > { %2566 = dma.done.wait (%p3210_p13), [#allocation7], 32   ;;  %p3211_p3 = pmov %p3210_p13 }
  0x5a   : > { %s2045_s15 = sshll.u32 %s2708_s17, 1  ;;  %vm546_vm0 = vcmask 261120   ;;  %v2377_v8 = vld [vmem:[%s3168_s4 + $0x8] sm:$0xff]   ;;  %v2594_v9 = vmov 0.0   ;;  %vm2595_vm1 = vmmov 0   ;;  %v2378_v10 = vld [vmem:[%s3168_s4] sm:$0xff]   ;;  %v670_v51 = vlaneseq }
  0x5b   : > { %2568 = vsyncadd (%p3211_p3), [#allocation7], 4294967264  ;;  %p528_p0 = scmp.lt.s32.totalorder %s2045_s15, 3  ;;  %2151 = vmatprep.subr.bf16.mxu0 %v2594_v9  ;;  %2155 = vmatprep.mubr.msk.bf16.mxu0 %vm2595_vm1, %v2594_v9  ;;  %v2047_v28 = vld [vmem:[%s3166_s2] ss:$0 sm:$0xff]  ;;  %s2596_s21 = smov 96  }
  0x5c   : > { %2152 = vmatpush3.bf16.msra.mxu0 %v2377_v8  ;;  %2171 = vmatprep.subr.bf16.mxu1 %v2594_v9  ;;  %v2048_v33 = vld [vmem:[%s3167_s3] ss:$0 sm:$0xff]  ;;  %vm682_vm2 = vcmask 64512   ;;  %v538_v52 = vld [vmem:[%s2822_s22] sm:$0x1]  ;;  %v671_v53 = vshrl.u32 %v670_v51, 7 }
  0x5d   : > { %s3226_s15 = smov (!%p528_p0, %s2045_s15), 3  ;;  %2153 = vmatprep.subr.bf16.mxu0 %v2594_v9  ;;  %2173 = vmatprep.mubr.msk.bf16.mxu1 %vm2595_vm1, %v2594_v9  ;;  %v2049_v38 = vld [vmem:[%s3169_s5] ss:$0 sm:$0xff]  ;;  %vm540_vm3 = vcmp.gt.f32.partialorder %v538_v52, 0.5  ;;  %v539_v56 = vld [vmem:[%s2822_s22 + $0x1] sm:$0x1] }
  0x5e   : > { %s2046_s27 = sshll.u32 %s3226_s15, 3  ;;  %v672_v54 = vsub.s32 0, %v671_v53  ;;  %v542_v55 = vsel %vm540_vm3, -1e+30, %v2594_v9  ;;  %vm541_vm4 = vcmp.gt.f32.partialorder %v539_v56, 0.5  ;;  %s2597_s22 = smov 64  }
  0x5f   : > { %s531_s20 = scalar_lea.vmem %s3164_s0, %s2046_s27  ;;  %v543_v61 = vsel %vm541_vm4, -1e+30, %v2594_v9  ;;  %s2598_s25 = smov 88   ;;  %vm806_vm5 = vcmask 1043456   ;;  %vm1128_vm6 = vcmask 130112   ;;  %vm1359_vm7 = vcmask 195712  }
  0x60   : > { %v2836_v0 = vld [vmem:[%s531_s20] sm:$0xff]  ;;  %v2838_v1 = vld [vmem:[%s531_s20 + $0x8] sm:$0xff]  ;;  %2154 = vmatpush3.bf16.msra.mxu0 %v2378_v10  ;;  %v2899_v57 = vrot.slane %v542_v55, %v672_v54  ;;  %s2599_s20 = smov 120   ;;  %s2600_s24 = smov 56   ;;  %vm1590_vm8 = vcmask 261312  }
  0x61   : > { %v547_v2 = vsel %vm546_vm0, %v2836_v0, 0.0  ;;  %v556_v3 = vmul.f32 %v2836_v0, %v2836_v0  ;;  %v550_v4 = vsel %vm546_vm0, %v2838_v1, 0.0  ;;  %v557_v5 = vmul.f32 %v2838_v1, %v2838_v1  ;;  %2159 = vmatprep.subr.bf16.mxu0 %v2594_v9  ;;  %s2601_s18 = smov 80   ;;  %s2602_s14 = smov 112  }
  0x62   : > { %548 = vadd.xlane.f32.xlu0 %v547_v2  ;;  %v2904_v2 = vrot.slane %v543_v61, %v672_v54  ;;  %s2603_s19 = smov 48   ;;  %s2604_s26 = smov 72  }
  0x63   : > { %v558_v6 = vsel %vm546_vm0, %v556_v3, 0.0  ;;  %v561_v7 = vsel %vm546_vm0, %v557_v5, 0.0  ;;  %s2605_s29 = smov 104   ;;  %s2606_s28 = smov 40  }
  0x64   : > { %559 = vadd.xlane.f32.xlu1 %v558_v6  ;;  %s2607_s23 = smov 8   ;;  %s2608_s15 = smov 16  }
  0x66   : > { %551 = vadd.xlane.f32.xlu0 %v550_v4 }
  0x68   : > { %562 = vadd.xlane.f32.xlu1 %v561_v7 }
  0xeb   : > { %v549_v11 = vpop.xlane.xlu0 %548 }
  0xec   : > { %v554_v12 = vmul.f32 0.03125, %v549_v11 }
  0xed   : > { %v560_v13 = vpop.xlane.xlu1 %559 }
  0xee   : > { %v566_v14 = vmul.f32 %v554_v12, %v554_v12  ;;  %v564_v15 = vmul.f32 0.03125, %v560_v13  ;;  %v570_v25 = vsub.f32 %v2836_v0, %v554_v12 }
  0xef   : > { %v552_v16 = vpop.xlane.xlu0 %551 }
  0xf0   : > { %v568_v17 = vsub.f32 %v564_v15, %v566_v14  ;;  %v555_v18 = vmul.f32 0.03125, %v552_v16 }
  0xf1   : > { %v563_v19 = vpop.xlane.xlu1 %562 }
  0xf2   : > { %v572_v20 = vadd.f32 1e-05, %v568_v17  ;;  %v567_v21 = vmul.f32 %v555_v18, %v555_v18  ;;  %v565_v22 = vmul.f32 0.03125, %v563_v19  ;;  %v571_v29 = vsub.f32 %v2838_v1, %v555_v18 }
  0xf4   : > { %2391 = vrsqrt.f32 %v572_v20  ;;  %v569_v23 = vsub.f32 %v565_v22, %v567_v21 }
  0xf6   : > { %v573_v24 = vadd.f32 1e-05, %v569_v23 }
  0xf8   : > { %2393 = vrsqrt.f32 %v573_v24 }
 0x101   : > { %v2392_v26 = vpop.eup %2391 }
 0x102   : > { %v576_v27 = vmul.f32 %v2392_v26, %v570_v25 }
 0x104   : > { %v584_v32 = vmul.f32 %v2047_v28, %v576_v27 }
 0x105   : > { %v2394_v30 = vpop.eup %2393 }
 0x106   : > { %v577_v31 = vmul.f32 %v2394_v30, %v571_v29  ;;  %v592_v35 = vadd.f32 %v2048_v33, %v584_v32 }
 0x108   : > { %v585_v34 = vmul.f32 %v2047_v28, %v577_v31 }
 0x10a   : > { %v593_v36 = vadd.f32 %v2048_v33, %v585_v34 }
 0x10c   : > { %v594_v37 = vpack.c.bf16 %v593_v36, %v592_v35 }
 0x10e   : > { %2156 = vmatmul.mubr.msk.bf16.vlgmr.msra.gmra.mxu0 %vm546_vm0, %v594_v37 }
 0x10f   : > { %2161 = vmatprep.mubr.msk.bf16.mxu0 %vm2595_vm1, %v2594_v9 }
 0x1ce   : > { %v655_v39 = vpop.f32.mrf.mxu0 }
 0x1cf   : > { %v656_v40 = vadd.f32 %v2049_v38, %v655_v39 }
 0x1d0   : > { %v2157_v41 = vpop.f32.mrf.mxu0 }
 0x1d1   : > { %v2878_v42 = vpack.c.bf16 %v656_v40, %v656_v40 }
 0x1d2   : > { %v658_v43 = vpop.f32.mrf.mxu0 }
 0x1d3   : > { %v659_v44 = vadd.f32 %v2049_v38, %v658_v43  ;;  %680 = vrot.lane.b32.xlu0 %v2878_v42, %s2596_s21 }
 0x1d4   : > { %v2158_v45 = vpop.f32.mrf.mxu0 }
 0x1d5   : > { %v2881_v46 = vpack.c.bf16 %v659_v44, %v659_v44 }
 0x1d7   : > { %729 = vrot.lane.b32.xlu1 %v2881_v46, %s2596_s21 }
 0x245   : > { %v681_v47 = vpop.permute.xlu0 %680 }
 0x246   : > { %v687_v48 = vsel %vm682_vm2, %v681_v47, 0 }
 0x247   : > { %2160 = vmatpush3.bf16.xpose.msra.mxu0 %v687_v48 }
 0x248   : > { %2165 = vmatprep.subr.bf16.mxu0 %v2594_v9 }
 0x249   : > { %v730_v49 = vpop.permute.xlu1 %729 }
 0x24a   : > { %v735_v50 = vsel %vm682_vm2, %v730_v49, 0 }
 0x24e   : > { %2162 = vmatmul.mubr.msk.bf16.vlgmr.msra.gmra.mxu0 %vm682_vm2, %v2878_v42 }
 0x24f   : > { %2166 = vmatpush3.bf16.xpose.msra.mxu0 %v735_v50  ;;  %2167 = vmatprep.mubr.msk.bf16.mxu0 %vm2595_vm1, %v2594_v9 }
 0x250   : > { %2177 = vmatprep.subr.bf16.mxu0 %v2594_v9 }
 0x256   : > { %2168 = vmatmul.mubr.msk.bf16.vlgmr.msra.gmra.mxu0 %vm682_vm2, %v2881_v46 }
 0x257   : > { %2179 = vmatprep.mubr.msk.bf16.mxu0 %vm2595_vm1, %v2594_v9 }
 0x30e   : > { %v723_v58 = vpop.f32.mrf.mxu0 }
 0x30f   : > { %v724_v59 = vadd.f32 %v723_v58, %v2899_v57 }
 0x310   : > { %v2163_v60 = vpop.f32.mrf.mxu0 }
 0x311   : > { %v777_v62 = vsel %vm682_vm2, %v724_v59, -inf }
 0x312   : > { %778 = vmax.xlane.f32.xlu1 %v777_v62  ;;  %v726_v63 = vpop.f32.mrf.mxu0 }
 0x314   : > { %v2164_v3 = vpop.f32.mrf.mxu0 }
 0x316   : > { %v771_v4 = vpop.f32.mrf.mxu0 }
 0x317   : > { %v772_v5 = vadd.f32 %v771_v4, %v2904_v2 }
 0x318   : > { %v2169_v6 = vpop.f32.mrf.mxu0 }
 0x319   : > { %v780_v7 = vsel %vm682_vm2, %v772_v5, -inf }
 0x31a   : > { %781 = vmax.xlane.f32.xlu0 %v780_v7  ;;  %v774_v8 = vpop.f32.mrf.mxu0 }
 0x31c   : > { %v2170_v10 = vpop.f32.mrf.mxu0 }
 0x323   : > { %850 = vrot.lane.b32.xlu1 %v2881_v46, %s2597_s22 }
 0x327   : > { %902 = vrot.lane.b32.xlu1 %v2878_v42, %s2598_s25 }
 0x39b   : > { %v779_v11 = vpop.xlane.xlu1 %778 }
 0x39c   : > { %v783_v12 = vsub.f32 %v724_v59, %v779_v11 }
 0x39e   : > { %v785_v13 = vmul.f32 1.442695, %v783_v12 }
 0x39f   : > { %v851_v14 = vpop.permute.xlu1 %850 }
 0x3a0   : > { %2395 = vpow2.f32 %v785_v13  ;;  %v856_v15 = vsel %vm806_vm5, %v851_v14, 0 }
 0x3a1   : > { %2178 = vmatpush3.bf16.msra.mxu0 %v856_v15 }
 0x3a2   : > { %2189 = vmatprep.subr.bf16.mxu0 %v2594_v9 }
 0x3a3   : > { %v782_v16 = vpop.xlane.xlu0 %781  ;;  %v903_v24 = vpop.permute.xlu1 %902 }
 0x3a4   : > { %v784_v17 = vsub.f32 %v772_v5, %v782_v16  ;;  %v908_v31 = vsel %vm682_vm2, %v903_v24, 0 }
 0x3a6   : > { %v787_v18 = vmul.f32 1.442695, %v784_v17 }
 0x3a8   : > { %2397 = vpow2.f32 %v787_v18 }
 0x3ad   : > { %v2396_v19 = vpop.eup %2395 }
 0x3ae   : > { %v789_v20 = vsel %vm682_vm2, %v2396_v19, 0.0 }
 0x3af   : > { %790 = vadd.xlane.f32.xlu0 %v789_v20 }
 0x3b5   : > { %v2398_v21 = vpop.eup %2397 }
 0x3b6   : > { %v792_v22 = vsel %vm682_vm2, %v2398_v21, 0.0 }
 0x3b7   : > { %793 = vadd.xlane.f32.xlu1 %v792_v22 }
 0x3c5   : > { %801 = vrot.lane.b32.xlu0 %v2878_v42, %s2597_s22 }
 0x3c8   : > { %952 = vrot.lane.b32.xlu1 %v2881_v46, %s2598_s25  ;;  %s2610_s25 = smov [#allocation9]  }
 0x3c9   : > { %900 = vrot.lane.b32.xlu0 %v2878_v42, %s2599_s20 }
 0x3cc   : > { %950 = vrot.lane.b32.xlu1 %v2881_v46, %s2599_s20  ;;  %s2609_s20 = smov 24  }
 0x438   : > { %v791_v23 = vpop.xlane.xlu0 %790 }
 0x439   : > { %2399 = vrcp.f32 %v791_v23 }
 0x43c   : > { %v802_v25 = vpop.permute.xlu0 %801 }
 0x43d   : > { %v808_v26 = vsel %vm806_vm5, %v802_v25, 0 }
 0x43e   : > { %2172 = vmatpush3.bf16.msra.mxu1 %v808_v26 }
 0x43f   : > { %2183 = vmatprep.subr.bf16.mxu1 %v2594_v9 }
 0x440   : > { %v794_v27 = vpop.xlane.xlu1 %793  ;;  %v901_v36 = vpop.permute.xlu0 %900 }
 0x441   : > { %2401 = vrcp.f32 %v794_v27 }
 0x444   : > { %v953_v34 = vpop.permute.xlu1 %952 }
 0x445   : > { %v958_v37 = vsel %vm682_vm2, %v953_v34, 0 }
 0x446   : > { %v2400_v28 = vpop.eup %2399 }
 0x447   : > { %v797_v29 = vmul.f32 %v2400_v28, %v2396_v19 }
 0x448   : > { %v951_v38 = vpop.permute.xlu1 %950 }
 0x449   : > { %v799_v30 = vpack.c.bf16 %v797_v29, %v797_v29 }
 0x44b   : > { %2174 = vmatmul.mubr.msk.bf16.vlgmr.msra.gmra.mxu1 %vm682_vm2, %v799_v30 }
 0x44c   : > { %2184 = vmatpush3.bf16.xpose.msra.mxu1 %v908_v31  ;;  %2185 = vmatprep.mubr.msk.bf16.mxu1 %vm2595_vm1, %v2594_v9 }
 0x44d   : > { %2195 = vmatprep.subr.bf16.mxu1 %v2594_v9 }
 0x44e   : > { %v2402_v32 = vpop.eup %2401 }
 0x44f   : > { %v798_v33 = vmul.f32 %v2402_v32, %v2398_v21 }
 0x451   : > { %v800_v35 = vpack.c.bf16 %v798_v33, %v798_v33 }
 0x453   : > { %2180 = vmatmul.mubr.msk.bf16.vlgmr.msra.gmra.mxu0 %vm682_vm2, %v800_v35  ;;  %2186 = vmatmul.mubr.msk.bf16.vlgmr.msra.gmra.mxu1 %vm682_vm2, %v901_v36 }
 0x454   : > { %2190 = vmatpush3.bf16.xpose.msra.mxu0 %v958_v37  ;;  %2191 = vmatprep.mubr.msk.bf16.mxu0 %vm2595_vm1, %v2594_v9 }
 0x455   : > { %2201 = vmatprep.subr.bf16.mxu0 %v2594_v9  ;;  %2197 = vmatprep.mubr.msk.bf16.mxu1 %vm2595_vm1, %v2594_v9 }
 0x45b   : > { %2192 = vmatmul.mubr.msk.bf16.vlgmr.msra.gmra.mxu0 %vm682_vm2, %v951_v38 }
 0x45c   : > { %2203 = vmatprep.mubr.msk.bf16.mxu0 %vm2595_vm1, %v2594_v9 }
 0x50b   : > { %v844_v39 = vpop.f32.mrf.mxu1 }
 0x50c   : > { %898 = vst.msk [vmem:[#allocation2] sm:$0xff] %vm682_vm2, %v844_v39 }
 0x50d   : > { %v2175_v40 = vpop.f32.mrf.mxu1 }
 0x50f   : > { %v847_v41 = vpop.f32.mrf.mxu1 }
 0x511   : > { %v2176_v43 = vpop.f32.mrf.mxu1 }
 0x513   : > { %v892_v44 = vpop.f32.mrf.mxu0  ;;  %v944_v45 = vpop.f32.mrf.mxu1 }
 0x514   : > { %899 = vst.msk [vmem:[#allocation2 + $0x8] sm:$0xff] %vm682_vm2, %v892_v44  ;;  %v945_v47 = vadd.f32 %v944_v45, %v2899_v57 }
 0x515   : > { %v2181_v48 = vpop.f32.mrf.mxu0  ;;  %v2187_v49 = vpop.f32.mrf.mxu1 }
 0x516   : > { %v1000_v50 = vsel %vm682_vm2, %v945_v47, -inf }
 0x517   : > { %1001 = vmax.xlane.f32.xlu0 %v1000_v50  ;;  %v895_v51 = vpop.f32.mrf.mxu0  ;;  %v947_v52 = vpop.f32.mrf.mxu1 }
 0x519   : > { %v2182_v53 = vpop.f32.mrf.mxu0  ;;  %v2188_v54 = vpop.f32.mrf.mxu1 }
 0x51b   : > { %v994_v55 = vpop.f32.mrf.mxu0 }
 0x51c   : > { %v995_v56 = vadd.f32 %v994_v55, %v2904_v2 }
 0x51d   : > { %v2193_v58 = vpop.f32.mrf.mxu0 }
 0x51e   : > { %v1003_v59 = vsel %vm682_vm2, %v995_v56, -inf }
 0x51f   : > { %1004 = vmax.xlane.f32.xlu1 %v1003_v59  ;;  %v997_v60 = vpop.f32.mrf.mxu0 }
 0x521   : > { %v2194_v61 = vpop.f32.mrf.mxu0 }
 0x530   : > { %1072 = vrot.lane.b32.xlu1 %v2881_v46, %s2600_s24 }
 0x534   : > { %1133 = vrot.lane.b32.xlu1 %v2878_v42, %s2601_s18 }
 0x538   : > { %1183 = vrot.lane.b32.xlu1 %v2881_v46, %s2601_s18  ;;  %s3212_s18 = sld [smem:[#allocation17_spill]] }
 0x53c   : > { %1181 = vrot.lane.b32.xlu1 %v2881_v46, %s2602_s14 }
 0x53e   : > { %p3215_p5 = scmp.ne.s32.totalorder %s3212_s18, 0 }
 0x5a0   : > { %v1002_v62 = vpop.xlane.xlu0 %1001 }
 0x5a1   : > { %v1006_v63 = vsub.f32 %v945_v47, %v1002_v62 }
 0x5a3   : > { %v1008_v3 = vmul.f32 1.442695, %v1006_v63 }
 0x5a5   : > { %2403 = vpow2.f32 %v1008_v3 }
 0x5a8   : > { %v1005_v4 = vpop.xlane.xlu1 %1004 }
 0x5a9   : > { %v1007_v5 = vsub.f32 %v995_v56, %v1005_v4 }
 0x5ab   : > { %v1010_v6 = vmul.f32 1.442695, %v1007_v5 }
 0x5ac   : > { %v1073_v7 = vpop.permute.xlu1 %1072 }
 0x5ad   : > { %2405 = vpow2.f32 %v1010_v6  ;;  %v1078_v8 = vsel %vm806_vm5, %v1073_v7, 0 }
 0x5ae   : > { %2202 = vmatpush3.bf16.msra.mxu0 %v1078_v8 }
 0x5af   : > { %2213 = vmatprep.subr.bf16.mxu0 %v2594_v9 }
 0x5b0   : > { %v1134_v20 = vpop.permute.xlu1 %1133 }
 0x5b1   : > { %v1139_v22 = vsel %vm682_vm2, %v1134_v20, 0 }
 0x5b2   : > { %v2404_v10 = vpop.eup %2403 }
 0x5b3   : > { %v1012_v11 = vsel %vm682_vm2, %v2404_v10, 0.0 }
 0x5b4   : > { %1013 = vadd.xlane.f32.xlu0 %v1012_v11  ;;  %v1184_v25 = vpop.permute.xlu1 %1183 }
 0x5b5   : > { %v1189_v28 = vsel %vm682_vm2, %v1184_v25, 0 }
 0x5b8   : > { %v1182_v29 = vpop.permute.xlu1 %1181 }
 0x5ba   : > { %v2406_v12 = vpop.eup %2405 }
 0x5bb   : > { %v1015_v13 = vsel %vm682_vm2, %v2406_v12, 0.0 }
 0x5bc   : > { %1016 = vadd.xlane.f32.xlu0 %v1015_v13 }
 0x5d2   : > { %1024 = vrot.lane.b32.xlu0 %v2878_v42, %s2600_s24  ;;  %s2044_s24 = sshll.u32 %s2818_s9, 4 }
 0x5d6   : > { %1131 = vrot.lane.b32.xlu0 %v2878_v42, %s2602_s14  ;;  %s2100_s14 = sshll.u32 %s2708_s17, 8  ;;  %s1915_s17 = scalar_lea.sflag [#allocation5], %s2818_s9 }
 0x63d   : > { %v1014_v14 = vpop.xlane.xlu0 %1013 }
 0x63e   : > { %2407 = vrcp.f32 %v1014_v14 }
 0x645   : > { %v1017_v15 = vpop.xlane.xlu0 %1016 }
 0x646   : > { %2409 = vrcp.f32 %v1017_v15 }
 0x649   : > { %v1025_v16 = vpop.permute.xlu0 %1024 }
 0x64a   : > { %v1030_v17 = vsel %vm806_vm5, %v1025_v16, 0 }
 0x64b   : > { %v2408_v18 = vpop.eup %2407  ;;  %2196 = vmatpush3.bf16.msra.mxu1 %v1030_v17 }
 0x64c   : > { %2207 = vmatprep.subr.bf16.mxu1 %v2594_v9  ;;  %v1020_v19 = vmul.f32 %v2408_v18, %v2404_v10 }
 0x64d   : > { %v1132_v27 = vpop.permute.xlu0 %1131 }
 0x64e   : > { %v1022_v21 = vpack.c.bf16 %v1020_v19, %v1020_v19 }
 0x650   : > { %2198 = vmatmul.mubr.msk.bf16.vlgmr.msra.gmra.mxu1 %vm682_vm2, %v1022_v21 }
 0x651   : > { %2208 = vmatpush3.bf16.xpose.msra.mxu1 %v1139_v22  ;;  %2209 = vmatprep.mubr.msk.bf16.mxu1 %vm2595_vm1, %v2594_v9 }
 0x652   : > { %2219 = vmatprep.subr.bf16.mxu1 %v2594_v9 }
 0x653   : > { %v2410_v23 = vpop.eup %2409 }
 0x654   : > { %v1021_v24 = vmul.f32 %v2410_v23, %v2406_v12 }
 0x656   : > { %v1023_v26 = vpack.c.bf16 %v1021_v24, %v1021_v24 }
 0x658   : > { %2204 = vmatmul.mubr.msk.bf16.vlgmr.msra.gmra.mxu0 %vm682_vm2, %v1023_v26  ;;  %2210 = vmatmul.mubr.msk.bf16.vlgmr.msra.gmra.mxu1 %vm682_vm2, %v1132_v27 }
 0x659   : > { %2214 = vmatpush3.bf16.xpose.msra.mxu0 %v1189_v28  ;;  %2215 = vmatprep.mubr.msk.bf16.mxu0 %vm2595_vm1, %v2594_v9 }
 0x65a   : > { %2225 = vmatprep.subr.bf16.mxu0 %v2594_v9  ;;  %2221 = vmatprep.mubr.msk.bf16.mxu1 %vm2595_vm1, %v2594_v9 }
 0x660   : > { %2216 = vmatmul.mubr.msk.bf16.vlgmr.msra.gmra.mxu0 %vm682_vm2, %v1182_v29 }
 0x661   : > { %2227 = vmatprep.mubr.msk.bf16.mxu0 %vm2595_vm1, %v2594_v9 }
 0x710   : > { %v2970_v30 = vpop.f32.mrf.mxu1 }
 0x712   : > { %v2199_v31 = vpop.f32.mrf.mxu1 }
 0x714   : > { %v1069_v32 = vpop.f32.mrf.mxu1 }
 0x716   : > { %v2200_v33 = vpop.f32.mrf.mxu1 }
 0x718   : > { %v2972_v34 = vpop.f32.mrf.mxu0  ;;  %v1175_v35 = vpop.f32.mrf.mxu1 }
 0x719   : > { %v1176_v36 = vadd.f32 %v1175_v35, %v2899_v57 }
 0x71a   : > { %v2205_v37 = vpop.f32.mrf.mxu0  ;;  %v2211_v38 = vpop.f32.mrf.mxu1 }
 0x71b   : > { %v1231_v39 = vsel %vm682_vm2, %v1176_v36, -inf }
 0x71c   : > { %1232 = vmax.xlane.f32.xlu0 %v1231_v39  ;;  %v1117_v40 = vpop.f32.mrf.mxu0  ;;  %v1178_v41 = vpop.f32.mrf.mxu1 }
 0x71e   : > { %v2206_v43 = vpop.f32.mrf.mxu0  ;;  %v2212_v44 = vpop.f32.mrf.mxu1 }
 0x720   : > { %v1225_v45 = vpop.f32.mrf.mxu0 }
 0x721   : > { %v1226_v47 = vadd.f32 %v1225_v45, %v2904_v2 }
 0x722   : > { %v2217_v48 = vpop.f32.mrf.mxu0 }
 0x723   : > { %v1234_v49 = vsel %vm682_vm2, %v1226_v47, -inf }
 0x724   : > { %1235 = vmax.xlane.f32.xlu1 %v1234_v49  ;;  %v1228_v50 = vpop.f32.mrf.mxu0 }
 0x726   : > { %v2218_v51 = vpop.f32.mrf.mxu0 }
 0x735   : > { %1303 = vrot.lane.b32.xlu1 %v2881_v46, %s2603_s19 }
 0x739   : > { %1364 = vrot.lane.b32.xlu1 %v2878_v42, %s2604_s26 }
 0x73d   : > { %1414 = vrot.lane.b32.xlu1 %v2881_v46, %s2604_s26 }
 0x741   : > { %1412 = vrot.lane.b32.xlu1 %v2881_v46, %s2605_s29 }
 0x7a5   : > { %v1233_v52 = vpop.xlane.xlu0 %1232 }
 0x7a6   : > { %v1237_v53 = vsub.f32 %v1176_v36, %v1233_v52 }
 0x7a8   : > { %v1239_v54 = vmul.f32 1.442695, %v1237_v53 }
 0x7aa   : > { %2411 = vpow2.f32 %v1239_v54 }
 0x7ad   : > { %v1236_v55 = vpop.xlane.xlu1 %1235 }
 0x7ae   : > { %v1238_v56 = vsub.f32 %v1226_v47, %v1236_v55 }
 0x7b0   : > { %v1241_v58 = vmul.f32 1.442695, %v1238_v56 }
 0x7b1   : > { %v1304_v59 = vpop.permute.xlu1 %1303 }
 0x7b2   : > { %2413 = vpow2.f32 %v1241_v58  ;;  %v1309_v60 = vsel %vm806_vm5, %v1304_v59, 0 }
 0x7b3   : > { %2226 = vmatpush3.bf16.msra.mxu0 %v1309_v60 }
 0x7b4   : > { %2237 = vmatprep.subr.bf16.mxu0 %v2594_v9 }
 0x7b5   : > { %v1365_v11 = vpop.permute.xlu1 %1364 }
 0x7b6   : > { %v1370_v13 = vsel %vm682_vm2, %v1365_v11, 0 }
 0x7b7   : > { %v2412_v61 = vpop.eup %2411 }
 0x7b8   : > { %v1243_v62 = vsel %vm682_vm2, %v2412_v61, 0.0 }
 0x7b9   : > { %1244 = vadd.xlane.f32.xlu0 %v1243_v62  ;;  %v1415_v16 = vpop.permute.xlu1 %1414 }
 0x7ba   : > { %v1420_v19 = vsel %vm682_vm2, %v1415_v16, 0 }
 0x7bd   : > { %v1413_v20 = vpop.permute.xlu1 %1412 }
 0x7bf   : > { %v2414_v63 = vpop.eup %2413 }
 0x7c0   : > { %v1246_v3 = vsel %vm682_vm2, %v2414_v63, 0.0 }
 0x7c1   : > { %1247 = vadd.xlane.f32.xlu0 %v1246_v3 }
 0x7d7   : > { %1255 = vrot.lane.b32.xlu0 %v2878_v42, %s2603_s19  ;;  %s526_s19 = scalar_lea.vmem [#allocation9], %s2044_s24 }
 0x7d8   : > { %s1928_s26 = sshll.u32 %s526_s19, 4  ;;  %s3119_s26 = int_to_ptr.vmem [resolvable:$true] %s1928_s26 }
 0x7d9   : > { %s2519_s22 = scalar_lea.vmem %s3119_s26, 256 }
 0x7da   : > { %p2520_p4 = scmp.ne.s32.totalorder %s3119_s26, %s2519_s22 }
 0x7db   : > { %1362 = vrot.lane.b32.xlu0 %v2878_v42, %s2605_s29 }
 0x7dc   : > { %p2521_p9 = pnand %p2520_p4, %p3215_p5 }
 0x7de   : > { %p2522_p10 = pneg %p2521_p9 }
 0x842   : > { %v1245_v4 = vpop.xlane.xlu0 %1244 }
 0x843   : > { %2415 = vrcp.f32 %v1245_v4 }
 0x84a   : > { %v1248_v5 = vpop.xlane.xlu0 %1247 }
 0x84b   : > { %2417 = vrcp.f32 %v1248_v5  ;;  %v2379_v5 = vld [vmem:[%s3170_s6 + $0x8] sm:$0xff]  }
 0x84e   : > { %v1256_v6 = vpop.permute.xlu0 %1255 }
 0x84f   : > { %v1261_v7 = vsel %vm806_vm5, %v1256_v6, 0  ;;  %v2380_v6 = vld [vmem:[%s3170_s6] sm:$0xff]  }
 0x850   : > { %v2416_v8 = vpop.eup %2415  ;;  %2220 = vmatpush3.bf16.msra.mxu1 %v1261_v7 }
 0x851   : > { %2231 = vmatprep.subr.bf16.mxu1 %v2594_v9  ;;  %v1251_v10 = vmul.f32 %v2416_v8, %v2412_v61 }
 0x852   : > { %v1363_v18 = vpop.permute.xlu0 %1362 }
 0x853   : > { %v1253_v12 = vpack.c.bf16 %v1251_v10, %v1251_v10 }
 0x855   : > { %2222 = vmatmul.mubr.msk.bf16.vlgmr.msra.gmra.mxu1 %vm682_vm2, %v1253_v12 }
 0x856   : > { %2232 = vmatpush3.bf16.xpose.msra.mxu1 %v1370_v13  ;;  %2233 = vmatprep.mubr.msk.bf16.mxu1 %vm2595_vm1, %v2594_v9 }
 0x857   : > { %2243 = vmatprep.subr.bf16.mxu1 %v2594_v9 }
 0x858   : > { %v2418_v14 = vpop.eup %2417 }
 0x859   : > { %v1252_v15 = vmul.f32 %v2418_v14, %v2414_v63 }
 0x85b   : > { %v1254_v17 = vpack.c.bf16 %v1252_v15, %v1252_v15 }
 0x85d   : > { %2228 = vmatmul.mubr.msk.bf16.vlgmr.msra.gmra.mxu0 %vm682_vm2, %v1254_v17  ;;  %2234 = vmatmul.mubr.msk.bf16.vlgmr.msra.gmra.mxu1 %vm682_vm2, %v1363_v18 }
 0x85e   : > { %2238 = vmatpush3.bf16.xpose.msra.mxu0 %v1420_v19  ;;  %2239 = vmatprep.mubr.msk.bf16.mxu0 %vm2595_vm1, %v2594_v9 }
 0x85f   : > { %2249 = vmatprep.subr.bf16.mxu0 %v2594_v9  ;;  %2245 = vmatprep.mubr.msk.bf16.mxu1 %vm2595_vm1, %v2594_v9 }
 0x865   : > { %2240 = vmatmul.mubr.msk.bf16.vlgmr.msra.gmra.mxu0 %vm682_vm2, %v1413_v20 }
 0x866   : > { %2251 = vmatprep.mubr.msk.bf16.mxu0 %vm2595_vm1, %v2594_v9 }
 0x915   : > { %v1297_v21 = vpop.f32.mrf.mxu1 }
 0x917   : > { %v2223_v22 = vpop.f32.mrf.mxu1 }
 0x919   : > { %v1300_v23 = vpop.f32.mrf.mxu1 }
 0x91b   : > { %v2224_v24 = vpop.f32.mrf.mxu1 }
 0x91d   : > { %v1345_v25 = vpop.f32.mrf.mxu0  ;;  %v1406_v26 = vpop.f32.mrf.mxu1 }
 0x91e   : > { %v1407_v27 = vadd.f32 %v1406_v26, %v2899_v57 }
 0x91f   : > { %v2229_v28 = vpop.f32.mrf.mxu0  ;;  %v2235_v29 = vpop.f32.mrf.mxu1 }
 0x920   : > { %v1462_v31 = vsel %vm682_vm2, %v1407_v27, -inf }
 0x921   : > { %1463 = vmax.xlane.f32.xlu0 %v1462_v31  ;;  %v1348_v32 = vpop.f32.mrf.mxu0  ;;  %v1409_v33 = vpop.f32.mrf.mxu1 }
 0x923   : > { %v2230_v35 = vpop.f32.mrf.mxu0  ;;  %v2236_v36 = vpop.f32.mrf.mxu1 }
 0x925   : > { %v1456_v37 = vpop.f32.mrf.mxu0 }
 0x926   : > { %v1457_v38 = vadd.f32 %v1456_v37, %v2904_v2  ;;  %v2381_v37 = vld [vmem:[%s3174_s10 + $0x8] sm:$0xff]  }
 0x927   : > { %v2241_v39 = vpop.f32.mrf.mxu0 }
 0x928   : > { %v1465_v40 = vsel %vm682_vm2, %v1457_v38, -inf }
 0x929   : > { %1466 = vmax.xlane.f32.xlu1 %v1465_v40  ;;  %v1459_v41 = vpop.f32.mrf.mxu0 }
 0x92b   : > { %v2242_v43 = vpop.f32.mrf.mxu0 }
 0x93a   : > { %1534 = vrot.lane.b32.xlu1 %v2881_v46, %s2606_s28 }
 0x93e   : > { %1122 = vrot.lane.b32.xlu1 %v2970_v30, %s2607_s23 }
 0x942   : > { %1124 = vrot.lane.b32.xlu1 %v2972_v34, %s2607_s23 }
 0x946   : > { %1355 = vrot.lane.b32.xlu1 %v1345_v25, %s2608_s15 }
 0x9aa   : > { %v1464_v57 = vpop.xlane.xlu0 %1463 }
 0x9ab   : > { %v1468_v2 = vsub.f32 %v1407_v27, %v1464_v57 }
 0x9ad   : > { %v1470_v44 = vmul.f32 1.442695, %v1468_v2 }
 0x9af   : > { %2419 = vpow2.f32 %v1470_v44 }
 0x9b2   : > { %v1467_v45 = vpop.xlane.xlu1 %1466 }
 0x9b3   : > { %v1469_v47 = vsub.f32 %v1457_v38, %v1467_v45 }
 0x9b5   : > { %v1472_v48 = vmul.f32 1.442695, %v1469_v47 }
 0x9b6   : > { %v1535_v49 = vpop.permute.xlu1 %1534 }
 0x9b7   : > { %2421 = vpow2.f32 %v1472_v48  ;;  %v1540_v46 = vsel %vm806_vm5, %v1535_v49, 0 }
 0x9b8   : > { %2250 = vmatpush3.bf16.msra.mxu0 %v1540_v46 }
 0x9b9   : > { %2263 = vmatprep.subr.bf16.mxu0 %v2594_v9 }
 0x9ba   : > { %v1123_v30 = vpop.permute.xlu1 %1122 }
 0x9bb   : > { %1129 = vst.msk [vmem:[#allocation2] sm:$0xff] %vm1128_vm6, %v1123_v30 }
 0x9bc   : > { %v2420_v34 = vpop.eup %2419 }
 0x9bd   : > { %v1474_v50 = vsel %vm682_vm2, %v2420_v34, 0.0 }
 0x9be   : > { %1475 = vadd.xlane.f32.xlu0 %v1474_v50  ;;  %v1125_v51 = vpop.permute.xlu1 %1124 }
 0x9bf   : > { %1130 = vst.msk [vmem:[#allocation2 + $0x8] sm:$0xff] %vm1128_vm6, %v1125_v51 }
 0x9c2   : > { %v1356_v52 = vpop.permute.xlu1 %1355 }
 0x9c3   : > { %1361 = vst.msk [vmem:[#allocation2 + $0x8] sm:$0xff] %vm1359_vm7, %v1356_v52  ;;  %v2075_v52 = vld [vmem:[%s3172_s8] ss:$0 sm:$0xff] }
 0x9c4   : > { %v2422_v53 = vpop.eup %2421 }
 0x9c5   : > { %v1477_v54 = vsel %vm682_vm2, %v2422_v53, 0.0 }
 0x9c6   : > { %1478 = vadd.xlane.f32.xlu0 %v1477_v54 }
 0x9dc   : > { %1486 = vrot.lane.b32.xlu0 %v2878_v42, %s2606_s28 }
 0x9e0   : > { %1353 = vrot.lane.b32.xlu0 %v1297_v21, %s2608_s15  ;;  %v2071_v21 = vld [vmem:[%s3171_s7] ss:$0 sm:$0xff]  ;;  %s3213_s15 = sld [smem:[#allocation20_spill]] }
 0x9e6   : > { %s3214_s27 = smov %s3213_s15  ;;  %s3116_s21 = scalar_lea.hbm %s3213_s15, %s2100_s14 }
 0xa47   : > { %v1476_v55 = vpop.xlane.xlu0 %1475 }
 0xa48   : > { %2423 = vrcp.f32 %v1476_v55 }
 0xa4f   : > { %v1479_v56 = vpop.xlane.xlu0 %1478 }
 0xa50   : > { %2425 = vrcp.f32 %v1479_v56 }
 0xa53   : > { %v1487_v58 = vpop.permute.xlu0 %1486 }
 0xa54   : > { %v1492_v59 = vsel %vm806_vm5, %v1487_v58, 0  ;;  %v2076_v58 = vld [vmem:[#allocation6] ss:$0 sm:$0xff] }
 0xa55   : > { %v2424_v60 = vpop.eup %2423  ;;  %2244 = vmatpush3.bf16.msra.mxu1 %v1492_v59 }
 0xa56   : > { %v1482_v61 = vmul.f32 %v2424_v60, %v2420_v34  ;;  %2255 = vmatprep.subr.bf16.mxu1 %v2594_v9 }
 0xa57   : > { %v1354_v62 = vpop.permute.xlu0 %1353 }
 0xa58   : > { %1360 = vst.msk [vmem:[#allocation2] sm:$0xff] %vm1359_vm7, %v1354_v62  ;;  %v1484_v63 = vpack.c.bf16 %v1482_v61, %v1482_v61 }
 0xa5a   : > { %2246 = vmatmul.mubr.msk.bf16.vlgmr.msra.gmra.mxu1 %vm682_vm2, %v1484_v63  ;;  %v2383_v63 = vld [vmem:[%s3176_s12 + $0x38] sm:$0xff]  }
 0xa5b   : > { %2259 = vmatprep.mubr.msk.bf16.mxu1 %vm2595_vm1, %v2594_v9  ;;  %2256 = vmatpush3.bf16.msra.mxu1 %v2379_v5  ;;  %v2387_v5 = vld [vmem:[%s3176_s12 + $0x18] sm:$0xff]  }
 0xa5c   : > { %2257 = vmatprep.subr.bf16.mxu1 %v2594_v9 }
 0xa5d   : > { %v2426_v42 = vpop.eup %2425 }
 0xa5e   : > { %v1483_v3 = vmul.f32 %v2426_v42, %v2422_v53  ;;  %v2384_v42 = vld [vmem:[%s3176_s12 + $0x30] sm:$0xff]  }
 0xa5f   : > { %2258 = vmatpush3.bf16.msra.mxu1 %v2380_v6  ;;  %v2388_v6 = vld [vmem:[%s3176_s12 + $0x10] sm:$0xff]  }
 0xa60   : > { %v1485_v4 = vpack.c.bf16 %v1483_v3, %v1483_v3  ;;  %2271 = vmatprep.subr.bf16.mxu1 %v2594_v9  ;;  %v2385_v3 = vld [vmem:[%s3176_s12 + $0x28] sm:$0xff]  }
 0xa62   : > { %2252 = vmatmul.mubr.msk.bf16.vlgmr.msra.gmra.mxu0 %vm682_vm2, %v1485_v4  ;;  %v2386_v4 = vld [vmem:[%s3176_s12 + $0x20] sm:$0xff]  }
 0xa63   : > { %2267 = vmatprep.mubr.msk.bf16.mxu0 %vm2595_vm1, %v2594_v9  ;;  %2264 = vmatpush3.bf16.msra.mxu0 %v2381_v37 }
 0xa64   : > { %2265 = vmatprep.subr.bf16.mxu0 %v2594_v9 }
 0xb1a   : > { %v1528_v7 = vpop.f32.mrf.mxu1 }
 0xb1b   : > { %1584 = vrot.lane.b32.xlu0 %v1528_v7, %s2609_s20  ;;  %v2389_v7 = vld [vmem:[%s3176_s12 + $0x8] sm:$0xff]  }
 0xb1c   : > { %v2247_v8 = vpop.f32.mrf.mxu1 }
 0xb1d   : > { %v2390_v8 = vld [vmem:[%s3176_s12] sm:$0xff]  }
 0xb1e   : > { %v1531_v10 = vpop.f32.mrf.mxu1 }
 0xb1f   : > { %v2077_v10 = vld [vmem:[#allocation8] ss:$0 sm:$0xff] }
 0xb20   : > { %v2248_v11 = vpop.f32.mrf.mxu1 }
 0xb22   : > { %v1576_v12 = vpop.f32.mrf.mxu0 }
 0xb23   : > { %1586 = vrot.lane.b32.xlu1 %v1576_v12, %s2609_s20  ;;  %s2523_s20 = sshll.u32 %s2610_s25, 4  ;;  %s2524_s20 = int_to_ptr.vmem [resolvable:$false] %s2523_s20 }
 0xb24   : > { %v2253_v13 = vpop.f32.mrf.mxu0  ;;  %s2525_s24 = scalar_lea.vmem %s2524_s20, 512  ;;  %p2526_p1 = scmp.lt.s32.totalorder %s3119_s26, %s2524_s20 }
 0xb25   : > { %p2527_p12 = scmp.lt.s32.totalorder %s2525_s24, %s2519_s22 }
 0xb26   : > { %v1579_v14 = vpop.f32.mrf.mxu0 }
 0xb27   : > { %p2528_p11 = por %p2527_p12, %p2526_p1 }
 0xb28   : > { %v2254_v15 = vpop.f32.mrf.mxu0 }
 0xb29   : > { %p2529_p8 = pnand %p2528_p11, %p2522_p10 }
 0xb8d   : > { %v1585_v16 = vpop.permute.xlu0 %1584 }
 0xb8e   : > { %1591 = vst.msk [vmem:[#allocation2] sm:$0xff] %vm1590_vm8, %v1585_v16 }
 0xb95   : > { %v1587_v17 = vpop.permute.xlu1 %1586  ;;  %v1593_v18 = vld [vmem:[#allocation2] sm:$0xff] }
 0xb96   : > { %1592 = vst.msk [vmem:[#allocation2 + $0x8] sm:$0xff] %vm1590_vm8, %v1587_v17 }
 0xb9d   : > { %v1594_v19 = vld [vmem:[#allocation2 + $0x8] sm:$0xff] }
 0xb9e   : > { %v1595_v20 = vpack.c.bf16 %v1594_v19, %v1593_v18 }
 0xba0   : > { %2260 = vmatmul.mubr.msk.bf16.vlgmr.msra.gmra.mxu1 %vm546_vm0, %v1595_v20 }
 0xba1   : > { %2287 = vmatprep.mubr.msk.bf16.mxu1 %vm2595_vm1, %v2594_v9  ;;  %2272 = vmatpush3.bf16.msra.mxu1 %v2383_v63 }
 0xba2   : > { %2273 = vmatprep.subr.bf16.mxu1 %v2594_v9 }
 0xba5   : > { %2274 = vmatpush3.bf16.msra.mxu1 %v2384_v42 }
 0xba6   : > { %2275 = vmatprep.subr.bf16.mxu1 %v2594_v9 }
 0xba9   : > { %2276 = vmatpush3.bf16.msra.mxu1 %v2385_v3 }
 0xbaa   : > { %2277 = vmatprep.subr.bf16.mxu1 %v2594_v9 }
 0xbad   : > { %2278 = vmatpush3.bf16.msra.mxu1 %v2386_v4 }
 0xbae   : > { %2279 = vmatprep.subr.bf16.mxu1 %v2594_v9 }
 0xbb1   : > { %2280 = vmatpush3.bf16.msra.mxu1 %v2387_v5 }
 0xbb2   : > { %2281 = vmatprep.subr.bf16.mxu1 %v2594_v9 }
 0xbb5   : > { %2282 = vmatpush3.bf16.msra.mxu1 %v2388_v6 }
 0xbb6   : > { %2283 = vmatprep.subr.bf16.mxu1 %v2594_v9 }
 0xbb9   : > { %2284 = vmatpush3.bf16.msra.mxu1 %v2389_v7 }
 0xbba   : > { %2285 = vmatprep.subr.bf16.mxu1 %v2594_v9 }
 0xbbd   : > { %2286 = vmatpush3.bf16.msra.mxu1 %v2390_v8 }
 0xc60   : > { %v1656_v22 = vpop.f32.mrf.mxu1 }
 0xc61   : > { %v1657_v23 = vadd.f32 %v2071_v21, %v1656_v22 }
 0xc62   : > { %v2261_v24 = vpop.f32.mrf.mxu1 }
 0xc63   : > { %v3047_v25 = vadd.f32 %v1657_v23, %v2836_v0 }
 0xc64   : > { %v1659_v26 = vpop.f32.mrf.mxu1 }
 0xc65   : > { %v1660_v27 = vadd.f32 %v2071_v21, %v1659_v26  ;;  %v1667_v28 = vsel %vm546_vm0, %v3047_v25, 0.0  ;;  %v1675_v29 = vmul.f32 %v3047_v25, %v3047_v25 }
 0xc66   : > { %1668 = vadd.xlane.f32.xlu0 %v1667_v28  ;;  %v2262_v31 = vpop.f32.mrf.mxu1 }
 0xc67   : > { %v3054_v32 = vadd.f32 %v1660_v27, %v2838_v1  ;;  %v1677_v33 = vsel %vm546_vm0, %v1675_v29, 0.0  ;;  %v2382_v1 = vld [vmem:[%s3174_s10] sm:$0xff]  }
 0xc68   : > { %2266 = vmatpush3.bf16.msra.mxu0 %v2382_v1  ;;  %v2083_v31 = vld [vmem:[%s3177_s13] ss:$0 sm:$0xff] }
 0xc69   : > { %v1670_v35 = vsel %vm546_vm0, %v3054_v32, 0.0  ;;  %v1676_v0 = vmul.f32 %v3054_v32, %v3054_v32 }
 0xc6a   : > { %1678 = vadd.xlane.f32.xlu0 %v1677_v33  ;;  %1671 = vadd.xlane.f32.xlu1 %v1670_v35 }
 0xc6b   : > { %v1680_v36 = vsel %vm546_vm0, %v1676_v0, 0.0 }
 0xc6e   : > { %1681 = vadd.xlane.f32.xlu0 %v1680_v36 }
 0xcef   : > { %v1669_v38 = vpop.xlane.xlu0 %1668 }
 0xcf0   : > { %v1673_v39 = vmul.f32 0.03125, %v1669_v38 }
 0xcf2   : > { %v1685_v43 = vmul.f32 %v1673_v39, %v1673_v39  ;;  %v1689_v34 = vsub.f32 %v3047_v25, %v1673_v39 }
 0xcf3   : > { %v1679_v40 = vpop.xlane.xlu0 %1678  ;;  %v1672_v41 = vpop.xlane.xlu1 %1671 }
 0xcf4   : > { %v1683_v57 = vmul.f32 0.03125, %v1679_v40  ;;  %v1674_v2 = vmul.f32 0.03125, %v1672_v41 }
 0xcf6   : > { %v1687_v44 = vsub.f32 %v1683_v57, %v1685_v43  ;;  %v1686_v48 = vmul.f32 %v1674_v2, %v1674_v2  ;;  %v1690_v53 = vsub.f32 %v3054_v32, %v1674_v2 }
 0xcf7   : > { %v1682_v45 = vpop.xlane.xlu0 %1681 }
 0xcf8   : > { %v1691_v47 = vadd.f32 1e-05, %v1687_v44  ;;  %v1684_v49 = vmul.f32 0.03125, %v1682_v45 }
 0xcfa   : > { %2427 = vrsqrt.f32 %v1691_v47  ;;  %v1688_v46 = vsub.f32 %v1684_v49, %v1686_v48 }
 0xcfc   : > { %v1692_v30 = vadd.f32 1e-05, %v1688_v46 }
 0xcfe   : > { %2429 = vrsqrt.f32 %v1692_v30 }
 0xd07   : > { %v2428_v50 = vpop.eup %2427 }
 0xd08   : > { %v1695_v51 = vmul.f32 %v2428_v50, %v1689_v34 }
 0xd0a   : > { %v1703_v56 = vmul.f32 %v2075_v52, %v1695_v51 }
 0xd0b   : > { %v2430_v54 = vpop.eup %2429 }
 0xd0c   : > { %v1696_v55 = vmul.f32 %v2430_v54, %v1690_v53  ;;  %v1711_v60 = vadd.f32 %v2076_v58, %v1703_v56 }
 0xd0e   : > { %v1704_v59 = vmul.f32 %v2075_v52, %v1696_v55 }
 0xd10   : > { %v1712_v61 = vadd.f32 %v2076_v58, %v1704_v59 }
 0xd12   : > { %v1713_v62 = vpack.c.bf16 %v1712_v61, %v1711_v60 }
 0xd14   : > { %2268 = vmatmul.mubr.msk.bf16.vlgmr.msra.gmra.mxu0 %vm546_vm0, %v1713_v62 }
 0xdd4   : > { %v1774_v11 = vpop.f32.mrf.mxu0 }
 0xdd5   : > { %v1775_v12 = vadd.f32 %v2077_v10, %v1774_v11 }
 0xdd6   : > { %v2269_v13 = vpop.f32.mrf.mxu0 }
 0xdd7   : > { %v2081_v14 = vmul.f32 -1.702, %v1775_v12 }
 0xdd8   : > { %v1777_v15 = vpop.f32.mrf.mxu0 }
 0xdd9   : > { %v1785_v16 = vmul.f32 1.442695, %v2081_v14  ;;  %v1778_v17 = vadd.f32 %v2077_v10, %v1777_v15 }
 0xdda   : > { %v2270_v18 = vpop.f32.mrf.mxu0 }
 0xddb   : > { %2431 = vpow2.f32 %v1785_v16  ;;  %v2082_v19 = vmul.f32 -1.702, %v1778_v17 }
 0xddd   : > { %v1787_v20 = vmul.f32 1.442695, %v2082_v19 }
 0xddf   : > { %2433 = vpow2.f32 %v1787_v20 }
 0xde8   : > { %v2432_v9 = vpop.eup %2431 }
 0xde9   : > { %v1789_v21 = vadd.f32 1.0, %v2432_v9 }
 0xdeb   : > { %2435 = vrcp.f32 %v1789_v21 }
 0xdec   : > { %v2434_v22 = vpop.eup %2433 }
 0xded   : > { %v1790_v23 = vadd.f32 1.0, %v2434_v22 }
 0xdef   : > { %2437 = vrcp.f32 %v1790_v23 }
 0xdf8   : > { %v2436_v24 = vpop.eup %2435 }
 0xdf9   : > { %v1795_v27 = vmul.f32 %v2436_v24, %v1775_v12 }
 0xdfc   : > { %v2438_v26 = vpop.eup %2437 }
 0xdfd   : > { %v1796_v28 = vmul.f32 %v2438_v26, %v1778_v17 }
 0xdff   : > { %v1797_v29 = vpack.c.bf16 %v1796_v28, %v1795_v27 }
 0xe01   : > { %2288 = vmatmul.mubr.bf16.vlgmr.msra.gmra.mxu1 %v1797_v29 }
 0xec1   : > { %v1903_v33 = vpop.f32.mrf.mxu1 }
 0xec2   : > { %v1904_v35 = vadd.f32 %v2083_v31, %v1903_v33 }
 0xec3   : > { %v2289_v0 = vpop.f32.mrf.mxu1 }
 0xec4   : > { %v1910_v36 = vadd.f32 %v1904_v35, %v3047_v25 }
 0xec5   : > { %v1906_v37 = vpop.f32.mrf.mxu1 }
 0xec6   : > { %1912 = vst.msk [vmem:[%s526_s19] sm:$0xff] %vm546_vm0, %v1910_v36  ;;  %v1907_v1 = vadd.f32 %v2083_v31, %v1906_v37 }
 0xec7   : > { %v2290_v38 = vpop.f32.mrf.mxu1 }
 0xec8   : > { %v1911_v39 = vadd.f32 %v1907_v1, %v3054_v32 }
 0xeca   : > { %1913 = vst.msk [vmem:[%s526_s19 + $0x8] sm:$0xff] %vm546_vm0, %v1911_v39 }
 0xecb   : > { %2532 = shalt.err (!%p2529_p8)
}
 0xecc   : > { %s2533_s14 = scalar_lea.hbm %s3116_s21, 256  ;;  %s2537_s28 = scalar_lea.hbm %s3214_s27, 512 }
 0xecd   : > { %p2534_p2 = scmp.ne.s32.totalorder %s3116_s21, %s2533_s14  ;;  %p2538_p13 = scmp.lt.s32.totalorder %s3116_s21, %s3214_s27 }
 0xece   : > { %p2539_p3 = scmp.lt.s32.totalorder %s2537_s28, %s2533_s14 }
 0xecf   : > { %p2535_p7 = pnand %p2534_p2, %p3215_p5 }
 0xed0   : > { %p2540_p0 = por %p2539_p3, %p2538_p13 }
 0xed1   : > { %p2536_p6 = pneg %p2535_p7 }
 0xed3   : > { %p2541_p4 = pnand %p2540_p0, %p2536_p6 }
 0xed5   : > { %2544 = shalt.err (!%p2541_p4)
}
 0xed6   : > { %s2611_s22 = smov 128  }
 0xed7   : > { %2301 = dma.vmem_to_hbm [thread:$0]  (%p3215_p5), %s3119_s26, 256, %s3116_s21, %s1915_s17, %s2611_s22, %s2611_s22, %s2607_s23  }
 0xed8 PF: > { %s3216_s20 = sld [smem:[#allocation13_spill]]  ;;  %p3219_p10 = scmp.ge.s32.totalorder %s2587_s16, 2 }
 0xed9   : > { %s3217_s24 = sld [smem:[#allocation18_spill]] }
 0xede   : > { %s1943_s19 = sand.u32 1, %s3216_s20  }
 0xedf   : > { %p3218_p9 = scmp.ne.s32.totalorder %s3217_s24, 0  ;;  %s1944_s14 = scalar_lea.sflag [#allocation5], %s1943_s19 }
 0xee1   : > { %p2315_p1 = pnand %p3219_p10, %p3218_p9 }
 0xee3   : > { %p2316_p12 = pneg %p2315_p1 }
 0xee5   : > { %2570 = dma.done.wait (%p2316_p12), %s1944_s14, 256  }
 0xee6   : > { %2572 = vsyncadd (%p2316_p12), %s1944_s14, 4294967040  ;;  %s3220_s16 = sld [smem:[#allocation15_spill]]  ;;  %s3223_s29 = smov %s2579_s30 }
 0xee7   : > { %s3221_s18 = sld [smem:[#allocation14_spill]] }
 0xee8   : > { %s3222_s15 = sld [smem:[#allocation16_spill]] }
 0xeec   : > { %p28_p11 = scmp.ge.s32.totalorder %s3220_s16, 4  }
 0xeed   : > { %s3224_s30 = smov %s3221_s18 }
 0xeee   :  { %30 = sbr.rel (!%p28_p11) target bundleno = 9 (0x9), region = 132 }
 0xef3   :  { %1949 = vsyncpa [#allocation4], 1 }
 0xef4   :  { %1951 = vsyncpa [#allocation4 + $0x1], 1 }
 0xef5   :  { %1952 = vsyncpa [#allocation7], 1 }
 0xef6   :  { %1953 = vsyncpa [#allocation5], 1 }
 0xef7   :  { %1955 = vsyncpa [#allocation5 + $0x1], 1 }

</bundles_post_ra>
